<compile_context>
chip_gen: v5e
topology: v5e:2x2
jax: 0.10.0
libtpu: 0.0.40
codegen_flags: <defaults>
</compile_context>

<pallas_src>
import jax
import jax.numpy as jnp
from jax.experimental import pallas as pl
from jax.experimental.pallas import tpu as pltpu


def _resblock_kernel(x_ref, w1_ref, b1_ref, w2_ref, b2_ref, o_ref, xpad_ref, mid_ref):
    # x_ref  : (H, W, C)      unpadded input image, f32, VMEM
    # w1_ref : (3, 3*C, C)    conv1 weights, tap-row major, BN1 scale folded in, bf16
    # b1_ref : (1, C)         folded BN1 bias, f32
    # w2_ref : (3, 3*C, C)    conv2 weights, BN2 scale folded in, bf16
    # b2_ref : (1, C)         folded BN2 bias, f32
    # o_ref  : (H, W, C)      output, f32, VMEM
    # xpad_ref / mid_ref : (H+2, W+2, C) f32 scratch = zero-padded conv1/conv2 inputs
    H, W, C = o_ref.shape

    # Zero only the 1-pixel border ring of both padded scratches, every grid step.
    # The interiors are fully overwritten below, so the ring is all that ever needs
    # zeros; doing it unconditionally is megacore-safe (no program_id gate needed).
    zrow = jnp.zeros((1, W + 2, C), jnp.float32)
    zcol = jnp.zeros((H + 2, 1, C), jnp.float32)
    for ref in (xpad_ref, mid_ref):
        ref[0:1, :, :] = zrow
        ref[H + 1:H + 2, :, :] = zrow
        ref[:, 0:1, :] = zcol
        ref[:, W + 1:W + 2, :] = zcol

    # In-kernel zero padding: copy the unpadded image into the scratch interior.
    x = x_ref[...]                                     # (H, W, C) f32
    xpad_ref[1:H + 1, 1:W + 1, :] = x

    def conv3x3(pad_ref, w_ref, acc):
        # 3x3 conv as 3 MXU matmuls with K = 3*C: for each tap row dy the three
        # along-W taps are grouped into one (H*W, 3*C) patch (channels-last makes the
        # dx-shifted windows lane-contiguous), contracted against a (3*C, C) weight
        # block.  Operands cast to bf16; accumulation stays f32.
        for dy in range(3):                            # fixed tap-row loop, unrolled
            row = pad_ref[dy:dy + H, :, :]             # (H, W+2, C) single load
            patch = jnp.concatenate(
                [row[:, 0:W, :], row[:, 1:W + 1, :], row[:, 2:W + 2, :]], axis=2,
            ).reshape(H * W, 3 * C).astype(jnp.bfloat16)
            acc = acc + jnp.dot(patch, w_ref[dy],
                                preferred_element_type=jnp.float32)
        return acc

    # ---- conv1 -> BN1 (folded) -> ReLU; BN1 bias folded into the accumulator init.
    acc1 = jnp.broadcast_to(b1_ref[...], (H * W, C)).astype(jnp.float32)
    acc1 = conv3x3(xpad_ref, w1_ref, acc1)
    mid_ref[1:H + 1, 1:W + 1, :] = jnp.maximum(acc1, 0.0).reshape(H, W, C)

    # ---- conv2 -> BN2 (folded); residual + BN2 bias folded into the accumulator init.
    acc2 = x.reshape(H * W, C) + b2_ref[...]
    acc2 = conv3x3(mid_ref, w2_ref, acc2)
    o_ref[...] = jnp.maximum(acc2, 0.0).reshape(H, W, C).astype(o_ref.dtype)


def resblock_pallas(x, w1, s1, b1, w2, s2, b2):
    """x: (N,C,H,W) f32; w1/w2: (C,C,3,3) OIHW; s*/b*: (C,) folded eval-mode BN scale/bias."""
    N, C, H, W = x.shape

    # Layout glue only (no padding here): NCHW -> NHWC.
    x_cl = jnp.transpose(x, (0, 2, 3, 1)).astype(jnp.float32)

    def fold(w, s):
        # OIHW -> (ky, kx, Cin, Cout) -> (3, 3*C, C) with per-Cout BN scale folded in,
        # cast to bf16 for the full-rate MXU path (accumulation stays f32 in-kernel).
        w = w.astype(jnp.float32) * s.astype(jnp.float32)[:, None, None, None]
        w = jnp.transpose(w, (2, 3, 1, 0)).reshape(3, 3 * C, C)
        return w.astype(jnp.bfloat16)

    w1f = fold(w1, s1)
    w2f = fold(w2, s2)
    b1r = b1.astype(jnp.float32).reshape(1, C)
    b2r = b2.astype(jnp.float32).reshape(1, C)

    out_cl = pl.pallas_call(
        _resblock_kernel,
        out_shape=jax.ShapeDtypeStruct((N, H, W, C), jnp.float32),
        grid=(N,),
        in_specs=[
            pl.BlockSpec((None, H, W, C), lambda n: (n, 0, 0, 0)),
            # Grid-invariant weights/biases.
            # TODO(synk): at large C, single-buffer these (pipeline_mode=pl.Buffered(1)
            #             or stage once into scratch) to halve their VMEM footprint.
            pl.BlockSpec((3, 3 * C, C), lambda n: (0, 0, 0)),
            pl.BlockSpec((1, C), lambda n: (0, 0)),
            pl.BlockSpec((3, 3 * C, C), lambda n: (0, 0, 0)),
            pl.BlockSpec((1, C), lambda n: (0, 0)),
        ],
        out_specs=pl.BlockSpec((None, H, W, C), lambda n: (n, 0, 0, 0)),
        scratch_shapes=[
            pltpu.VMEM((H + 2, W + 2, C), jnp.float32),   # zero-padded input (conv1)
            pltpu.VMEM((H + 2, W + 2, C), jnp.float32),   # zero-padded mid (conv2)
        ],
        compiler_params=pltpu.CompilerParams(dimension_semantics=("parallel",)),
    )(x_cl, w1f, b1r, w2f, b2r)

    return jnp.transpose(out_cl, (0, 3, 1, 2)).astype(x.dtype)


def resblock_ref(x, w1, g1, be1, m1, v1, w2, g2, be2, m2, v2, eps=1e-5):
    """Pure-JAX reference matching PyTorch eval-mode ResBlock."""
    def conv(h, w):
        return jax.lax.conv_general_dilated(
            h, w, window_strides=(1, 1), padding=((1, 1), (1, 1)),
            dimension_numbers=("NCHW", "OIHW", "NCHW"),
            precision=jax.lax.Precision.HIGHEST)

    def bn(h, g, b, m, v):
        inv = g / jnp.sqrt(v + eps)
        return h * inv[None, :, None, None] + (b - m * inv)[None, :, None, None]

    out = jax.nn.relu(bn(conv(x, w1), g1, be1, m1, v1))
    out = bn(conv(out, w2), g2, be2, m2, v2)
    return jax.nn.relu(out + x)


if __name__ == "__main__":
    N, C, H, W = 2, 4, 16, 16
    eps = 1e-5
    ks = jax.random.split(jax.random.PRNGKey(0), 11)

    x = jax.random.normal(ks[0], (N, C, H, W), jnp.float32)
    w1 = 0.2 * jax.random.normal(ks[1], (C, C, 3, 3), jnp.float32)
    w2 = 0.2 * jax.random.normal(ks[2], (C, C, 3, 3), jnp.float32)
    g1 = 1.0 + 0.1 * jax.random.normal(ks[3], (C,), jnp.float32)
    be1 = 0.1 * jax.random.normal(ks[4], (C,), jnp.float32)
    m1 = 0.1 * jax.random.normal(ks[5], (C,), jnp.float32)
    v1 = 0.5 + jax.random.uniform(ks[6], (C,), jnp.float32)
    g2 = 1.0 + 0.1 * jax.random.normal(ks[7], (C,), jnp.float32)
    be2 = 0.1 * jax.random.normal(ks[8], (C,), jnp.float32)
    m2 = 0.1 * jax.random.normal(ks[9], (C,), jnp.float32)
    v2 = 0.5 + jax.random.uniform(ks[10], (C,), jnp.float32)

    # Fold eval-mode BatchNorm into per-channel scale/bias.
    s1 = g1 / jnp.sqrt(v1 + eps)
    b1 = be1 - m1 * s1
    s2 = g2 / jnp.sqrt(v2 + eps)
    b2 = be2 - m2 * s2

    out = resblock_pallas(x, w1, s1, b1, w2, s2, b2)
    out = jax.block_until_ready(out)

    ref = resblock_ref(x, w1, g1, be1, m1, v1, w2, g2, be2, m2, v2, eps)
    assert out.shape == (N, C, H, W)
    # bf16 matmul inputs (f32 accumulation) -> looser tolerance than pure-f32.
    err = float(jnp.max(jnp.abs(out - ref) / (1.0 + jnp.abs(ref))))
    assert err < 3e-2, f"max normalized err {err}"
    print("KERNEL_OK")
</pallas_src>

<mosaic_0001>
module attributes {stable_mosaic.version = 11 : i64} {
  func.func @_resblock_kernel(%arg0: i32, %arg1: memref<1x16x16x4xf32, #tpu.memory_space<vmem>>, %arg2: memref<3x12x4xbf16, #tpu.memory_space<vmem>>, %arg3: memref<1x4xf32, #tpu.memory_space<vmem>>, %arg4: memref<3x12x4xbf16, #tpu.memory_space<vmem>>, %arg5: memref<1x4xf32, #tpu.memory_space<vmem>>, %arg6: memref<1x16x16x4xf32, #tpu.memory_space<vmem>>, %arg7: memref<18x18x4xf32, #tpu.memory_space<vmem>>, %arg8: memref<18x18x4xf32, #tpu.memory_space<vmem>>) attributes {dimension_semantics = [#tpu.dimension_semantics<parallel>], iteration_bounds = array<i64: 2>, scalar_prefetch = 0 : i64, scratch_operands = 2 : i64, tpu.core_type = #tpu.core_type<tc>, window_params = [{transform_indices = @transform_0, window_bounds = array<i64: 1, 16, 16, 4>}, {pipeline_mode = #tpu.pipeline_mode<synchronous>, transform_indices = @transform_1, window_bounds = array<i64: 3, 12, 4>}, {pipeline_mode = #tpu.pipeline_mode<synchronous>, transform_indices = @transform_2, window_bounds = array<i64: 1, 4>}, {pipeline_mode = #tpu.pipeline_mode<synchronous>, transform_indices = @transform_3, window_bounds = array<i64: 3, 12, 4>}, {pipeline_mode = #tpu.pipeline_mode<synchronous>, transform_indices = @transform_4, window_bounds = array<i64: 1, 4>}, {transform_indices = @transform_5, window_bounds = array<i64: 1, 16, 16, 4>}]} {
    %cst = arith.constant 0.000000e+00 : f32
    %0 = vector.broadcast %cst : f32 to vector<1x18x4xf32>
    %cst_0 = arith.constant 0.000000e+00 : f32
    %1 = vector.broadcast %cst_0 : f32 to vector<18x1x4xf32>
    %c0 = arith.constant 0 : index
    %c0_1 = arith.constant 0 : index
    %c0_2 = arith.constant 0 : index
    %2 = vector.load %arg7[%c0, %c0_1, %c0_2] : memref<18x18x4xf32, #tpu.memory_space<vmem>>, vector<1x18x4xf32>
    tpu.vector_store %arg7[%c0, %c0_1, %c0_2], %0 {strides = array<i32>} : memref<18x18x4xf32, #tpu.memory_space<vmem>>, vector<1x18x4xf32>,
    %c17 = arith.constant 17 : index
    %c0_3 = arith.constant 0 : index
    %c0_4 = arith.constant 0 : index
    %3 = vector.load %arg7[%c17, %c0_3, %c0_4] : memref<18x18x4xf32, #tpu.memory_space<vmem>>, vector<1x18x4xf32>
    tpu.vector_store %arg7[%c17, %c0_3, %c0_4], %0 {strides = array<i32>} : memref<18x18x4xf32, #tpu.memory_space<vmem>>, vector<1x18x4xf32>,
    %c0_5 = arith.constant 0 : index
    %c0_6 = arith.constant 0 : index
    %c0_7 = arith.constant 0 : index
    %4 = vector.load %arg7[%c0_5, %c0_6, %c0_7] : memref<18x18x4xf32, #tpu.memory_space<vmem>>, vector<18x1x4xf32>
    tpu.vector_store %arg7[%c0_5, %c0_6, %c0_7], %1 {strides = array<i32>} : memref<18x18x4xf32, #tpu.memory_space<vmem>>, vector<18x1x4xf32>,
    %c0_8 = arith.constant 0 : index
    %c17_9 = arith.constant 17 : index
    %c0_10 = arith.constant 0 : index
    %5 = vector.load %arg7[%c0_8, %c17_9, %c0_10] : memref<18x18x4xf32, #tpu.memory_space<vmem>>, vector<18x1x4xf32>
    tpu.vector_store %arg7[%c0_8, %c17_9, %c0_10], %1 {strides = array<i32>} : memref<18x18x4xf32, #tpu.memory_space<vmem>>, vector<18x1x4xf32>,
    %c0_11 = arith.constant 0 : index
    %c0_12 = arith.constant 0 : index
    %c0_13 = arith.constant 0 : index
    %6 = vector.load %arg8[%c0_11, %c0_12, %c0_13] : memref<18x18x4xf32, #tpu.memory_space<vmem>>, vector<1x18x4xf32>
    tpu.vector_store %arg8[%c0_11, %c0_12, %c0_13], %0 {strides = array<i32>} : memref<18x18x4xf32, #tpu.memory_space<vmem>>, vector<1x18x4xf32>,
    %c17_14 = arith.constant 17 : index
    %c0_15 = arith.constant 0 : index
    %c0_16 = arith.constant 0 : index
    %7 = vector.load %arg8[%c17_14, %c0_15, %c0_16] : memref<18x18x4xf32, #tpu.memory_space<vmem>>, vector<1x18x4xf32>
    tpu.vector_store %arg8[%c17_14, %c0_15, %c0_16], %0 {strides = array<i32>} : memref<18x18x4xf32, #tpu.memory_space<vmem>>, vector<1x18x4xf32>,
    %c0_17 = arith.constant 0 : index
    %c0_18 = arith.constant 0 : index
    %c0_19 = arith.constant 0 : index
    %8 = vector.load %arg8[%c0_17, %c0_18, %c0_19] : memref<18x18x4xf32, #tpu.memory_space<vmem>>, vector<18x1x4xf32>
    tpu.vector_store %arg8[%c0_17, %c0_18, %c0_19], %1 {strides = array<i32>} : memref<18x18x4xf32, #tpu.memory_space<vmem>>, vector<18x1x4xf32>,
    %c0_20 = arith.constant 0 : index
    %c17_21 = arith.constant 17 : index
    %c0_22 = arith.constant 0 : index
    %9 = vector.load %arg8[%c0_20, %c17_21, %c0_22] : memref<18x18x4xf32, #tpu.memory_space<vmem>>, vector<18x1x4xf32>
    tpu.vector_store %arg8[%c0_20, %c17_21, %c0_22], %1 {strides = array<i32>} : memref<18x18x4xf32, #tpu.memory_space<vmem>>, vector<18x1x4xf32>,
    %c0_23 = arith.constant 0 : index
    %c0_24 = arith.constant 0 : index
    %c0_25 = arith.constant 0 : index
    %c0_26 = arith.constant 0 : index
    %10 = vector.load %arg1[%c0_23, %c0_24, %c0_25, %c0_26] : memref<1x16x16x4xf32, #tpu.memory_space<vmem>>, vector<1x16x16x4xf32>
    %11 = vector.shape_cast %10 : vector<1x16x16x4xf32> to vector<16x16x4xf32>
    %c1 = arith.constant 1 : index
    %c1_27 = arith.constant 1 : index
    %c0_28 = arith.constant 0 : index
    %12 = vector.load %arg7[%c1, %c1_27, %c0_28] : memref<18x18x4xf32, #tpu.memory_space<vmem>>, vector<16x16x4xf32>
    tpu.vector_store %arg7[%c1, %c1_27, %c0_28], %11 {strides = array<i32>} : memref<18x18x4xf32, #tpu.memory_space<vmem>>, vector<16x16x4xf32>,
    %c0_29 = arith.constant 0 : index
    %c0_30 = arith.constant 0 : index
    %13 = vector.load %arg3[%c0_29, %c0_30] : memref<1x4xf32, #tpu.memory_space<vmem>>, vector<1x4xf32>
    %14 = vector.shape_cast %13 : vector<1x4xf32> to vector<1x4xf32>
    %15 = vector.broadcast %14 : vector<1x4xf32> to vector<256x4xf32>
    %c0_31 = arith.constant 0 : index
    %c0_32 = arith.constant 0 : index
    %c0_33 = arith.constant 0 : index
    %16 = vector.load %arg7[%c0_31, %c0_32, %c0_33] : memref<18x18x4xf32, #tpu.memory_space<vmem>>, vector<16x18x4xf32>
    %17 = vector.extract_strided_slice %16 {offsets = [0, 0, 0], sizes = [16, 16, 4], strides = [1, 1, 1]} : vector<16x18x4xf32> to vector<16x16x4xf32>
    %18 = vector.extract_strided_slice %16 {offsets = [0, 1, 0], sizes = [16, 16, 4], strides = [1, 1, 1]} : vector<16x18x4xf32> to vector<16x16x4xf32>
    %19 = vector.extract_strided_slice %16 {offsets = [0, 2, 0], sizes = [16, 16, 4], strides = [1, 1, 1]} : vector<16x18x4xf32> to vector<16x16x4xf32>
    %20 = tpu.concatenate %17, %18, %19 in 2 : vector<16x16x4xf32>, vector<16x16x4xf32>, vector<16x16x4xf32> -> vector<16x16x12xf32>
    %21 = vector.shape_cast %20 : vector<16x16x12xf32> to vector<256x12xf32>
    %22 = arith.truncf %21 : vector<256x12xf32> to vector<256x12xbf16>
    %c0_34 = arith.constant 0 : index
    %c0_35 = arith.constant 0 : index
    %c0_36 = arith.constant 0 : index
    %23 = vector.load %arg2[%c0_34, %c0_35, %c0_36] : memref<3x12x4xbf16, #tpu.memory_space<vmem>>, vector<1x12x4xbf16>
    %24 = vector.shape_cast %23 : vector<1x12x4xbf16> to vector<12x4xbf16>
    %cst_37 = arith.constant dense<0.000000e+00> : vector<256x4xf32>
    %25 = tpu.matmul %22, %24, %cst_37 {dimension_numbers = #tpu.dot_dimension_numbers<[1], [0], [0], [1], [0, 0, 1, 1], [], []>} : vector<256x12xbf16>, vector<12x4xbf16>, vector<256x4xf32> -> vector<256x4xf32>
    %26 = arith.addf %15, %25 : vector<256x4xf32>
    %c1_38 = arith.constant 1 : index
    %c0_39 = arith.constant 0 : index
    %c0_40 = arith.constant 0 : index
    %27 = vector.load %arg7[%c1_38, %c0_39, %c0_40] : memref<18x18x4xf32, #tpu.memory_space<vmem>>, vector<16x18x4xf32>
    %28 = vector.extract_strided_slice %27 {offsets = [0, 0, 0], sizes = [16, 16, 4], strides = [1, 1, 1]} : vector<16x18x4xf32> to vector<16x16x4xf32>
    %29 = vector.extract_strided_slice %27 {offsets = [0, 1, 0], sizes = [16, 16, 4], strides = [1, 1, 1]} : vector<16x18x4xf32> to vector<16x16x4xf32>
    %30 = vector.extract_strided_slice %27 {offsets = [0, 2, 0], sizes = [16, 16, 4], strides = [1, 1, 1]} : vector<16x18x4xf32> to vector<16x16x4xf32>
    %31 = tpu.concatenate %28, %29, %30 in 2 : vector<16x16x4xf32>, vector<16x16x4xf32>, vector<16x16x4xf32> -> vector<16x16x12xf32>
    %32 = vector.shape_cast %31 : vector<16x16x12xf32> to vector<256x12xf32>
    %33 = arith.truncf %32 : vector<256x12xf32> to vector<256x12xbf16>
    %c1_41 = arith.constant 1 : index
    %c0_42 = arith.constant 0 : index
    %c0_43 = arith.constant 0 : index
    %34 = vector.load %arg2[%c1_41, %c0_42, %c0_43] : memref<3x12x4xbf16, #tpu.memory_space<vmem>>, vector<1x12x4xbf16>
    %35 = vector.shape_cast %34 : vector<1x12x4xbf16> to vector<12x4xbf16>
    %cst_44 = arith.constant dense<0.000000e+00> : vector<256x4xf32>
    %36 = tpu.matmul %33, %35, %cst_44 {dimension_numbers = #tpu.dot_dimension_numbers<[1], [0], [0], [1], [0, 0, 1, 1], [], []>} : vector<256x12xbf16>, vector<12x4xbf16>, vector<256x4xf32> -> vector<256x4xf32>
    %37 = arith.addf %26, %36 : vector<256x4xf32>
    %c2 = arith.constant 2 : index
    %c0_45 = arith.constant 0 : index
    %c0_46 = arith.constant 0 : index
    %38 = vector.load %arg7[%c2, %c0_45, %c0_46] : memref<18x18x4xf32, #tpu.memory_space<vmem>>, vector<16x18x4xf32>
    %39 = vector.extract_strided_slice %38 {offsets = [0, 0, 0], sizes = [16, 16, 4], strides = [1, 1, 1]} : vector<16x18x4xf32> to vector<16x16x4xf32>
    %40 = vector.extract_strided_slice %38 {offsets = [0, 1, 0], sizes = [16, 16, 4], strides = [1, 1, 1]} : vector<16x18x4xf32> to vector<16x16x4xf32>
    %41 = vector.extract_strided_slice %38 {offsets = [0, 2, 0], sizes = [16, 16, 4], strides = [1, 1, 1]} : vector<16x18x4xf32> to vector<16x16x4xf32>
    %42 = tpu.concatenate %39, %40, %41 in 2 : vector<16x16x4xf32>, vector<16x16x4xf32>, vector<16x16x4xf32> -> vector<16x16x12xf32>
    %43 = vector.shape_cast %42 : vector<16x16x12xf32> to vector<256x12xf32>
    %44 = arith.truncf %43 : vector<256x12xf32> to vector<256x12xbf16>
    %c2_47 = arith.constant 2 : index
    %c0_48 = arith.constant 0 : index
    %c0_49 = arith.constant 0 : index
    %45 = vector.load %arg2[%c2_47, %c0_48, %c0_49] : memref<3x12x4xbf16, #tpu.memory_space<vmem>>, vector<1x12x4xbf16>
    %46 = vector.shape_cast %45 : vector<1x12x4xbf16> to vector<12x4xbf16>
    %cst_50 = arith.constant dense<0.000000e+00> : vector<256x4xf32>
    %47 = tpu.matmul %44, %46, %cst_50 {dimension_numbers = #tpu.dot_dimension_numbers<[1], [0], [0], [1], [0, 0, 1, 1], [], []>} : vector<256x12xbf16>, vector<12x4xbf16>, vector<256x4xf32> -> vector<256x4xf32>
    %48 = arith.addf %37, %47 : vector<256x4xf32>
    %cst_51 = arith.constant 0.000000e+00 : f32
    %49 = vector.broadcast %cst_51 : f32 to vector<256x4xf32>
    %50 = arith.maximumf %48, %49 : vector<256x4xf32>
    %51 = vector.shape_cast %50 : vector<256x4xf32> to vector<16x16x4xf32>
    %c1_52 = arith.constant 1 : index
    %c1_53 = arith.constant 1 : index
    %c0_54 = arith.constant 0 : index
    %52 = vector.load %arg8[%c1_52, %c1_53, %c0_54] : memref<18x18x4xf32, #tpu.memory_space<vmem>>, vector<16x16x4xf32>
    tpu.vector_store %arg8[%c1_52, %c1_53, %c0_54], %51 {strides = array<i32>} : memref<18x18x4xf32, #tpu.memory_space<vmem>>, vector<16x16x4xf32>,
    %53 = vector.shape_cast %11 : vector<16x16x4xf32> to vector<256x4xf32>
    %c0_55 = arith.constant 0 : index
    %c0_56 = arith.constant 0 : index
    %54 = vector.load %arg5[%c0_55, %c0_56] : memref<1x4xf32, #tpu.memory_space<vmem>>, vector<1x4xf32>
    %55 = vector.broadcast %54 : vector<1x4xf32> to vector<256x4xf32>
    %56 = arith.addf %53, %55 : vector<256x4xf32>
    %c0_57 = arith.constant 0 : index
    %c0_58 = arith.constant 0 : index
    %c0_59 = arith.constant 0 : index
    %57 = vector.load %arg8[%c0_57, %c0_58, %c0_59] : memref<18x18x4xf32, #tpu.memory_space<vmem>>, vector<16x18x4xf32>
    %58 = vector.extract_strided_slice %57 {offsets = [0, 0, 0], sizes = [16, 16, 4], strides = [1, 1, 1]} : vector<16x18x4xf32> to vector<16x16x4xf32>
    %59 = vector.extract_strided_slice %57 {offsets = [0, 1, 0], sizes = [16, 16, 4], strides = [1, 1, 1]} : vector<16x18x4xf32> to vector<16x16x4xf32>
    %60 = vector.extract_strided_slice %57 {offsets = [0, 2, 0], sizes = [16, 16, 4], strides = [1, 1, 1]} : vector<16x18x4xf32> to vector<16x16x4xf32>
    %61 = tpu.concatenate %58, %59, %60 in 2 : vector<16x16x4xf32>, vector<16x16x4xf32>, vector<16x16x4xf32> -> vector<16x16x12xf32>
    %62 = vector.shape_cast %61 : vector<16x16x12xf32> to vector<256x12xf32>
    %63 = arith.truncf %62 : vector<256x12xf32> to vector<256x12xbf16>
    %c0_60 = arith.constant 0 : index
    %c0_61 = arith.constant 0 : index
    %c0_62 = arith.constant 0 : index
    %64 = vector.load %arg4[%c0_60, %c0_61, %c0_62] : memref<3x12x4xbf16, #tpu.memory_space<vmem>>, vector<1x12x4xbf16>
    %65 = vector.shape_cast %64 : vector<1x12x4xbf16> to vector<12x4xbf16>
    %cst_63 = arith.constant dense<0.000000e+00> : vector<256x4xf32>
    %66 = tpu.matmul %63, %65, %cst_63 {dimension_numbers = #tpu.dot_dimension_numbers<[1], [0], [0], [1], [0, 0, 1, 1], [], []>} : vector<256x12xbf16>, vector<12x4xbf16>, vector<256x4xf32> -> vector<256x4xf32>
    %67 = arith.addf %56, %66 : vector<256x4xf32>
    %c1_64 = arith.constant 1 : index
    %c0_65 = arith.constant 0 : index
    %c0_66 = arith.constant 0 : index
    %68 = vector.load %arg8[%c1_64, %c0_65, %c0_66] : memref<18x18x4xf32, #tpu.memory_space<vmem>>, vector<16x18x4xf32>
    %69 = vector.extract_strided_slice %68 {offsets = [0, 0, 0], sizes = [16, 16, 4], strides = [1, 1, 1]} : vector<16x18x4xf32> to vector<16x16x4xf32>
    %70 = vector.extract_strided_slice %68 {offsets = [0, 1, 0], sizes = [16, 16, 4], strides = [1, 1, 1]} : vector<16x18x4xf32> to vector<16x16x4xf32>
    %71 = vector.extract_strided_slice %68 {offsets = [0, 2, 0], sizes = [16, 16, 4], strides = [1, 1, 1]} : vector<16x18x4xf32> to vector<16x16x4xf32>
    %72 = tpu.concatenate %69, %70, %71 in 2 : vector<16x16x4xf32>, vector<16x16x4xf32>, vector<16x16x4xf32> -> vector<16x16x12xf32>
    %73 = vector.shape_cast %72 : vector<16x16x12xf32> to vector<256x12xf32>
    %74 = arith.truncf %73 : vector<256x12xf32> to vector<256x12xbf16>
    %c1_67 = arith.constant 1 : index
    %c0_68 = arith.constant 0 : index
    %c0_69 = arith.constant 0 : index
    %75 = vector.load %arg4[%c1_67, %c0_68, %c0_69] : memref<3x12x4xbf16, #tpu.memory_space<vmem>>, vector<1x12x4xbf16>
    %76 = vector.shape_cast %75 : vector<1x12x4xbf16> to vector<12x4xbf16>
    %cst_70 = arith.constant dense<0.000000e+00> : vector<256x4xf32>
    %77 = tpu.matmul %74, %76, %cst_70 {dimension_numbers = #tpu.dot_dimension_numbers<[1], [0], [0], [1], [0, 0, 1, 1], [], []>} : vector<256x12xbf16>, vector<12x4xbf16>, vector<256x4xf32> -> vector<256x4xf32>
    %78 = arith.addf %67, %77 : vector<256x4xf32>
    %c2_71 = arith.constant 2 : index
    %c0_72 = arith.constant 0 : index
    %c0_73 = arith.constant 0 : index
    %79 = vector.load %arg8[%c2_71, %c0_72, %c0_73] : memref<18x18x4xf32, #tpu.memory_space<vmem>>, vector<16x18x4xf32>
    %80 = vector.extract_strided_slice %79 {offsets = [0, 0, 0], sizes = [16, 16, 4], strides = [1, 1, 1]} : vector<16x18x4xf32> to vector<16x16x4xf32>
    %81 = vector.extract_strided_slice %79 {offsets = [0, 1, 0], sizes = [16, 16, 4], strides = [1, 1, 1]} : vector<16x18x4xf32> to vector<16x16x4xf32>
    %82 = vector.extract_strided_slice %79 {offsets = [0, 2, 0], sizes = [16, 16, 4], strides = [1, 1, 1]} : vector<16x18x4xf32> to vector<16x16x4xf32>
    %83 = tpu.concatenate %80, %81, %82 in 2 : vector<16x16x4xf32>, vector<16x16x4xf32>, vector<16x16x4xf32> -> vector<16x16x12xf32>
    %84 = vector.shape_cast %83 : vector<16x16x12xf32> to vector<256x12xf32>
    %85 = arith.truncf %84 : vector<256x12xf32> to vector<256x12xbf16>
    %c2_74 = arith.constant 2 : index
    %c0_75 = arith.constant 0 : index
    %c0_76 = arith.constant 0 : index
    %86 = vector.load %arg4[%c2_74, %c0_75, %c0_76] : memref<3x12x4xbf16, #tpu.memory_space<vmem>>, vector<1x12x4xbf16>
    %87 = vector.shape_cast %86 : vector<1x12x4xbf16> to vector<12x4xbf16>
    %cst_77 = arith.constant dense<0.000000e+00> : vector<256x4xf32>
    %88 = tpu.matmul %85, %87, %cst_77 {dimension_numbers = #tpu.dot_dimension_numbers<[1], [0], [0], [1], [0, 0, 1, 1], [], []>} : vector<256x12xbf16>, vector<12x4xbf16>, vector<256x4xf32> -> vector<256x4xf32>
    %89 = arith.addf %78, %88 : vector<256x4xf32>
    %cst_78 = arith.constant 0.000000e+00 : f32
    %90 = vector.broadcast %cst_78 : f32 to vector<256x4xf32>
    %91 = arith.maximumf %89, %90 : vector<256x4xf32>
    %92 = vector.shape_cast %91 : vector<256x4xf32> to vector<16x16x4xf32>
    %c0_79 = arith.constant 0 : index
    %c0_80 = arith.constant 0 : index
    %c0_81 = arith.constant 0 : index
    %c0_82 = arith.constant 0 : index
    %93 = vector.load %arg6[%c0_79, %c0_80, %c0_81, %c0_82] : memref<1x16x16x4xf32, #tpu.memory_space<vmem>>, vector<1x16x16x4xf32>
    %94 = vector.shape_cast %93 : vector<1x16x16x4xf32> to vector<16x16x4xf32>
    %95 = vector.shape_cast %92 : vector<16x16x4xf32> to vector<1x16x16x4xf32>
    tpu.vector_store %arg6[%c0_79, %c0_80, %c0_81, %c0_82], %95 {strides = array<i32>} : memref<1x16x16x4xf32, #tpu.memory_space<vmem>>, vector<1x16x16x4xf32>,
    return
  }
  func.func @transform_0(%arg0: i32) -> (i32, i32, i32, i32) {
    %c0_i32 = arith.constant 0 : i32
    %c0_i32_0 = arith.constant 0 : i32
    %c0_i32_1 = arith.constant 0 : i32
    %c0_i32_2 = arith.constant 0 : i32
    return %arg0, %c0_i32, %c0_i32_0, %c0_i32_1 : i32, i32, i32, i32
  }
  func.func @transform_1(%arg0: i32) -> (i32, i32, i32) {
    %c0_i32 = arith.constant 0 : i32
    %c0_i32_0 = arith.constant 0 : i32
    %c0_i32_1 = arith.constant 0 : i32
    %c0_i32_2 = arith.constant 0 : i32
    return %c0_i32, %c0_i32_0, %c0_i32_1 : i32, i32, i32
  }
  func.func @transform_2(%arg0: i32) -> (i32, i32) {
    %c0_i32 = arith.constant 0 : i32
    %c0_i32_0 = arith.constant 0 : i32
    %c0_i32_1 = arith.constant 0 : i32
    return %c0_i32, %c0_i32_0 : i32, i32
  }
  func.func @transform_3(%arg0: i32) -> (i32, i32, i32) {
    %c0_i32 = arith.constant 0 : i32
    %c0_i32_0 = arith.constant 0 : i32
    %c0_i32_1 = arith.constant 0 : i32
    %c0_i32_2 = arith.constant 0 : i32
    return %c0_i32, %c0_i32_0, %c0_i32_1 : i32, i32, i32
  }
  func.func @transform_4(%arg0: i32) -> (i32, i32) {
    %c0_i32 = arith.constant 0 : i32
    %c0_i32_0 = arith.constant 0 : i32
    %c0_i32_1 = arith.constant 0 : i32
    return %c0_i32, %c0_i32_0 : i32, i32
  }
  func.func @transform_5(%arg0: i32) -> (i32, i32, i32, i32) {
    %c0_i32 = arith.constant 0 : i32
    %c0_i32_0 = arith.constant 0 : i32
    %c0_i32_1 = arith.constant 0 : i32
    %c0_i32_2 = arith.constant 0 : i32
    return %arg0, %c0_i32, %c0_i32_0, %c0_i32_1 : i32, i32, i32, i32
  }
}

</mosaic_0001>

<bundles_post_ra>
// kernel: tpu_custom_call.1
= control target key start
LH: loop header
LB: loop body
LE: loop exit
PB: predicated region body
PF: predicated region fallthrough
CT: control target
= control target key end

     0   :  { %s6113_s18 = smov 0   ;;  %s9696_s0 = inlined_call_operand.vmem [shape: f32[2,16,16,4], index: 0, kind: input, shape index: {}]   ;;  %s9697_s1 = inlined_call_operand.vmem [shape: bf16[3,12,4], index: 1, kind: input, shape index: {}]   ;;  %s9698_s2 = inlined_call_operand.vmem [shape: f32[1,4], index: 2, kind: input, shape index: {}]   ;;  %s9699_s3 = inlined_call_operand.vmem [shape: bf16[3,12,4], index: 3, kind: input, shape index: {}]   ;;  %s9700_s4 = inlined_call_operand.vmem [shape: f32[1,4], index: 4, kind: input, shape index: {}]   ;;  %s9701_s5 = inlined_call_operand.vmem [shape: f32[2,16,16,4], index: 5, kind: output, shape index: {}]  }
   0x1 LB: > { %s4856_s19 = sadd.s32 4294967295, %s6078_s18   ;;  %p4860_p0 = scmp.ge.s32.totalorder %s6078_s18, 1  ;;  %s6078_s18 = sphi %s6113_s18, %s15_s18  }
   0x2   : > { %p187_p1 = scmp.lt.s32.totalorder %s6078_s18, 3 }
   0x4   : > { %p188_p2 = pnand %p4860_p0, %p187_p1 }
   0x6   : > { %191 = sbr.rel (%p188_p2) target bundleno = 1251 (0x4e3), region = 40 }
   0xb   : > { %vm226_vm0 = vcmask 31744   ;;  %vm229_vm1 = vcmask 25600   ;;  %v6080_v0 = vmov 0.0   ;;  %vm235_vm2 = vcmask 24576   ;;  %s6081_s20 = smov 4   ;;  %p215_p3 = scmp.lt.s32.totalorder %s4856_s19, 1 }
   0xc   : > { %227 = vst.msk [vmem:[#allocation2] sm:$0xff] %vm226_vm0, %v6080_v0  ;;  %vm480_vm3 = vcmask 1046528   ;;  %vm657_vm4 = vcmask 1045504   ;;  %s6082_s25 = smov 8   ;;  %vm866_vm5 = vcmask 64512   ;;  %vm922_vm6 = vcmask 97280  }
   0xd   : > { %228 = vst.msk [vmem:[#allocation2 + $0x8] sm:$0xff] %vm226_vm0, %v6080_v0  ;;  %s10049_s19 = smov (!%p215_p3, %s4856_s19), 1 }
   0xe   : > { %230 = vst.msk [vmem:[#allocation2 + $0x10] sm:$0x3] %vm229_vm1, %v6080_v0  ;;  %s4995_s21 = sshll.u32 %s10049_s19, 8 }
   0xf   : > { %236 = vst.msk [vmem:[#allocation2] sm:$0x1] %vm235_vm2, %v6080_v0  ;;  %s6291_s24 = scalar_lea.vmem %s9696_s0, %s4995_s21  ;;  %s9514_s11 = scalar_lea.vmem %s9701_s5, %s4995_s21 }
  0x10   : > { %254 = vst.msk [vmem:[#allocation2 + $0x11] sm:$0x1] %vm235_vm2, %v6080_v0  ;;  %v6300_v10 = vld [vmem:[%s6291_s24 + $0x30] sm:$0xff]  ;;  %v6305_v11 = vld [vmem:[%s6291_s24 + $0x38] sm:$0xff]  ;;  %v6334_v15 = vld [vmem:[%s6291_s24] sm:$0xff] }
  0x11   : > { %232 = vst.msk [vmem:[#allocation2 + $0x198] sm:$0xff] %vm226_vm0, %v6080_v0  ;;  %v6322_v12 = vld [vmem:[%s6291_s24 + $0x10] sm:$0xff]  ;;  %v6327_v13 = vld [vmem:[%s6291_s24 + $0x18] sm:$0xff]  ;;  %v6344_v19 = vld [vmem:[%s6291_s24 + $0x8] sm:$0xff] }
  0x12   : > { %233 = vst.msk [vmem:[#allocation2 + $0x1a0] sm:$0xff] %vm226_vm0, %v6080_v0  ;;  %v6353_v22 = vld [vmem:[%s6291_s24 + $0x40] sm:$0xff]  ;;  %v6358_v23 = vld [vmem:[%s6291_s24 + $0x48] sm:$0xff]  ;;  %v6380_v29 = vld [vmem:[%s6291_s24 + $0x50] sm:$0xff] }
  0x13   : > { %234 = vst.msk [vmem:[#allocation2 + $0x1a8] sm:$0x3] %vm229_vm1, %v6080_v0  ;;  %v6369_v26 = vld [vmem:[%s6291_s24 + $0x20] sm:$0xff]  ;;  %v6375_v28 = vld [vmem:[%s6291_s24 + $0x28] sm:$0xff]  ;;  %v6386_v30 = vld [vmem:[%s6291_s24 + $0x58] sm:$0xff] }
  0x14   : > { %v6137_v1 = vld [vmem:[#allocation2 + $0x8] sm:$0xff]  ;;  %237 = vst.msk [vmem:[#allocation2 + $0x18] sm:$0x1] %vm235_vm2, %v6080_v0  ;;  %v6393_v32 = vld [vmem:[%s6291_s24 + $0x70] sm:$0xff]  ;;  %v6403_v36 = vld [vmem:[%s6291_s24 + $0x78] sm:$0xff] }
  0x15   : > { %v482_v2 = vrot.slane %v6137_v1, 1  ;;  %238 = vst.msk [vmem:[#allocation2 + $0x30] sm:$0x1] %vm235_vm2, %v6080_v0  ;;  %v6414_v40 = vld [vmem:[%s6291_s24 + $0x60] sm:$0xff]  ;;  %v6424_v44 = vld [vmem:[%s6291_s24 + $0x68] sm:$0xff] }
  0x16   : > { %v6144_v3 = vld [vmem:[#allocation2] sm:$0xff]  ;;  %239 = vst.msk [vmem:[#allocation2 + $0x48] sm:$0x1] %vm235_vm2, %v6080_v0  ;;  %v6452_v55 = vld [vmem:[%s6291_s24 + $0x88] sm:$0xff] }
  0x17   : > { %v6148_v4 = vld [vmem:[#allocation2 + $0x10] sm:$0x3]  ;;  %v481_v5 = vrot.slane %v6144_v3, 1  ;;  %240 = vst.msk [vmem:[#allocation2 + $0x60] sm:$0x1] %vm235_vm2, %v6080_v0  ;;  %v6441_v50 = vld [vmem:[%s6291_s24 + $0x80] sm:$0xff] }
  0x18   : > { %v484_v6 = vrot.slane %v6148_v4, 1  ;;  %241 = vst.msk [vmem:[#allocation2 + $0x78] sm:$0x1] %vm235_vm2, %v6080_v0  ;;  %v6469_v61 = vld [vmem:[%s6291_s24 + $0xa0] sm:$0xff] }
  0x19   : > { %v483_v7 = vsel %vm480_vm3, %v481_v5, %v482_v2  ;;  %242 = vst.msk [vmem:[#allocation2 + $0x90] sm:$0x1] %vm235_vm2, %v6080_v0  ;;  %v6481_v5 = vld [vmem:[%s6291_s24 + $0xa8] sm:$0xff] }
  0x1a   : > { %v485_v8 = vsel %vm480_vm3, %v482_v2, %v484_v6  ;;  %243 = vst.msk [vmem:[#allocation2 + $0xa8] sm:$0x1] %vm235_vm2, %v6080_v0 }
  0x1b   : > { %v5016_v9 = vpack.i.bf16 %v485_v8, %v483_v7  ;;  %244 = vst.msk [vmem:[#allocation2 + $0xc0] sm:$0x1] %vm235_vm2, %v6080_v0 }
  0x1c   : > { %245 = vst.msk [vmem:[#allocation2 + $0xd8] sm:$0x1] %vm235_vm2, %v6080_v0 }
  0x1d   : > { %5017 = vrot.lane.b32.xlu0 %v5016_v9, %s6081_s20  ;;  %246 = vst.msk [vmem:[#allocation2 + $0xf0] sm:$0x1] %vm235_vm2, %v6080_v0 }
  0x1e   : > { %247 = vst.msk [vmem:[#allocation2 + $0x108] sm:$0x1] %vm235_vm2, %v6080_v0 }
  0x1f   : > { %248 = vst.msk [vmem:[#allocation2 + $0x120] sm:$0x1] %vm235_vm2, %v6080_v0 }
  0x20   : > { %249 = vst.msk [vmem:[#allocation2 + $0x138] sm:$0x1] %vm235_vm2, %v6080_v0 }
  0x21   : > { %250 = vst.msk [vmem:[#allocation2 + $0x150] sm:$0x1] %vm235_vm2, %v6080_v0 }
  0x22   : > { %251 = vst.msk [vmem:[#allocation2 + $0x168] sm:$0x1] %vm235_vm2, %v6080_v0 }
  0x23   : > { %252 = vst.msk [vmem:[#allocation2 + $0x180] sm:$0x1] %vm235_vm2, %v6080_v0 }
  0x24   : > { %255 = vst.msk [vmem:[#allocation2 + $0x29] sm:$0x1] %vm235_vm2, %v6080_v0 }
  0x25   : > { %256 = vst.msk [vmem:[#allocation2 + $0x41] sm:$0x1] %vm235_vm2, %v6080_v0 }
  0x26   : > { %257 = vst.msk [vmem:[#allocation2 + $0x59] sm:$0x1] %vm235_vm2, %v6080_v0 }
  0x27   : > { %258 = vst.msk [vmem:[#allocation2 + $0x71] sm:$0x1] %vm235_vm2, %v6080_v0 }
  0x28   : > { %259 = vst.msk [vmem:[#allocation2 + $0x89] sm:$0x1] %vm235_vm2, %v6080_v0 }
  0x29   : > { %260 = vst.msk [vmem:[#allocation2 + $0xa1] sm:$0x1] %vm235_vm2, %v6080_v0 }
  0x2a   : > { %261 = vst.msk [vmem:[#allocation2 + $0xb9] sm:$0x1] %vm235_vm2, %v6080_v0 }
  0x2b   : > { %262 = vst.msk [vmem:[#allocation2 + $0xd1] sm:$0x1] %vm235_vm2, %v6080_v0 }
  0x2c   : > { %263 = vst.msk [vmem:[#allocation2 + $0xe9] sm:$0x1] %vm235_vm2, %v6080_v0 }
  0x2d   : > { %264 = vst.msk [vmem:[#allocation2 + $0x101] sm:$0x1] %vm235_vm2, %v6080_v0 }
  0x2e   : > { %265 = vst.msk [vmem:[#allocation2 + $0x119] sm:$0x1] %vm235_vm2, %v6080_v0 }
  0x2f   : > { %266 = vst.msk [vmem:[#allocation2 + $0x131] sm:$0x1] %vm235_vm2, %v6080_v0 }
  0x30   : > { %267 = vst.msk [vmem:[#allocation2 + $0x149] sm:$0x1] %vm235_vm2, %v6080_v0 }
  0x31   : > { %268 = vst.msk [vmem:[#allocation2 + $0x161] sm:$0x1] %vm235_vm2, %v6080_v0 }
  0x32   : > { %269 = vst.msk [vmem:[#allocation2 + $0x179] sm:$0x1] %vm235_vm2, %v6080_v0 }
  0x33   : > { %270 = vst.msk [vmem:[#allocation2 + $0x191] sm:$0x1] %vm235_vm2, %v6080_v0 }
  0x34   : > { %272 = vst.msk [vmem:[#allocation3] sm:$0xff] %vm226_vm0, %v6080_v0 }
  0x35   : > { %273 = vst.msk [vmem:[#allocation3 + $0x8] sm:$0xff] %vm226_vm0, %v6080_v0 }
  0x36   : > { %274 = vst.msk [vmem:[#allocation3 + $0x10] sm:$0x3] %vm229_vm1, %v6080_v0 }
  0x37   : > { %276 = vst.msk [vmem:[#allocation3 + $0x198] sm:$0xff] %vm226_vm0, %v6080_v0 }
  0x38   : > { %277 = vst.msk [vmem:[#allocation3 + $0x1a0] sm:$0xff] %vm226_vm0, %v6080_v0 }
  0x39   : > { %278 = vst.msk [vmem:[#allocation3 + $0x1a8] sm:$0x3] %vm229_vm1, %v6080_v0 }
  0x3a   : > { %280 = vst.msk [vmem:[#allocation3 + $0x18] sm:$0x1] %vm235_vm2, %v6080_v0 }
  0x3b   : > { %281 = vst.msk [vmem:[#allocation3 + $0x30] sm:$0x1] %vm235_vm2, %v6080_v0 }
  0x3c   : > { %282 = vst.msk [vmem:[#allocation3 + $0x48] sm:$0x1] %vm235_vm2, %v6080_v0 }
  0x3d   : > { %283 = vst.msk [vmem:[#allocation3 + $0x60] sm:$0x1] %vm235_vm2, %v6080_v0 }
  0x3e   : > { %284 = vst.msk [vmem:[#allocation3 + $0x78] sm:$0x1] %vm235_vm2, %v6080_v0 }
  0x3f   : > { %285 = vst.msk [vmem:[#allocation3 + $0x90] sm:$0x1] %vm235_vm2, %v6080_v0 }
  0x40   : > { %286 = vst.msk [vmem:[#allocation3 + $0xa8] sm:$0x1] %vm235_vm2, %v6080_v0 }
  0x41   : > { %287 = vst.msk [vmem:[#allocation3 + $0xc0] sm:$0x1] %vm235_vm2, %v6080_v0 }
  0x42   : > { %288 = vst.msk [vmem:[#allocation3 + $0xd8] sm:$0x1] %vm235_vm2, %v6080_v0 }
  0x43   : > { %289 = vst.msk [vmem:[#allocation3 + $0xf0] sm:$0x1] %vm235_vm2, %v6080_v0 }
  0x44   : > { %290 = vst.msk [vmem:[#allocation3 + $0x108] sm:$0x1] %vm235_vm2, %v6080_v0 }
  0x45   : > { %291 = vst.msk [vmem:[#allocation3 + $0x120] sm:$0x1] %vm235_vm2, %v6080_v0 }
  0x46   : > { %292 = vst.msk [vmem:[#allocation3 + $0x138] sm:$0x1] %vm235_vm2, %v6080_v0 }
  0x47   : > { %293 = vst.msk [vmem:[#allocation3 + $0x150] sm:$0x1] %vm235_vm2, %v6080_v0 }
  0x48   : > { %294 = vst.msk [vmem:[#allocation3 + $0x168] sm:$0x1] %vm235_vm2, %v6080_v0 }
  0x49   : > { %295 = vst.msk [vmem:[#allocation3 + $0x180] sm:$0x1] %vm235_vm2, %v6080_v0 }
  0x4a   : > { %298 = vst.msk [vmem:[#allocation3 + $0x29] sm:$0x1] %vm235_vm2, %v6080_v0 }
  0x4b   : > { %299 = vst.msk [vmem:[#allocation3 + $0x41] sm:$0x1] %vm235_vm2, %v6080_v0 }
  0x4c   : > { %300 = vst.msk [vmem:[#allocation3 + $0x59] sm:$0x1] %vm235_vm2, %v6080_v0 }
  0x4d   : > { %301 = vst.msk [vmem:[#allocation3 + $0x71] sm:$0x1] %vm235_vm2, %v6080_v0 }
  0x4e   : > { %302 = vst.msk [vmem:[#allocation3 + $0x89] sm:$0x1] %vm235_vm2, %v6080_v0 }
  0x4f   : > { %303 = vst.msk [vmem:[#allocation3 + $0xa1] sm:$0x1] %vm235_vm2, %v6080_v0 }
  0x50   : > { %304 = vst.msk [vmem:[#allocation3 + $0xb9] sm:$0x1] %vm235_vm2, %v6080_v0 }
  0x51   : > { %305 = vst.msk [vmem:[#allocation3 + $0xd1] sm:$0x1] %vm235_vm2, %v6080_v0 }
  0x52   : > { %306 = vst.msk [vmem:[#allocation3 + $0xe9] sm:$0x1] %vm235_vm2, %v6080_v0 }
  0x53   : > { %307 = vst.msk [vmem:[#allocation3 + $0x101] sm:$0x1] %vm235_vm2, %v6080_v0 }
  0x54   : > { %308 = vst.msk [vmem:[#allocation3 + $0x119] sm:$0x1] %vm235_vm2, %v6080_v0 }
  0x55   : > { %309 = vst.msk [vmem:[#allocation3 + $0x131] sm:$0x1] %vm235_vm2, %v6080_v0 }
  0x56   : > { %310 = vst.msk [vmem:[#allocation3 + $0x149] sm:$0x1] %vm235_vm2, %v6080_v0 }
  0x57   : > { %311 = vst.msk [vmem:[#allocation3 + $0x161] sm:$0x1] %vm235_vm2, %v6080_v0 }
  0x58   : > { %9817 = vst [vmem:[#allocation4_spill] sm:$0xff] %v6300_v10 }
  0x59   : > { %312 = vst.msk [vmem:[#allocation3 + $0x179] sm:$0x1] %vm235_vm2, %v6080_v0 }
  0x5a   : > { %9818 = vst [vmem:[#allocation5_spill] sm:$0xff] %v6305_v11 }
  0x5b   : > { %313 = vst.msk [vmem:[#allocation3 + $0x191] sm:$0x1] %vm235_vm2, %v6080_v0 }
  0x5c   : > { %354 = vst.msk [vmem:[#allocation2 + $0x61] sm:$0xff] %vm226_vm0, %v6300_v10 }
  0x5d   : > { %355 = vst.msk [vmem:[#allocation2 + $0x69] sm:$0xff] %vm226_vm0, %v6305_v11  ;;  %v6596_v11 = vld [vmem:[%s6291_s24 + $0xc8] sm:$0xff] }
  0x5e   : > { %253 = vst.msk [vmem:[#allocation2 + $0x198] sm:$0x1] %vm235_vm2, %v6080_v0 }
  0x5f   : > { %271 = vst.msk [vmem:[#allocation2 + $0x1a9] sm:$0x1] %vm235_vm2, %v6080_v0 }
  0x60   : > { %279 = vst.msk [vmem:[#allocation3] sm:$0x1] %vm235_vm2, %v6080_v0 }
  0x61   : > { %296 = vst.msk [vmem:[#allocation3 + $0x198] sm:$0x1] %vm235_vm2, %v6080_v0 }
  0x62   : > { %9819 = vst [vmem:[#allocation6_spill] sm:$0xff] %v6322_v12 }
  0x63   : > { %297 = vst.msk [vmem:[#allocation3 + $0x11] sm:$0x1] %vm235_vm2, %v6080_v0  ;;  %v6329_v14 = vld [vmem:[#allocation2 + $0x60] sm:$0xff] }
  0x64   : > { %9820 = vst [vmem:[#allocation7_spill] sm:$0xff] %v6327_v13  ;;  %v6336_v16 = vld [vmem:[#allocation2 + $0x68] sm:$0xff]  ;;  %v6338_v17 = vld [vmem:[#allocation2 + $0x70] sm:$0x3]  ;;  %v501_v18 = vrot.slane %v6329_v14, 1 }
  0x65   : > { %314 = vst.msk [vmem:[#allocation3 + $0x1a9] sm:$0x1] %vm235_vm2, %v6080_v0  ;;  %v6347_v20 = vrot.slane %v6336_v16, 1  ;;  %v504_v21 = vrot.slane %v6338_v17, 1 }
  0x66   : > { %9821 = vst [vmem:[#allocation8_spill] sm:$0xff] %v6334_v15 }
  0x67   : > { %350 = vst.msk [vmem:[#allocation2 + $0x31] sm:$0xff] %vm226_vm0, %v6322_v12  ;;  %v6362_v24 = vsel %vm480_vm3, %v501_v18, %v6347_v20  ;;  %v505_v25 = vsel %vm480_vm3, %v6347_v20, %v504_v21  ;;  %v6498_v21 = vld [vmem:[%s6291_s24 + $0x90] sm:$0xff] }
  0x68   : > { %9822 = vst [vmem:[#allocation9_spill] sm:$0xff] %v6344_v19  ;;  %v5036_v27 = vpack.i.bf16 %v505_v25, %v6362_v24 }
  0x69   : > { %351 = vst.msk [vmem:[#allocation2 + $0x39] sm:$0xff] %vm226_vm0, %v6327_v13  ;;  %v6624_v13 = vld [vmem:[%s6291_s24 + $0xe8] sm:$0xff] }
  0x6a   : > { %9823 = vst [vmem:[#allocation10_spill] sm:$0xff] %v6353_v22  ;;  %5037 = vrot.lane.b32.xlu2 %v5036_v27, %s6081_s20 }
  0x6b   : > { %348 = vst.msk [vmem:[#allocation2 + $0x19] sm:$0xff] %vm226_vm0, %v6334_v15 }
  0x6c   : > { %9824 = vst [vmem:[#allocation11_spill] sm:$0xff] %v6358_v23 }
  0x6d   : > { %349 = vst.msk [vmem:[#allocation2 + $0x21] sm:$0xff] %vm226_vm0, %v6344_v19 }
  0x6e   : > { %9825 = vst [vmem:[#allocation12_spill] sm:$0xff] %v6369_v26  ;;  %v6388_v31 = vld [vmem:[#allocation2 + $0x30] sm:$0xff] }
  0x6f   : > { %356 = vst.msk [vmem:[#allocation2 + $0x79] sm:$0xff] %vm226_vm0, %v6353_v22  ;;  %v491_v35 = vrot.slane %v6388_v31, 1 }
  0x70   : > { %9826 = vst [vmem:[#allocation13_spill] sm:$0xff] %v6375_v28  ;;  %v6395_v33 = vld [vmem:[#allocation2 + $0x38] sm:$0xff]  ;;  %v6397_v34 = vld [vmem:[#allocation2 + $0x40] sm:$0x3] }
  0x71   : > { %357 = vst.msk [vmem:[#allocation2 + $0x81] sm:$0xff] %vm226_vm0, %v6358_v23  ;;  %v6406_v37 = vrot.slane %v6395_v33, 1  ;;  %v494_v38 = vrot.slane %v6397_v34, 1 }
  0x72   : > { %9827 = vst [vmem:[#allocation14_spill] sm:$0xff] %v6380_v29  ;;  %v6409_v39 = vld [vmem:[#allocation2 + $0x18] sm:$0xff] }
  0x73   : > { %352 = vst.msk [vmem:[#allocation2 + $0x49] sm:$0xff] %vm226_vm0, %v6369_v26  ;;  %v486_v43 = vrot.slane %v6409_v39, 1  ;;  %v6428_v45 = vsel %vm480_vm3, %v491_v35, %v6406_v37  ;;  %v495_v46 = vsel %vm480_vm3, %v6406_v37, %v494_v38 }
  0x74   : > { %9828 = vst [vmem:[#allocation15_spill] sm:$0xff] %v6386_v30  ;;  %v6416_v41 = vld [vmem:[#allocation2 + $0x20] sm:$0xff]  ;;  %v6418_v42 = vld [vmem:[#allocation2 + $0x28] sm:$0x3]  ;;  %v5026_v51 = vpack.i.bf16 %v495_v46, %v6428_v45 }
  0x75   : > { %353 = vst.msk [vmem:[#allocation2 + $0x51] sm:$0xff] %vm226_vm0, %v6375_v28  ;;  %v6433_v47 = vrot.slane %v6416_v41, 1  ;;  %v489_v48 = vrot.slane %v6418_v42, 1 }
  0x76   : > { %9829 = vst [vmem:[#allocation16_spill] sm:$0xff] %v6393_v32  ;;  %v6436_v49 = vld [vmem:[#allocation2 + $0x78] sm:$0xff]  ;;  %5027 = vrot.lane.b32.xlu1 %v5026_v51, %s6081_s20 }
  0x77   : > { %358 = vst.msk [vmem:[#allocation2 + $0x91] sm:$0xff] %vm226_vm0, %v6380_v29  ;;  %v506_v54 = vrot.slane %v6436_v49, 1  ;;  %v6456_v56 = vsel %vm480_vm3, %v486_v43, %v6433_v47  ;;  %v490_v57 = vsel %vm480_vm3, %v6433_v47, %v489_v48  ;;  %v6510_v43 = vld [vmem:[%s6291_s24 + $0x98] sm:$0xff] }
  0x78   : > { %9830 = vst [vmem:[#allocation17_spill] sm:$0xff] %v6403_v36  ;;  %v6444_v52 = vld [vmem:[#allocation2 + $0x80] sm:$0xff]  ;;  %v6446_v53 = vld [vmem:[#allocation2 + $0x88] sm:$0x3]  ;;  %v5021_v62 = vpack.i.bf16 %v490_v57, %v6456_v56 }
  0x79   : > { %359 = vst.msk [vmem:[#allocation2 + $0x99] sm:$0xff] %vm226_vm0, %v6386_v30  ;;  %v6461_v58 = vrot.slane %v6444_v52, 1  ;;  %v509_v59 = vrot.slane %v6446_v53, 1 }
  0x7a   : > { %9831 = vst [vmem:[#allocation18_spill] sm:$0xff] %v6414_v40  ;;  %v6464_v60 = vld [vmem:[#allocation2 + $0x48] sm:$0xff]  ;;  %5022 = vrot.lane.b32.xlu0 %v5021_v62, %s6081_s20 }
  0x7b   : > { %362 = vst.msk [vmem:[#allocation2 + $0xc1] sm:$0xff] %vm226_vm0, %v6393_v32  ;;  %v496_v2 = vrot.slane %v6464_v60, 1  ;;  %v6485_v6 = vsel %vm480_vm3, %v506_v54, %v6461_v58  ;;  %v510_v7 = vsel %vm480_vm3, %v6461_v58, %v509_v59  ;;  %v6527_v59 = vld [vmem:[%s6291_s24 + $0xb0] sm:$0xff] }
  0x7c   : > { %9832 = vst [vmem:[#allocation19_spill] sm:$0xff] %v6424_v44  ;;  %v6473_v63 = vld [vmem:[#allocation2 + $0x50] sm:$0xff]  ;;  %v6475_v0 = vld [vmem:[#allocation2 + $0x58] sm:$0x3]  ;;  %v5041_v25 = vpack.i.bf16 %v510_v7, %v6485_v6 }
  0x7d   : > { %363 = vst.msk [vmem:[#allocation2 + $0xc9] sm:$0xff] %vm226_vm0, %v6403_v36  ;;  %v6490_v8 = vrot.slane %v6473_v63, 1  ;;  %v499_v9 = vrot.slane %v6475_v0, 1 }
  0x7e   : > { %9833 = vst [vmem:[#allocation20_spill] sm:$0xff] %v6441_v50  ;;  %v6493_v18 = vld [vmem:[#allocation2 + $0x90] sm:$0xff]  ;;  %5042 = vrot.lane.b32.xlu2 %v5041_v25, %s6081_s20 }
  0x7f   : > { %360 = vst.msk [vmem:[#allocation2 + $0xa9] sm:$0xff] %vm226_vm0, %v6414_v40  ;;  %v511_v38 = vrot.slane %v6493_v18, 1  ;;  %v6514_v46 = vsel %vm480_vm3, %v496_v2, %v6490_v8  ;;  %v500_v48 = vsel %vm480_vm3, %v6490_v8, %v499_v9 }
  0x80   : > { %9834 = vst [vmem:[#allocation21_spill] sm:$0xff] %v6452_v55  ;;  %v6502_v27 = vld [vmem:[#allocation2 + $0x98] sm:$0xff]  ;;  %v6504_v35 = vld [vmem:[#allocation2 + $0xa0] sm:$0x3]  ;;  %v5031_v62 = vpack.i.bf16 %v500_v48, %v6514_v46 }
  0x81   : > { %9835 = vst [vmem:[#allocation22_spill] sm:$0xff] %v6461_v58  ;;  %v6519_v51 = vrot.slane %v6502_v27, 1  ;;  %v514_v54 = vrot.slane %v6504_v35, 1 }
  0x82   : > { %361 = vst.msk [vmem:[#allocation2 + $0xb1] sm:$0xff] %vm226_vm0, %v6424_v44  ;;  %v6522_v57 = vld [vmem:[#allocation2 + $0xc0] sm:$0xff]  ;;  %v6567_v44 = vld [vmem:[%s6291_s24 + $0xd8] sm:$0xff]  ;;  %5032 = vrot.lane.b32.xlu1 %v5031_v62, %s6081_s20 }
  0x83   : > { %9836 = vst [vmem:[#allocation23_spill] sm:$0xff] %v6469_v61  ;;  %v521_v9 = vrot.slane %v6522_v57, 1  ;;  %v515_v25 = vsel %vm480_vm3, %v6519_v51, %v514_v54 }
  0x84   : > { %364 = vst.msk [vmem:[#allocation2 + $0xd9] sm:$0xff] %vm226_vm0, %v6441_v50  ;;  %v6531_v2 = vld [vmem:[#allocation2 + $0xc8] sm:$0xff]  ;;  %v6533_v7 = vld [vmem:[#allocation2 + $0xd0] sm:$0x3] }
  0x85   : > { %9837 = vst [vmem:[#allocation24_spill] sm:$0xff] %v6481_v5  ;;  %v6548_v48 = vrot.slane %v6531_v2, 1 }
  0x86   : > { %9838 = vst [vmem:[#allocation25_spill] sm:$0xff] %v6485_v6  ;;  %v6551_v50 = vld [vmem:[#allocation2 + $0xa8] sm:$0xff] }
  0x87   : > { %365 = vst.msk [vmem:[#allocation2 + $0xe1] sm:$0xff] %vm226_vm0, %v6452_v55  ;;  %v524_v55 = vrot.slane %v6533_v7, 1  ;;  %v516_v54 = vrot.slane %v6551_v50, 1  ;;  %v6571_v40 = vsel %vm480_vm3, %v521_v9, %v6548_v48 }
  0x88   : > { %9839 = vst [vmem:[#allocation26_spill] sm:$0xff] %v6498_v21 }
  0x89   : > { %368 = vst.msk [vmem:[#allocation2 + $0x109] sm:$0xff] %vm226_vm0, %v6469_v61  ;;  %v6539_v61 = vld [vmem:[%s6291_s24 + $0xb8] sm:$0xff] }
  0x8a   : > { %9840 = vst [vmem:[#allocation27_spill] sm:$0xff] %v6510_v43  ;;  %v6561_v32 = vld [vmem:[#allocation2 + $0xb8] sm:$0x3] }
  0x8b   : > { %9841 = vst [vmem:[#allocation28_spill] sm:$0xff] %v6519_v51  ;;  %v519_v30 = vrot.slane %v6561_v32, 1  ;;  %v6579_v29 = vld [vmem:[#allocation2 + $0xd8] sm:$0xff] }
  0x8c   : > { %9842 = vst [vmem:[#allocation29_spill] sm:$0xff] %v6522_v57  ;;  %v526_v22 = vrot.slane %v6579_v29, 1 }
  0x8d   : > { %369 = vst.msk [vmem:[#allocation2 + $0x111] sm:$0xff] %vm226_vm0, %v6481_v5  ;;  %v6543_v5 = vsel %vm480_vm3, %v511_v38, %v6519_v51  ;;  %v6559_v38 = vld [vmem:[#allocation2 + $0xb0] sm:$0xff] }
  0x8e   : > { %9843 = vst [vmem:[#allocation30_spill] sm:$0xff] %v6527_v59  ;;  %v5046_v36 = vpack.i.bf16 %v515_v25, %v6543_v5  ;;  %v6576_v25 = vrot.slane %v6559_v38, 1  ;;  %v6588_v23 = vld [vmem:[#allocation2 + $0xe0] sm:$0xff] }
  0x8f   : > { %366 = vst.msk [vmem:[#allocation2 + $0xf1] sm:$0xff] %vm226_vm0, %v6498_v21  ;;  %v6556_v21 = vld [vmem:[%s6291_s24 + $0xd0] sm:$0xff] }
  0x90   : > { %9844 = vst [vmem:[#allocation31_spill] sm:$0xff] %v6539_v61  ;;  %v520_v62 = vsel %vm480_vm3, %v6576_v25, %v519_v30  ;;  %v6608_v28 = vld [vmem:[#allocation2 + $0x108] sm:$0xff]  ;;  %5047 = vrot.lane.b32.xlu0 %v5046_v36, %s6081_s20 }
  0x91   : > { %9845 = vst [vmem:[#allocation32_spill] sm:$0xff] %v6543_v5  ;;  %v536_v30 = vrot.slane %v6608_v28, 1 }
  0x92   : > { %9846 = vst [vmem:[#allocation33_spill] sm:$0xff] %v6548_v48 }
  0x93   : > { %367 = vst.msk [vmem:[#allocation2 + $0xf9] sm:$0xff] %vm226_vm0, %v6510_v43  ;;  %v525_v43 = vsel %vm480_vm3, %v6548_v48, %v524_v55  ;;  %v6590_v55 = vld [vmem:[#allocation2 + $0xe8] sm:$0x3] }
  0x94   : > { %9847 = vst [vmem:[#allocation34_spill] sm:$0xff] %v6556_v21  ;;  %v5056_v9 = vpack.i.bf16 %v525_v43, %v6571_v40  ;;  %v6605_v43 = vrot.slane %v6588_v23, 1  ;;  %v529_v10 = vrot.slane %v6590_v55, 1  ;;  %v6616_v26 = vld [vmem:[#allocation2 + $0x110] sm:$0xff] }
  0x95   : > { %370 = vst.msk [vmem:[#allocation2 + $0x121] sm:$0xff] %vm226_vm0, %v6527_v59  ;;  %v6584_v59 = vld [vmem:[%s6291_s24 + $0xc0] sm:$0xff]  ;;  %v6633_v36 = vrot.slane %v6616_v26, 1 }
  0x96   : > { %9848 = vst [vmem:[#allocation35_spill] sm:$0xff] %v6567_v44  ;;  %v6628_v12 = vsel %vm480_vm3, %v526_v22, %v6605_v43  ;;  %v6636_v15 = vld [vmem:[#allocation2 + $0xf0] sm:$0xff]  ;;  %5057 = vrot.lane.b32.xlu2 %v5056_v9, %s6081_s20 }
  0x97   : > { %9849 = vst [vmem:[#allocation36_spill] sm:$0xff] %v6571_v40 }
  0x98   : > { %9850 = vst [vmem:[#allocation37_spill] sm:$0xff] %v6576_v25 }
  0x99   : > { %371 = vst.msk [vmem:[#allocation2 + $0x129] sm:$0xff] %vm226_vm0, %v6539_v61  ;;  %v6600_v61 = vsel %vm480_vm3, %v516_v54, %v6576_v25  ;;  %v6618_v54 = vld [vmem:[#allocation2 + $0x118] sm:$0x3] }
  0x9a   : > { %9851 = vst [vmem:[#allocation38_spill] sm:$0xff] %v6584_v59  ;;  %v539_v19 = vrot.slane %v6618_v54, 1  ;;  %v6642_v40 = vld [vmem:[#allocation2 + $0xf8] sm:$0xff]  ;;  %v6644_v22 = vld [vmem:[#allocation2 + $0x100] sm:$0x3] }
  0x9b   : > { %374 = vst.msk [vmem:[#allocation2 + $0x151] sm:$0xff] %vm226_vm0, %v6556_v21  ;;  %v6613_v21 = vld [vmem:[%s6291_s24 + $0xe0] sm:$0xff]  ;;  %v6656_v9 = vrot.slane %v6642_v40, 1 }
  0x9c   : > { %9852 = vst [vmem:[#allocation39_spill] sm:$0xff] %v6596_v11  ;;  %v6659_v48 = vld [vmem:[#allocation2 + $0x120] sm:$0xff] }
  0x9d   : > { %9853 = vst [vmem:[#allocation40_spill] sm:$0xff] %v6600_v61 }
  0x9e   : > { %9854 = vst [vmem:[#allocation41_spill] sm:$0xff] %v6605_v43 }
  0x9f   : > { %375 = vst.msk [vmem:[#allocation2 + $0x159] sm:$0xff] %vm226_vm0, %v6567_v44  ;;  %v530_v44 = vsel %vm480_vm3, %v6605_v43, %v529_v10  ;;  %v531_v10 = vrot.slane %v6636_v15, 1  ;;  %v6651_v43 = vsel %vm480_vm3, %v536_v30, %v6633_v36  ;;  %v541_v30 = vrot.slane %v6659_v48, 1 }
  0xa0   : > { %9855 = vst [vmem:[#allocation42_spill] sm:$0xff] %v6613_v21  ;;  %v6666_v5 = vld [vmem:[#allocation2 + $0x130] sm:$0x3] }
  0xa1   : > { %372 = vst.msk [vmem:[#allocation2 + $0x139] sm:$0xff] %vm226_vm0, %v6584_v59  ;;  %v5051_v59 = vpack.i.bf16 %v520_v62, %v6600_v61  ;;  %v534_v62 = vrot.slane %v6644_v22, 1  ;;  %v5061_v61 = vpack.i.bf16 %v530_v44, %v6628_v12  ;;  %v6679_v44 = vsel %vm480_vm3, %v531_v10, %v6656_v9 }
  0xa2   : > { %9856 = vst [vmem:[#allocation43_spill] sm:$0xff] %v6624_v13  ;;  %v6673_v25 = vld [vmem:[#allocation2 + $0x150] sm:$0xff] }
  0xa3   : > { %9857 = vst [vmem:[#allocation44_spill] sm:$0xff] %v6628_v12  ;;  %5052 = vrot.lane.b32.xlu1 %v5051_v59, %s6081_s20  ;;  %5062 = vrot.lane.b32.xlu0 %v5061_v61, %s6081_s20 }
  0xa4   : > { %9858 = vst [vmem:[#allocation45_spill] sm:$0xff] %v6633_v36 }
  0xa5   : > { %373 = vst.msk [vmem:[#allocation2 + $0x141] sm:$0xff] %vm226_vm0, %v6596_v11  ;;  %v540_v11 = vsel %vm480_vm3, %v6633_v36, %v539_v19  ;;  %v544_v36 = vrot.slane %v6666_v5, 1 }
  0xa6   : > { %376 = vst.msk [vmem:[#allocation2 + $0x169] sm:$0xff] %vm226_vm0, %v6613_v21  ;;  %v6664_v21 = vld [vmem:[#allocation2 + $0x128] sm:$0xff]  ;;  %v5071_v51 = vpack.i.bf16 %v540_v11, %v6651_v43  ;;  %v6683_v12 = vld [vmem:[#allocation2 + $0x160] sm:$0x3] }
  0xa7   : > { %9859 = vst [vmem:[#allocation46_spill] sm:$0xff] %v6651_v43  ;;  %v6670_v19 = vrot.slane %v6664_v21, 1  ;;  %v554_v59 = vrot.slane %v6683_v12, 1 }
  0xa8   : > { %9860 = vst [vmem:[#allocation47_spill] sm:$0xff] %v6656_v9  ;;  %v6692_v6 = vld [vmem:[#allocation2 + $0x138] sm:$0xff]  ;;  %5072 = vrot.lane.b32.xlu2 %v5071_v51, %s6081_s20 }
  0xa9   : > { %9861 = vst [vmem:[#allocation48_spill] sm:$0xff] %v6659_v48  ;;  %v551_v48 = vrot.slane %v6673_v25, 1  ;;  %v6701_v43 = vsel %vm480_vm3, %v541_v30, %v6670_v19 }
  0xaa   : > { %377 = vst.msk [vmem:[#allocation2 + $0x171] sm:$0xff] %vm226_vm0, %v6624_v13  ;;  %v6681_v13 = vld [vmem:[#allocation2 + $0x158] sm:$0xff] }
  0xab   : > { %9862 = vst [vmem:[#allocation49_spill] sm:$0xff] %v6664_v21  ;;  %v535_v21 = vsel %vm480_vm3, %v6656_v9, %v534_v62  ;;  %v545_v62 = vsel %vm480_vm3, %v6670_v19, %v544_v36 }
  0xac   : > { %9863 = vst [vmem:[#allocation50_spill] sm:$0xff] %v6666_v5  ;;  %v6689_v5 = vrot.slane %v6681_v13, 1  ;;  %v6695_v11 = vld [vmem:[#allocation2 + $0x140] sm:$0xff]  ;;  %v6697_v10 = vld [vmem:[#allocation2 + $0x148] sm:$0x3]  ;;  %v5066_v9 = vpack.i.bf16 %v535_v21, %v6679_v44  ;;  %v5076_v51 = vpack.i.bf16 %v545_v62, %v6701_v43 }
  0xad   : > { %9864 = vst [vmem:[#allocation51_spill] sm:$0xff] %v6670_v19  ;;  %v6721_v36 = vrot.slane %v6695_v11, 1  ;;  %v549_v21 = vrot.slane %v6697_v10, 1 }
  0xae   : > { %9865 = vst [vmem:[#allocation52_spill] sm:$0xff] %v6673_v25  ;;  %v6716_v58 = vsel %vm480_vm3, %v551_v48, %v6689_v5  ;;  %v555_v30 = vsel %vm480_vm3, %v6689_v5, %v554_v59  ;;  %5067 = vrot.lane.b32.xlu1 %v5066_v9, %s6081_s20  ;;  %v663_v59 = vrot.slane %v6409_v39, 2  ;;  %5077 = vrot.lane.b32.xlu0 %v5076_v51, %s6081_s20 }
  0xaf   : > { %9866 = vst [vmem:[#allocation53_spill] sm:$0xff] %v6679_v44  ;;  %v5086_v48 = vpack.i.bf16 %v555_v30, %v6716_v58  ;;  %v550_v62 = vsel %vm480_vm3, %v6721_v36, %v549_v21 }
  0xb0   : > { %9867 = vst [vmem:[#allocation54_spill] sm:$0xff] %v6681_v13  ;;  %v6708_v13 = vld [vmem:[#allocation2 + $0x168] sm:$0xff] }
  0xb1   : > { %9868 = vst [vmem:[#allocation55_spill] sm:$0xff] %v6683_v12  ;;  %v546_v12 = vrot.slane %v6692_v6, 1  ;;  %v6710_v61 = vld [vmem:[#allocation2 + $0x170] sm:$0xff]  ;;  %v6712_v25 = vld [vmem:[#allocation2 + $0x178] sm:$0x3]  ;;  %v556_v19 = vrot.slane %v6708_v13, 1  ;;  %5087 = vrot.lane.b32.xlu2 %v5086_v48, %s6081_s20 }
  0xb2   : > { %9869 = vst [vmem:[#allocation56_spill] sm:$0xff] %v6689_v5  ;;  %v6727_v44 = vrot.slane %v6710_v61, 1  ;;  %v6765_v48 = vrot.slane %v6395_v33, 2 }
  0xb3   : > { %9870 = vst [vmem:[#allocation57_spill] sm:$0xff] %v6692_v6  ;;  %v559_v6 = vrot.slane %v6712_v25, 1  ;;  %v6735_v5 = vsel %vm480_vm3, %v546_v12, %v6721_v36  ;;  %v661_v12 = vrot.slane %v6148_v4, 2  ;;  %v668_v4 = vrot.slane %v6388_v31, 2 }
  0xb4   : > { %9871 = vst [vmem:[#allocation58_spill] sm:$0xff] %v6701_v43  ;;  %v6740_v43 = vrot.slane %v6416_v41, 2  ;;  %v6746_v9 = vsel %vm480_vm3, %v556_v19, %v6727_v44  ;;  %v5081_v30 = vpack.i.bf16 %v550_v62, %v6735_v5  ;;  %v658_v41 = vrot.slane %v6144_v3, 2 }
  0xb5   : > { %9872 = vst [vmem:[#allocation59_spill] sm:$0xff] %v6710_v61  ;;  %v666_v61 = vrot.slane %v6418_v42, 2  ;;  %v560_v39 = vsel %vm480_vm3, %v6727_v44, %v559_v6  ;;  %v659_v42 = vrot.slane %v6137_v1, 2  ;;  %v671_v6 = vrot.slane %v6397_v34, 2 }
  0xb6   : > { %v6757_v21 = vsel %vm657_vm4, %v663_v59, %v6740_v43  ;;  %v5091_v51 = vpack.i.bf16 %v560_v39, %v6746_v9  ;;  %v681_v3 = vrot.slane %v6338_v17, 2  ;;  %5082 = vrot.lane.b32.xlu1 %v5081_v30, %s6081_s20  ;;  %v6774_v39 = vrot.slane %v6336_v16, 2 }
  0xb7   : > { %v667_v19 = vsel %vm657_vm4, %v6740_v43, %v666_v61  ;;  %v660_v59 = vsel %vm657_vm4, %v658_v41, %v659_v42  ;;  %v662_v62 = vsel %vm657_vm4, %v659_v42, %v661_v12  ;;  %v678_v61 = vrot.slane %v6329_v14, 2 }
  0xb8   : > { %v5101_v1 = vpack.i.bf16 %v667_v19, %v6757_v21  ;;  %5092 = vrot.lane.b32.xlu0 %v5091_v51, %s6081_s20  ;;  %v6779_v31 = vsel %vm657_vm4, %v668_v4, %v6765_v48  ;;  %v672_v17 = vsel %vm657_vm4, %v6765_v48, %v671_v6  ;;  %v5096_v33 = vpack.i.bf16 %v662_v62, %v660_v59 }
  0xb9   : > { %v673_v34 = vrot.slane %v6464_v60, 2  ;;  %v6786_v14 = vrot.slane %v6473_v63, 2  ;;  %v676_v16 = vrot.slane %v6475_v0, 2  ;;  %v6791_v12 = vsel %vm657_vm4, %v678_v61, %v6774_v39 }
  0xba   : > { %5102 = vrot.lane.b32.xlu2 %v5101_v1, %s6082_s25  ;;  %v682_v30 = vsel %vm657_vm4, %v6774_v39, %v681_v3  ;;  %v5106_v41 = vpack.i.bf16 %v672_v17, %v6779_v31  ;;  %v683_v42 = vrot.slane %v6436_v49, 2  ;;  %v6798_v19 = vrot.slane %v6444_v52, 2 }
  0xbb   : > { %v686_v60 = vrot.slane %v6446_v53, 2  ;;  %v6804_v63 = vsel %vm657_vm4, %v673_v34, %v6786_v14  ;;  %v5116_v0 = vpack.i.bf16 %v682_v30, %v6791_v12  ;;  %v677_v51 = vsel %vm657_vm4, %v6786_v14, %v676_v16  ;;  %v6815_v53 = vld [vmem:[#allocation2 + $0x28] sm:$0x3] }
  0xbc   : > { %v693_v6 = vrot.slane %v6551_v50, 2  ;;  %v6811_v49 = vrot.slane %v6559_v38, 2  ;;  %v696_v52 = vrot.slane %v6561_v32, 2  ;;  %v6819_v4 = vsel %vm657_vm4, %v683_v42, %v6798_v19 }
  0xbd   : > { %v687_v3 = vsel %vm657_vm4, %v6798_v19, %v686_v60  ;;  %v1194_v1 = vrot.slane %v6815_v53, 1  ;;  %v5111_v50 = vpack.i.bf16 %v677_v51, %v6804_v63  ;;  %v688_v38 = vrot.slane %v6493_v18, 2  ;;  %v9888_v51 = vld [vmem:[#allocation50_spill] sm:$0xff] }
  0xbe   : > { %5097 = vrot.lane.b32.xlu1 %v5096_v33, %s6082_s25  ;;  %v6828_v32 = vrot.slane %v6502_v27, 2  ;;  %v691_v59 = vrot.slane %v6504_v35, 2  ;;  %v6833_v62 = vsel %vm657_vm4, %v693_v6, %v6811_v49  ;;  %v697_v61 = vsel %vm657_vm4, %v6811_v49, %v696_v52  ;;  %v6841_v33 = vld [vmem:[#allocation2 + $0x40] sm:$0x3]  ;;  %v6872_v6 = vld [vmem:[#allocation2 + $0x58] sm:$0x3] }
  0xbf   : > { %9873 = vst [vmem:[#allocation60_spill] sm:$0xff] %v6833_v62  ;;  %v6839_v17 = vsel %vm480_vm3, %v6433_v47, %v1194_v1  ;;  %v5121_v18 = vpack.i.bf16 %v687_v3, %v6819_v4  ;;  %v1199_v35 = vrot.slane %v6841_v33, 1  ;;  %v698_v34 = vrot.slane %v6522_v57, 2  ;;  %v6874_v52 = vld [vmem:[#allocation2 + $0x70] sm:$0x3]  ;;  %v9890_v57 = vld [vmem:[#allocation28_spill] sm:$0xff] }
  0xc0   : > { %5107 = vrot.lane.b32.xlu0 %v5106_v41, %s6082_s25  ;;  %v6849_v16 = vrot.slane %v6531_v2, 2  ;;  %v701_v30 = vrot.slane %v6533_v7, 2  ;;  %v6855_v47 = vsel %vm657_vm4, %v688_v38, %v6828_v32  ;;  %v692_v41 = vsel %vm657_vm4, %v6828_v32, %v691_v59 }
  0xc1   : > { %v5131_v42 = vpack.i.bf16 %v697_v61, %v6833_v62  ;;  %v6862_v60 = vsel %vm480_vm3, %v6406_v37, %v1199_v35  ;;  %v708_v2 = vrot.slane %v6636_v15, 2  ;;  %v711_v7 = vrot.slane %v6644_v22, 2 }
  0xc2   : > { %5117 = vrot.lane.b32.xlu2 %v5116_v0, %s6082_s25  ;;  %9874 = vst [vmem:[#allocation61_spill] sm:$0xff] %v6849_v16  ;;  %v6866_v0 = vrot.slane %v6642_v40, 2  ;;  %v6878_v37 = vsel %vm657_vm4, %v698_v34, %v6849_v16  ;;  %v702_v15 = vsel %vm657_vm4, %v6849_v16, %v701_v30  ;;  %v1204_v40 = vrot.slane %v6872_v6, 1  ;;  %v9897_v16 = vld [vmem:[#allocation55_spill] sm:$0xff] }
  0xc3   : > { %9876 = vst [vmem:[#allocation63_spill] sm:$0xff] %v6878_v37  ;;  %v1209_v22 = vrot.slane %v6874_v52, 1  ;;  %v5126_v3 = vpack.i.bf16 %v692_v41, %v6855_v47  ;;  %v703_v1 = vrot.slane %v6579_v29, 2  ;;  %v706_v38 = vrot.slane %v6590_v55, 2  ;;  %v6905_v29 = vld [vmem:[#allocation2 + $0x88] sm:$0x3] }
  0xc4   : > { %9875 = vst [vmem:[#allocation62_spill] sm:$0xff] %v6866_v0  ;;  %v6893_v59 = vsel %vm657_vm4, %v708_v2, %v6866_v0  ;;  %v712_v61 = vsel %vm657_vm4, %v6866_v0, %v711_v7  ;;  %v1214_v30 = vrot.slane %v6905_v29, 1  ;;  %v713_v41 = vrot.slane %v6608_v28, 2  ;;  %v9881_v28 = vld [vmem:[#allocation57_spill] sm:$0xff]  ;;  %v6938_v55 = vld [vmem:[#allocation2 + $0xa0] sm:$0x3] }
  0xc5   : > { %9877 = vst [vmem:[#allocation64_spill] sm:$0xff] %v6893_v59  ;;  %v6903_v35 = vsel %vm480_vm3, %v6347_v20, %v1209_v22  ;;  %v716_v20 = vrot.slane %v6618_v54, 2  ;;  %v5146_v7 = vpack.i.bf16 %v712_v61, %v6893_v59  ;;  %v6932_v22 = vrot.slane %v6695_v11, 2 }
  0xc6   : > { %5112 = vrot.lane.b32.xlu1 %v5111_v50, %s6082_s25  ;;  %v6888_v50 = vrot.slane %v6588_v23, 2  ;;  %v5136_v23 = vpack.i.bf16 %v702_v15, %v6878_v37  ;;  %v9880_v15 = vld [vmem:[#allocation22_spill] sm:$0xff]  ;;  %v726_v54 = vrot.slane %v6697_v10, 2  ;;  %v1219_v11 = vrot.slane %v6938_v55, 1 }
  0xc7   : > { %9882 = vst [vmem:[#allocation22_spill] sm:$0xff] %v6932_v22  ;;  %v721_v27 = vrot.slane %v9888_v51, 2  ;;  %v9892_v51 = vld [vmem:[#allocation32_spill] sm:$0xff] }
  0xc8   : > { %5122 = vrot.lane.b32.xlu0 %v5121_v18, %s6082_s25  ;;  %v6899_v18 = vsel %vm480_vm3, %v6490_v8, %v1204_v40  ;;  %v6915_v8 = vrot.slane %v6616_v26, 2  ;;  %v707_v2 = vsel %vm657_vm4, %v6888_v50, %v706_v38  ;;  %v6928_v40 = vsel %vm480_vm3, %v9880_v15, %v1214_v30  ;;  %v6940_v38 = vld [vmem:[#allocation2 + $0xb8] sm:$0x3] }
  0xc9   : > { %v723_v26 = vrot.slane %v9881_v28, 2  ;;  %v1224_v10 = vrot.slane %v6940_v38, 1 }
  0xca   : > { %5132 = vrot.lane.b32.xlu2 %v5131_v42, %s6082_s25  ;;  %9878 = vst [vmem:[#allocation65_spill] sm:$0xff] %v6915_v8  ;;  %v6921_v42 = vsel %vm657_vm4, %v703_v1, %v6888_v50  ;;  %v6944_v61 = vsel %vm657_vm4, %v713_v41, %v6915_v8  ;;  %v717_v30 = vsel %vm657_vm4, %v6915_v8, %v716_v20  ;;  %v9886_v1 = vld [vmem:[#allocation49_spill] sm:$0xff] }
  0xcb   : > { %9879 = vst [vmem:[#allocation66_spill] sm:$0xff] %v6921_v42  ;;  %v5141_v15 = vpack.i.bf16 %v707_v2, %v6921_v42  ;;  %v6954_v34 = vrot.slane %v9886_v1, 2  ;;  %v6959_v41 = vsel %vm657_vm4, %v723_v26, %v6932_v22  ;;  %v727_v20 = vsel %vm657_vm4, %v6932_v22, %v726_v54  ;;  %v9891_v2 = vld [vmem:[#allocation37_spill] sm:$0xff]  ;;  %v9893_v26 = vld [vmem:[#allocation40_spill] sm:$0xff] }
  0xcc   : > { %9884 = vst [vmem:[#allocation57_spill] sm:$0xff] %v6944_v61  ;;  %v6965_v8 = vsel %vm480_vm3, %v9890_v57, %v1219_v11  ;;  %v5151_v1 = vpack.i.bf16 %v717_v30, %v6944_v61  ;;  %v9894_v22 = vld [vmem:[#allocation52_spill] sm:$0xff]  ;;  %v9895_v57 = vld [vmem:[#allocation54_spill] sm:$0xff]  ;;  %v9898_v30 = vld [vmem:[#allocation33_spill] sm:$0xff] }
  0xcd   : > { %v728_v0 = vrot.slane %v9894_v22, 2  ;;  %v6981_v11 = vrot.slane %v9895_v57, 2  ;;  %v722_v37 = vsel %vm657_vm4, %v6954_v34, %v721_v27  ;;  %v9900_v22 = vld [vmem:[#allocation36_spill] sm:$0xff]  ;;  %v6996_v57 = vld [vmem:[#allocation2 + $0xe8] sm:$0x3] }
  0xce   : > { %5127 = vrot.lane.b32.xlu1 %v5126_v3, %s6082_s25  ;;  %v9883_v3 = vld [vmem:[#allocation25_spill] sm:$0xff] }
  0xcf   : > { %9887 = vst [vmem:[#allocation25_spill] sm:$0xff] %v6954_v34 }
  0xd0   : > { %5137 = vrot.lane.b32.xlu0 %v5136_v23, %s6082_s25  ;;  %v9885_v23 = vld [vmem:[#allocation48_spill] sm:$0xff]  ;;  %9896 = vst [vmem:[#allocation49_spill] sm:$0xff] %v6981_v11 }
  0xd1   : > { %v718_v28 = vrot.slane %v9885_v23, 2  ;;  %9889 = vst [vmem:[#allocation48_spill] sm:$0xff] %v6959_v41  ;;  %v6971_v23 = vld [vmem:[#allocation2 + $0xd0] sm:$0x3] }
  0xd2   : > { %5147 = vrot.lane.b32.xlu2 %v5146_v7, %s6082_s25  ;;  %v6969_v7 = vsel %vm480_vm3, %v9891_v2, %v1224_v10  ;;  %v1229_v54 = vrot.slane %v6971_v23, 1  ;;  %v731_v10 = vrot.slane %v9897_v16, 2  ;;  %v5161_v2 = vpack.i.bf16 %v727_v20, %v6959_v41  ;;  %v6998_v16 = vld [vmem:[#allocation2 + $0x100] sm:$0x3] }
  0xd3   : > { %v6990_v59 = vsel %vm657_vm4, %v718_v28, %v6954_v34  ;;  %9901 = vst [vmem:[#allocation28_spill] sm:$0xff] %v6998_v16  ;;  %v1234_v28 = vrot.slane %v6996_v57, 1  ;;  %v7019_v34 = vld [vmem:[#allocation2 + $0x118] sm:$0x3] }
  0xd4   : > { %v1230_v61 = vsel %vm480_vm3, %v9898_v30, %v1229_v54  ;;  %9899 = vst [vmem:[#allocation50_spill] sm:$0xff] %v6990_v59  ;;  %v732_v20 = vsel %vm657_vm4, %v6981_v11, %v731_v10  ;;  %v1239_v54 = vrot.slane %v6998_v16, 1  ;;  %v5156_v27 = vpack.i.bf16 %v722_v37, %v6990_v59  ;;  %v9905_v10 = vld [vmem:[#allocation47_spill] sm:$0xff] }
  0xd5   : > { %v5211_v42 = vpack.i.bf16 %v1230_v61, %v9900_v22  ;;  %v733_v61 = vrot.slane %v6708_v13, 2  ;;  %v736_v22 = vrot.slane %v6712_v25, 2  ;;  %v9907_v13 = vld [vmem:[#allocation53_spill] sm:$0xff] }
  0xd6   : > { %5142 = vrot.lane.b32.xlu1 %v5141_v15, %s6082_s25  ;;  %v7002_v15 = vsel %vm657_vm4, %v728_v0, %v6981_v11  ;;  %v9904_v0 = vld [vmem:[#allocation41_spill] sm:$0xff]  ;;  %v1240_v11 = vsel %vm480_vm3, %v9905_v10, %v1239_v54  ;;  %v7041_v10 = vld [vmem:[%s6291_s24 + $0xf0] sm:$0xff] }
  0xd7   : > { %9902 = vst [vmem:[#allocation37_spill] sm:$0xff] %v7002_v15  ;;  %v1235_v41 = vsel %vm480_vm3, %v9904_v0, %v1234_v28  ;;  %v5166_v37 = vpack.i.bf16 %v732_v20, %v7002_v15  ;;  %v5221_v16 = vpack.i.bf16 %v1240_v11, %v9907_v13  ;;  %v9908_v25 = vld [vmem:[#allocation45_spill] sm:$0xff]  ;;  %v9909_v0 = vld [vmem:[#allocation46_spill] sm:$0xff]  ;;  %v7046_v13 = vld [vmem:[%s6291_s24 + $0xf8] sm:$0xff] }
  0xd8   : > { %5152 = vrot.lane.b32.xlu0 %v5151_v1, %s6082_s25  ;;  %v9903_v1 = vld [vmem:[#allocation59_spill] sm:$0xff]  ;;  %v7038_v11 = vld [vmem:[#allocation2 + $0x148] sm:$0x3]  ;;  %9910 = vst [vmem:[#allocation32_spill] sm:$0xff] %v7041_v10 }
  0xd9   : > { %v7012_v30 = vrot.slane %v9903_v1, 2  ;;  %v1244_v1 = vrot.slane %v7019_v34, 1  ;;  %9911 = vst [vmem:[#allocation40_spill] sm:$0xff] %v7046_v13 }
  0xda   : > { %5162 = vrot.lane.b32.xlu2 %v5161_v2, %s6082_s25  ;;  %v9906_v2 = vld [vmem:[#allocation44_spill] sm:$0xff]  ;;  %378 = vst.msk [vmem:[#allocation2 + $0x181] sm:$0xff] %vm226_vm0, %v7041_v10 }
  0xdb   : > { %v5216_v59 = vpack.i.bf16 %v1235_v41, %v9906_v2  ;;  %v1245_v62 = vsel %vm480_vm3, %v9908_v25, %v1244_v1  ;;  %v7030_v28 = vsel %vm657_vm4, %v733_v61, %v7012_v30  ;;  %v737_v54 = vsel %vm657_vm4, %v7012_v30, %v736_v22  ;;  %v7036_v41 = vld [vmem:[#allocation2 + $0x130] sm:$0x3]  ;;  %379 = vst.msk [vmem:[#allocation2 + $0x189] sm:$0xff] %vm226_vm0, %v7046_v13  ;;  %v9913_v22 = vld [vmem:[#allocation51_spill] sm:$0xff]  ;;  %v7061_v25 = vld [vmem:[#allocation2 + $0x160] sm:$0x3] }
  0xdc   : > { %v5226_v20 = vpack.i.bf16 %v1245_v62, %v9909_v0  ;;  %v1254_v2 = vrot.slane %v7038_v11, 1  ;;  %v5171_v61 = vpack.i.bf16 %v737_v54, %v7030_v28  ;;  %v9912_v62 = vpack.i.bf16 %v6839_v17, %v6456_v56  ;;  %v9914_v0 = vld [vmem:[#allocation58_spill] sm:$0xff]  ;;  %v9915_v56 = vld [vmem:[#allocation56_spill] sm:$0xff] }
  0xdd   : > { %v1259_v15 = vrot.slane %v7061_v25, 1  ;;  %v7352_v13 = vld [vmem:[#allocation2 + $0xe0] sm:$0xff] }
  0xde   : > { %5157 = vrot.lane.b32.xlu1 %v5156_v27, %s6082_s25  ;;  %v1249_v27 = vrot.slane %v7036_v41, 1  ;;  %v1255_v1 = vsel %vm480_vm3, %v6721_v36, %v1254_v2  ;;  %v7074_v36 = vld [vmem:[#allocation2 + $0x178] sm:$0x3]  ;;  %9950 = vst [vmem:[#allocation58_spill] sm:$0xff] %v7352_v13 }
  0xdf   : > { %v5236_v54 = vpack.i.bf16 %v1255_v1, %v6735_v5  ;;  %v1260_v17 = vsel %vm480_vm3, %v9915_v56, %v1259_v15  ;;  %v1264_v2 = vrot.slane %v7074_v36, 1  ;;  %v9917_v5 = vpack.i.bf16 %v6903_v35, %v6362_v24 }
  0xe0   : > { %5167 = vrot.lane.b32.xlu0 %v5166_v37, %s6082_s25  ;;  %v1250_v37 = vsel %vm480_vm3, %v9913_v22, %v1249_v27  ;;  %v9916_v27 = vpack.i.bf16 %v6862_v60, %v6428_v45  ;;  %v9918_v45 = vpack.i.bf16 %v6899_v18, %v6514_v46  ;;  %v9919_v60 = vpack.i.bf16 %v6928_v40, %v9883_v3 }
  0xe1   : > { %v5231_v10 = vpack.i.bf16 %v1250_v37, %v9914_v0  ;;  %v1265_v15 = vsel %vm480_vm3, %v6727_v44, %v1264_v2  ;;  %v9920_v24 = vpack.i.bf16 %v6969_v7, %v9893_v26  ;;  %v9922_v44 = vpack.i.bf16 %v6965_v8, %v9892_v51 }
  0xe2   : > { %5177 = vrot.lane.b32.xlu2 %v9912_v62, %s6081_s20  ;;  %v5241_v62 = vpack.i.bf16 %v1260_v17, %v6716_v58  ;;  %v5246_v58 = vpack.i.bf16 %v1265_v15, %v6746_v9  ;;  %v7108_v9 = vld [vmem:[#allocation2 + $0x180] sm:$0xff]  ;;  %v7110_v18 = vld [vmem:[#allocation2 + $0x188] sm:$0xff]  ;;  %v7112_v40 = vld [vmem:[#allocation2 + $0x190] sm:$0x3]  ;;  %v1385_v56 = vrot.slane %v6874_v52, 2  ;;  %v1390_v2 = vrot.slane %v6905_v29, 2 }
  0xe3   : > { %v1266_v3 = vrot.slane %v7108_v9, 1  ;;  %v7117_v7 = vrot.slane %v7110_v18, 1  ;;  %v1269_v8 = vrot.slane %v7112_v40, 1  ;;  %v1410_v29 = vrot.slane %v6996_v57, 2  ;;  %v9926_v57 = vld [vmem:[#allocation60_spill] sm:$0xff] }
  0xe5   : > { %v7126_v51 = vsel %vm480_vm3, %v1266_v3, %v7117_v7  ;;  %v9927_v3 = vld [vmem:[#allocation28_spill] sm:$0xff] }
  0xe6   : > { %5172 = vrot.lane.b32.xlu1 %v5171_v61, %s6082_s25  ;;  %v7081_v61 = vpop.permute.xlu2 %5037 }
  0xe8   : > { %5182 = vrot.lane.b32.xlu0 %v9916_v27, %s6081_s20  ;;  %v7136_v37 = vpop.permute.xlu1 %5027 }
  0xea   : > { %5192 = vrot.lane.b32.xlu2 %v9917_v5, %s6081_s20 }
  0xee   : > { %5187 = vrot.lane.b32.xlu1 %v9918_v45, %s6081_s20  ;;  %v7098_v35 = vpop.permute.xlu2 %5042  ;;  %v1391_v45 = vsel %vm657_vm4, %v6798_v19, %v1390_v2  ;;  %v1411_v19 = vsel %vm657_vm4, %v6888_v50, %v1410_v29  ;;  %v9930_v50 = vld [vmem:[#allocation62_spill] sm:$0xff] }
  0xef   : > { %9921 = vst [vmem:[#allocation52_spill] sm:$0xff] %v7098_v35  ;;  %v7406_v35 = vld [vmem:[#allocation2 + $0x120] sm:$0xff] }
  0xf0   : > { %5197 = vrot.lane.b32.xlu0 %v9919_v60, %s6081_s20 }
  0xf2   : > { %5207 = vrot.lane.b32.xlu2 %v9920_v24, %s6081_s20 }
  0xf6   : > { %5202 = vrot.lane.b32.xlu1 %v9922_v44, %s6081_s20  ;;  %v7106_v46 = vpop.permute.xlu2 %5057 }
  0xf8   : > { %5212 = vrot.lane.b32.xlu0 %v5211_v42, %s6081_s20  ;;  %v7121_v42 = vpop.permute.xlu0 %5017 }
  0xf9   : > { %v5020_v29 = vunpack.i.h.bf16 %v7121_v42 }
  0xfa   : > { %5222 = vrot.lane.b32.xlu2 %v5221_v16, %s6081_s20  ;;  %v1370_v16 = vrot.slane %v6815_v53, 2 }
  0xfc   : > { %v1371_v1 = vsel %vm657_vm4, %v6740_v43, %v1370_v16  ;;  %v9929_v16 = vld [vmem:[#allocation61_spill] sm:$0xff] }
  0xfe   : > { %5217 = vrot.lane.b32.xlu1 %v5216_v59, %s6081_s20  ;;  %v1270_v59 = vsel %vm480_vm3, %v7117_v7, %v1269_v8  ;;  %v1415_v8 = vrot.slane %v9927_v3, 2  ;;  %v7249_v3 = vld [vmem:[#allocation2 + $0x50] sm:$0xff] }
  0xff   : > { %v5251_v22 = vpack.i.bf16 %v1270_v59, %v7126_v51 }
 0x100   : > { %5227 = vrot.lane.b32.xlu0 %v5226_v20, %s6081_s20  ;;  %v1380_v20 = vrot.slane %v6872_v6, 2  ;;  %v7141_v0 = vpop.permute.xlu0 %5022  ;;  %v5256_v6 = vpack.i.bf16 %v1371_v1, %v6757_v21  ;;  %v7162_v21 = vpop.permute.xlu1 %5032 }
 0x102   : > { %5237 = vrot.lane.b32.xlu2 %v5236_v54, %s6081_s20  ;;  %v7130_v26 = vpop.permute.xlu2 %5072  ;;  %v1375_v54 = vrot.slane %v6841_v33, 2  ;;  %v1381_v53 = vsel %vm657_vm4, %v6786_v14, %v1380_v20  ;;  %v4867_v33 = vld [vmem:[%s9697_s1] sm:$0xf]  ;;  %v4997_v14 = vld [vmem:[%s9697_s1] sm:$0x30] }
 0x103   : > { %v5266_v17 = vpack.i.bf16 %v1381_v53, %v6804_v63  ;;  %v4868_v52 = vor.u32 %v4997_v14, %v4867_v33  ;;  %v1386_v63 = vsel %vm657_vm4, %v6774_v39, %v1385_v56  ;;  %v1400_v39 = vrot.slane %v6940_v38, 2  ;;  %v9933_v56 = vld [vmem:[#allocation25_spill] sm:$0xff]  ;;  %v9936_v14 = vld [vmem:[#allocation50_spill] sm:$0xff] }
 0x104   : > { %v1376_v43 = vsel %vm657_vm4, %v6765_v48, %v1375_v54  ;;  %v9932_v54 = vld [vmem:[#allocation63_spill] sm:$0xff]  ;;  %v1430_v33 = vrot.slane %v7038_v11, 2  ;;  %v9941_v11 = vld [vmem:[#allocation57_spill] sm:$0xff] }
 0x105   : > { %v5261_v48 = vpack.i.bf16 %v1376_v43, %v6779_v31 }
 0x106   : > { %5232 = vrot.lane.b32.xlu1 %v5231_v10, %s6081_s20 }
 0x108   : > { %5242 = vrot.lane.b32.xlu0 %v5241_v62, %s6081_s20  ;;  %v1395_v62 = vrot.slane %v6938_v55, 2  ;;  %v7167_v27 = vpop.permute.xlu0 %5047  ;;  %v972_v55 = vsel %vm657_vm4, %v4868_v52, 0 }
 0x109   : > { %9924 = vst [vmem:[#allocation55_spill] sm:$0xff] %v7167_v27  ;;  %981 = vmatpush.bf16.msra.mxu0 %v972_v55  ;;  %5003 = vmatpush.bf16.msra.mxu2 %v972_v55  ;;  %v1440_v55 = vrot.slane %v7074_v36, 2  ;;  %v5060_v27 = vunpack.i.h.bf16 %v7106_v46 }
 0x10a   : > { %5252 = vrot.lane.b32.xlu2 %v5251_v22, %s6081_s20  ;;  %v1396_v5 = vsel %vm657_vm4, %v6828_v32, %v1395_v62  ;;  %v1401_v32 = vsel %vm657_vm4, %v6811_v49, %v1400_v39  ;;  %v9928_v49 = vld [vmem:[#allocation66_spill] sm:$0xff]  ;;  %v1425_v22 = vrot.slane %v7036_v41, 2  ;;  %v9935_v41 = vld [vmem:[#allocation64_spill] sm:$0xff] }
 0x10b   : > { %v7147_v10 = vpop.permute.xlu2 %5087  ;;  %v5281_v31 = vpack.i.bf16 %v1396_v5, %v6855_v47  ;;  %v1405_v47 = vrot.slane %v6971_v23, 2  ;;  %v5286_v44 = vpack.i.bf16 %v1401_v32, %v9926_v57  ;;  %v5296_v59 = vpack.i.bf16 %v1411_v19, %v9928_v49  ;;  %9960 = vst [vmem:[#allocation64_spill] sm:$0xff] %v7406_v35 }
 0x10c   : > { %9923 = vst [vmem:[#allocation54_spill] sm:$0xff] %v7147_v10  ;;  %v1416_v23 = vsel %vm657_vm4, %v9930_v50, %v1415_v8  ;;  %v1441_v36 = vsel %vm657_vm4, %v7012_v30, %v1440_v55  ;;  %v1442_v19 = vrot.slane %v7108_v9, 2  ;;  %v7245_v57 = vrot.slane %v7110_v18, 2  ;;  %v7251_v8 = vld [vmem:[#allocation2 + $0x58] sm:$0x3]  ;;  %v5978_v30 = vld [vmem:[#allocation2] sm:$0xff] }
 0x10d   : > { %v5301_v62 = vpack.i.bf16 %v1416_v23, %v9935_v41  ;;  %v5326_v49 = vpack.i.bf16 %v1441_v36, %v7030_v28  ;;  %v9944_v9 = vld [vmem:[#allocation49_spill] sm:$0xff]  ;;  %v1908_v50 = vrot.slane %v7251_v8, 1 }
 0x10e   : > { %5247 = vrot.lane.b32.xlu1 %v5246_v58, %s6081_s20  ;;  %v5271_v58 = vpack.i.bf16 %v1386_v63, %v6791_v12  ;;  %v5276_v12 = vpack.i.bf16 %v1391_v45, %v6819_v4  ;;  %v1406_v4 = vsel %vm657_vm4, %v9929_v16, %v1405_v47  ;;  %v9937_v63 = vld [vmem:[#allocation65_spill] sm:$0xff]  ;;  %v1435_v45 = vrot.slane %v7061_v25, 2  ;;  %9943 = vst [vmem:[#allocation44_spill] sm:$0xff] %v7245_v57  ;;  %v7261_v16 = vld [vmem:[#allocation2 + $0x38] sm:$0xff] }
 0x10f   : > { %v5291_v53 = vpack.i.bf16 %v1406_v4, %v9932_v54  ;;  %v1445_v25 = vrot.slane %v7112_v40, 2  ;;  %v7263_v4 = vld [vmem:[#allocation2 + $0x40] sm:$0x3]  ;;  %v1906_v40 = vrot.slane %v7249_v3, 1  ;;  %v5979_v54 = vld [vmem:[#allocation2 + $0x8] sm:$0xff] }
 0x110   : > { %5257 = vrot.lane.b32.xlu0 %v5256_v6, %s6082_s25  ;;  %v1420_v6 = vrot.slane %v7019_v34, 2  ;;  %v9939_v34 = vld [vmem:[#allocation22_spill] sm:$0xff]  ;;  %v1436_v18 = vsel %vm657_vm4, %v9944_v9, %v1435_v45  ;;  %v835_v28 = vsel %vm226_vm0, %v5979_v54, %v5020_v29  ;;  %v1903_v55 = vrot.slane %v7263_v4, 1  ;;  %v7316_v54 = vld [vmem:[#allocation2 + $0x78] sm:$0xff] }
 0x111   : > { %v1431_v5 = vsel %vm657_vm4, %v9939_v34, %v1430_v33  ;;  %v4999_v33 = vld [vmem:[%s9697_s1 + $0x10] sm:$0x30]  ;;  %v7289_v34 = vld [vmem:[#allocation2 + $0x60] sm:$0xff]  ;;  %v1909_v29 = vsel %vm480_vm3, %v1906_v40, %v1908_v50 }
 0x112   : > { %5267 = vrot.lane.b32.xlu2 %v5266_v17, %s6082_s25  ;;  %v1426_v17 = vsel %vm657_vm4, %v9933_v56, %v1425_v22 }
 0x113   : > { %v5311_v52 = vpack.i.bf16 %v1426_v17, %v9936_v14  ;;  %v1446_v17 = vsel %vm657_vm4, %v7245_v57, %v1445_v25  ;;  %v7302_v25 = vld [vmem:[#allocation2 + $0x90] sm:$0xff] }
 0x114   : > { %v7175_v15 = vpop.permute.xlu2 %5102 }
 0x115   : > { %v7184_v60 = vpop.permute.xlu1 %5052  ;;  %v7189_v24 = vpop.permute.xlu0 %5062  ;;  %v5104_v10 = vunpack.i.l.bf16 %v7175_v15 }
 0x116   : > { %5262 = vrot.lane.b32.xlu1 %v5261_v48, %s6082_s25  ;;  %9925 = vst [vmem:[#allocation33_spill] sm:$0xff] %v7184_v60  ;;  %v1421_v48 = vsel %vm657_vm4, %v9937_v63, %v1420_v6  ;;  %v7365_v60 = vld [vmem:[#allocation2 + $0xc8] sm:$0xff] }
 0x118   : > { %5272 = vrot.lane.b32.xlu0 %v5271_v58, %s6082_s25  ;;  %v5019_v58 = vunpack.i.l.bf16 %v7121_v42 }
 0x11a   : > { %5282 = vrot.lane.b32.xlu2 %v5281_v31, %s6082_s25  ;;  %v5306_v31 = vpack.i.bf16 %v1421_v48, %v9941_v11  ;;  %v834_v42 = vsel %vm226_vm0, %v5978_v30, %v5019_v58  ;;  %v1901_v48 = vrot.slane %v7261_v16, 1  ;;  %v7293_v58 = vld [vmem:[#allocation2 + $0x70] sm:$0x3]  ;;  %v7304_v30 = vld [vmem:[#allocation2 + $0x98] sm:$0xff] }
 0x11c   : > { %v7196_v38 = vpop.permute.xlu2 %5117 }
 0x11e   : > { %5277 = vrot.lane.b32.xlu1 %v5276_v12, %s6082_s25  ;;  %v9942_v12 = vld [vmem:[#allocation48_spill] sm:$0xff] }
 0x11f   : > { %v5316_v47 = vpack.i.bf16 %v1431_v5, %v9942_v12  ;;  %v7291_v5 = vld [vmem:[#allocation2 + $0x68] sm:$0xff] }
 0x120   : > { %v7205_v20 = vpop.permute.xlu1 %5067  ;;  %5287 = vrot.lane.b32.xlu0 %v5286_v44, %s6082_s25  ;;  %v7210_v1 = vpop.permute.xlu0 %5077  ;;  %v7247_v44 = vld [vmem:[#allocation2 + $0x48] sm:$0xff] }
 0x121   : > { %9931 = vst [vmem:[#allocation36_spill] sm:$0xff] %v7210_v1  ;;  %v1905_v22 = vrot.slane %v7247_v44, 1 }
 0x122   : > { %5297 = vrot.lane.b32.xlu2 %v5296_v59, %s6082_s25  ;;  %v7257_v59 = vld [vmem:[#allocation2 + $0x30] sm:$0xff] }
 0x123   : > { %v1900_v41 = vrot.slane %v7257_v59, 1  ;;  %v1907_v36 = vsel %vm480_vm3, %v1905_v22, %v1906_v40  ;;  %v1913_v22 = vrot.slane %v7293_v58, 1 }
 0x124   : > { %v7217_v43 = vpop.permute.xlu2 %5132  ;;  %v5341_v50 = vpack.i.bf16 %v1909_v29, %v1907_v36  ;;  %v7339_v36 = vld [vmem:[#allocation2 + $0xb8] sm:$0x3]  ;;  %v5059_v29 = vunpack.i.l.bf16 %v7106_v46 }
 0x125   : > { %9934 = vst [vmem:[#allocation59_spill] sm:$0xff] %v7217_v43  ;;  %v1902_v40 = vsel %vm480_vm3, %v1900_v41, %v1901_v48 }
 0x126   : > { %5292 = vrot.lane.b32.xlu1 %v5291_v53, %s6082_s25  ;;  %v7272_v53 = vsel %vm657_vm4, %v1442_v19, %v7245_v57 }
 0x127   : > { %9945 = vst [vmem:[#allocation53_spill] sm:$0xff] %v7272_v53  ;;  %v5331_v19 = vpack.i.bf16 %v1446_v17, %v7272_v53 }
 0x128   : > { %v7226_v2 = vpop.permute.xlu1 %5082  ;;  %5302 = vrot.lane.b32.xlu0 %v5301_v62, %s6082_s25  ;;  %v4911_v62 = vld [vmem:[%s9697_s1 + $0x10] sm:$0xf] }
 0x129   : > { %9938 = vst [vmem:[#allocation41_spill] sm:$0xff] %v7226_v2  ;;  %v4912_v11 = vor.u32 %v4999_v33, %v4911_v62  ;;  %v7326_v33 = vld [vmem:[#allocation2 + $0x88] sm:$0x3]  ;;  %v1936_v2 = vrot.slane %v7352_v13, 1  ;;  %v7410_v13 = vld [vmem:[#allocation2 + $0x130] sm:$0x3] }
 0x12a   : > { %v7232_v39 = vpop.permute.xlu0 %5092  ;;  %5312 = vrot.lane.b32.xlu2 %v5311_v52, %s6082_s25  ;;  %v9946_v52 = vld [vmem:[#allocation37_spill] sm:$0xff]  ;;  %9962 = vst [vmem:[#allocation65_spill] sm:$0xff] %v7410_v13 }
 0x12b   : > { %9940 = vst [vmem:[#allocation47_spill] sm:$0xff] %v7232_v39  ;;  %v5321_v63 = vpack.i.bf16 %v1436_v18, %v9946_v52  ;;  %v2389_v9 = vsel %vm657_vm4, %v4912_v11, 0  ;;  %v1911_v18 = vrot.slane %v7291_v5, 1  ;;  %v7354_v39 = vld [vmem:[#allocation2 + $0xe8] sm:$0x3] }
 0x12c   : > { %v7240_v32 = vpop.permute.xlu2 %5147  ;;  %2398 = vmatpush.bf16.msrb.mxu2 %v2389_v9  ;;  %9951 = vst [vmem:[#allocation56_spill] sm:$0xff] %v7354_v39  ;;  %v1938_v53 = vrot.slane %v7354_v39, 1  ;;  %v7408_v39 = vld [vmem:[#allocation2 + $0x128] sm:$0xff] }
 0x12d   : > { %v1914_v52 = vsel %vm480_vm3, %v1911_v18, %v1913_v22  ;;  %v5105_v22 = vunpack.i.h.bf16 %v7175_v15  ;;  %9961 = vst [vmem:[#allocation50_spill] sm:$0xff] %v7408_v39 }
 0x12e   : > { %5307 = vrot.lane.b32.xlu1 %v5306_v31, %s6082_s25 }
 0x130   : > { %v5098_v23 = vpop.permute.xlu1 %5097  ;;  %5317 = vrot.lane.b32.xlu0 %v5316_v47, %s6082_s25 }
 0x131   : > { %v5100_v6 = vunpack.i.h.bf16 %v5098_v23  ;;  %v5099_v56 = vunpack.i.l.bf16 %v5098_v23  ;;  %v1904_v23 = vsel %vm480_vm3, %v1901_v48, %v1903_v55  ;;  %v1915_v55 = vrot.slane %v7316_v54, 1 }
 0x132   : > { %v7283_v14 = vpop.permute.xlu0 %5107  ;;  %5327 = vrot.lane.b32.xlu2 %v5326_v49, %s6082_s25  ;;  %v7306_v49 = vld [vmem:[#allocation2 + $0xa0] sm:$0x3]  ;;  %v5336_v48 = vpack.i.bf16 %v1904_v23, %v1902_v40  ;;  %v7350_v23 = vld [vmem:[#allocation2 + $0xd8] sm:$0xff] }
 0x133   : > { %v867_v31 = vsel %vm866_vm5, %v834_v42, %v5099_v56  ;;  %v868_v45 = vsel %vm866_vm5, %v835_v28, %v5100_v6  ;;  %v1910_v42 = vrot.slane %v7289_v34, 1  ;;  %v7318_v28 = vld [vmem:[#allocation2 + $0x80] sm:$0xff]  ;;  %v1920_v6 = vrot.slane %v7302_v25, 1 }
 0x134   : > { %v899_v12 = vpack.c.bf16 %v868_v45, %v867_v31  ;;  %v7299_v47 = vpop.permute.xlu2 %5162  ;;  %v1921_v56 = vrot.slane %v7304_v30, 1  ;;  %v1923_v17 = vrot.slane %v7306_v49, 1  ;;  %v1916_v11 = vrot.slane %v7318_v28, 1  ;;  %v7335_v31 = vld [vmem:[#allocation2 + $0xa8] sm:$0xff]  ;;  %v7337_v45 = vld [vmem:[#allocation2 + $0xb0] sm:$0xff] }
 0x135   : > { %9947 = vst [vmem:[#allocation45_spill] sm:$0xff] %v7299_v47  ;;  %v1912_v41 = vsel %vm480_vm3, %v1910_v42, %v1911_v18  ;;  %v5025_v42 = vunpack.i.h.bf16 %v7141_v0  ;;  %v5024_v18 = vunpack.i.l.bf16 %v7141_v0  ;;  %v7367_v47 = vld [vmem:[#allocation2 + $0xd0] sm:$0x3]  ;;  %v1935_v15 = vrot.slane %v7350_v23, 1 }
 0x136   : > { %5322 = vrot.lane.b32.xlu1 %v5321_v63, %s6082_s25  ;;  %4869 = vmatmul.msk.bf16.vlgmr.msra.gmra.mxu0 %vm922_vm6, %v899_v12  ;;  %v1918_v12 = vrot.slane %v7326_v33, 1  ;;  %v1924_v9 = vsel %vm480_vm3, %v1921_v56, %v1923_v17  ;;  %v1928_v17 = vrot.slane %v7339_v36, 1  ;;  %v1917_v0 = vsel %vm480_vm3, %v1915_v55, %v1916_v11  ;;  %v7376_v55 = vld [vmem:[#allocation2 + $0x18] sm:$0xff] }
 0x137   : > { %9953 = vst [vmem:[#allocation28_spill] sm:$0xff] %v7376_v55 }
 0x138   : > { %v7323_v62 = vpop.permute.xlu1 %5112  ;;  %5332 = vrot.lane.b32.xlu0 %v5331_v19, %s6082_s25  ;;  %v1922_v19 = vsel %vm480_vm3, %v1920_v6, %v1921_v56  ;;  %v1925_v6 = vrot.slane %v7335_v31, 1  ;;  %v1926_v56 = vrot.slane %v7337_v45, 1 }
 0x139   : > { %v5356_v43 = vpack.i.bf16 %v1924_v9, %v1922_v19  ;;  %v9955_v9 = vld [vmem:[#allocation29_spill] sm:$0xff] }
 0x13a   : > { %v7330_v63 = vpop.permute.xlu0 %5122  ;;  %5342 = vrot.lane.b32.xlu2 %v5341_v50, %s6081_s20  ;;  %v5346_v50 = vpack.i.bf16 %v1914_v52, %v1912_v41  ;;  %v7362_v41 = vld [vmem:[#allocation2 + $0xc0] sm:$0xff]  ;;  %v1919_v52 = vsel %vm480_vm3, %v1916_v11, %v1918_v12  ;;  %v836_v11 = vsel %vm226_vm0, %v7376_v55, %v5024_v18  ;;  %v850_v57 = vsel %vm226_vm0, %v9955_v9, %v5059_v29  ;;  %v7396_v9 = vld [vmem:[#allocation2 + $0xf8] sm:$0xff] }
 0x13b   : > { %9948 = vst [vmem:[#allocation46_spill] sm:$0xff] %v7330_v63  ;;  %v7380_v12 = vld [vmem:[#allocation2 + $0x20] sm:$0xff]  ;;  %v7390_v63 = vld [vmem:[#allocation2 + $0xf0] sm:$0xff]  ;;  %v5351_v18 = vpack.i.bf16 %v1919_v52, %v1917_v0  ;;  %v1930_v55 = vrot.slane %v7362_v41, 1  ;;  %v1933_v29 = vrot.slane %v7367_v47, 1  ;;  %v5982_v52 = vld [vmem:[#allocation2 + $0xc8] sm:$0xff] }
 0x13c   : > { %v7348_v40 = vpop.permute.xlu2 %5177  ;;  %9954 = vst [vmem:[#allocation66_spill] sm:$0xff] %v7380_v12  ;;  %v837_v19 = vsel %vm226_vm0, %v7380_v12, %v5025_v42  ;;  %v1931_v42 = vrot.slane %v7365_v60, 1  ;;  %v1940_v12 = vrot.slane %v7390_v63, 1 }
 0x13d   : > { %9949 = vst [vmem:[#allocation51_spill] sm:$0xff] %v7348_v40  ;;  %v869_v40 = vsel %vm866_vm5, %v836_v11, %v5104_v10  ;;  %v870_v46 = vsel %vm866_vm5, %v837_v19, %v5105_v22  ;;  %v7398_v10 = vld [vmem:[#allocation2 + $0x100] sm:$0x3]  ;;  %v851_v19 = vsel %vm226_vm0, %v5982_v52, %v5060_v27  ;;  %v7422_v52 = vld [vmem:[#allocation2 + $0x110] sm:$0xff] }
 0x13e   : > { %5337 = vrot.lane.b32.xlu1 %v5336_v48, %s6081_s20  ;;  %9956 = vst [vmem:[#allocation61_spill] sm:$0xff] %v7390_v63  ;;  %v900_v11 = vpack.c.bf16 %v870_v46, %v869_v40  ;;  %v1932_v40 = vsel %vm480_vm3, %v1930_v55, %v1931_v42  ;;  %v7419_v46 = vld [vmem:[#allocation2 + $0x108] sm:$0xff] }
 0x13f   : > { %9957 = vst [vmem:[#allocation62_spill] sm:$0xff] %v7396_v9 }
 0x140   : > { %v7373_v48 = vpop.permute.xlu1 %5127  ;;  %5347 = vrot.lane.b32.xlu0 %v5346_v50, %s6081_s20  ;;  %v1929_v50 = vsel %vm480_vm3, %v1926_v56, %v1928_v17  ;;  %9958 = vst [vmem:[#allocation63_spill] sm:$0xff] %v7398_v10  ;;  %v1939_v17 = vsel %vm480_vm3, %v1936_v2, %v1938_v53  ;;  %v1943_v53 = vrot.slane %v7398_v10, 1  ;;  %v7458_v10 = vld [vmem:[#allocation2 + $0x170] sm:$0xff] }
 0x141   : > { %9952 = vst [vmem:[#allocation60_spill] sm:$0xff] %v7373_v48  ;;  %v1927_v48 = vsel %vm480_vm3, %v1925_v6, %v1926_v56  ;;  %v1937_v56 = vsel %vm480_vm3, %v1935_v15, %v1936_v2  ;;  %v1941_v2 = vrot.slane %v7396_v9, 1  ;;  %v7460_v9 = vld [vmem:[#allocation2 + $0x178] sm:$0x3] }
 0x142   : > { %v5138_v1 = vpop.permute.xlu0 %5137  ;;  %5357 = vrot.lane.b32.xlu2 %v5356_v43, %s6081_s20  ;;  %v5361_v43 = vpack.i.bf16 %v1929_v50, %v1927_v48  ;;  %v5371_v48 = vpack.i.bf16 %v1939_v17, %v1937_v56  ;;  %v1934_v50 = vsel %vm480_vm3, %v1931_v42, %v1933_v29  ;;  %9963 = vst [vmem:[#allocation22_spill] sm:$0xff] %v7422_v52  ;;  %v1945_v29 = vrot.slane %v7419_v46, 1 }
 0x143   : > { %v5140_v22 = vunpack.i.h.bf16 %v5138_v1  ;;  %v5139_v6 = vunpack.i.l.bf16 %v5138_v1  ;;  %v1942_v55 = vsel %vm480_vm3, %v1940_v12, %v1941_v2  ;;  %v1944_v42 = vsel %vm480_vm3, %v1941_v2, %v1943_v53  ;;  %9970 = vst [vmem:[#allocation68_spill] sm:$0xff] %v7458_v10 }
 0x144   : > { %v7402_v0 = vpop.permute.xlu2 %5192  ;;  %v5366_v17 = vpack.i.bf16 %v1934_v50, %v1932_v40  ;;  %v5030_v12 = vunpack.i.h.bf16 %v7136_v37  ;;  %v5029_v2 = vunpack.i.l.bf16 %v7136_v37  ;;  %v7451_v50 = vld [vmem:[#allocation2 + $0x168] sm:$0xff]  ;;  %9971 = vst [vmem:[#allocation69_spill] sm:$0xff] %v7460_v9  ;;  %v5109_v37 = vunpack.i.l.bf16 %v7283_v14 }
 0x145   : > { %9959 = vst [vmem:[#allocation25_spill] sm:$0xff] %v7402_v0  ;;  %v883_v1 = vsel %vm866_vm5, %v850_v57, %v5139_v6  ;;  %v884_v15 = vsel %vm866_vm5, %v851_v19, %v5140_v22  ;;  %v7424_v57 = vld [vmem:[#allocation2 + $0x118] sm:$0x3]  ;;  %v1950_v22 = vrot.slane %v7406_v35, 1  ;;  %v1951_v6 = vrot.slane %v7408_v39, 1 }
 0x146   : > { %5352 = vrot.lane.b32.xlu1 %v5351_v18, %s6081_s20  ;;  %4870 = vmatmul.msk.bf16.gmra.mxu0 %vm922_vm6, %v900_v11  ;;  %v907_v27 = vpack.c.bf16 %v884_v15, %v883_v1  ;;  %9964 = vst [vmem:[#allocation57_spill] sm:$0xff] %v7424_v57  ;;  %v1953_v18 = vrot.slane %v7410_v13, 1  ;;  %v1946_v11 = vrot.slane %v7422_v52, 1  ;;  %v1948_v1 = vrot.slane %v7424_v57, 1  ;;  %v7441_v15 = vld [vmem:[#allocation2 + $0x138] sm:$0xff] }
 0x147   : > { %9965 = vst [vmem:[#allocation48_spill] sm:$0xff] %v7441_v15  ;;  %v1952_v53 = vsel %vm480_vm3, %v1950_v22, %v1951_v6  ;;  %v5064_v0 = vunpack.i.l.bf16 %v7189_v24  ;;  %v5110_v13 = vunpack.i.h.bf16 %v7283_v14  ;;  %v5376_v35 = vpack.i.bf16 %v1944_v42, %v1942_v55  ;;  %v7472_v14 = vld [vmem:[#allocation2 + $0x150] sm:$0xff] }
 0x148   : > { %v7429_v19 = vpop.permute.xlu1 %5142  ;;  %5362 = vrot.lane.b32.xlu0 %v5361_v43, %s6081_s20  ;;  %4877 = vmatmul.msk.bf16.vlgmr.msra.gmra.mxu2 %vm922_vm6, %v907_v27  ;;  %v7443_v43 = vld [vmem:[#allocation2 + $0x140] sm:$0xff]  ;;  %v7445_v27 = vld [vmem:[#allocation2 + $0x148] sm:$0x3]  ;;  %v1954_v40 = vsel %vm480_vm3, %v1951_v6, %v1953_v18  ;;  %9968 = vst [vmem:[#allocation29_spill] sm:$0xff] %v7451_v50  ;;  %v1955_v22 = vrot.slane %v7441_v15, 1  ;;  %v1949_v63 = vsel %vm480_vm3, %v1946_v11, %v1948_v1  ;;  %v1965_v55 = vrot.slane %v7451_v50, 1 }
 0x149   : > { %9966 = vst [vmem:[#allocation49_spill] sm:$0xff] %v7443_v43  ;;  %v1956_v6 = vrot.slane %v7443_v43, 1  ;;  %v1958_v18 = vrot.slane %v7445_v27, 1  ;;  %v5145_v42 = vunpack.i.h.bf16 %v7429_v19  ;;  %v5144_v57 = vunpack.i.l.bf16 %v7429_v19  ;;  %v7474_v15 = vld [vmem:[#allocation2 + $0x158] sm:$0xff]  ;;  %v7476_v43 = vld [vmem:[#allocation2 + $0x160] sm:$0x3] }
 0x14a   : > { %v7436_v56 = vpop.permute.xlu0 %5152  ;;  %5372 = vrot.lane.b32.xlu2 %v5371_v48, %s6081_s20  ;;  %9967 = vst [vmem:[#allocation37_spill] sm:$0xff] %v7445_v27  ;;  %v5065_v48 = vunpack.i.h.bf16 %v7189_v24  ;;  %v1947_v24 = vsel %vm480_vm3, %v1945_v29, %v1946_v11  ;;  %v1966_v27 = vrot.slane %v7458_v10, 1  ;;  %v7483_v11 = vld [vmem:[#allocation2 + $0x30] sm:$0xff]  ;;  %v7487_v19 = vld [vmem:[#allocation2 + $0x38] sm:$0xff] }
 0x14b   : > { %9973 = vst [vmem:[#allocation71_spill] sm:$0xff] %v7483_v11  ;;  %v838_v1 = vsel %vm226_vm0, %v7483_v11, %v5029_v2  ;;  %v1957_v2 = vsel %vm480_vm3, %v1955_v22, %v1956_v6  ;;  %v1959_v11 = vsel %vm480_vm3, %v1956_v6, %v1958_v18 }
 0x14c   : > { %v7456_v39 = vpop.permute.xlu2 %5207  ;;  %9974 = vst [vmem:[#allocation72_spill] sm:$0xff] %v7487_v19  ;;  %v871_v50 = vsel %vm866_vm5, %v838_v1, %v5109_v37  ;;  %v1967_v22 = vsel %vm480_vm3, %v1965_v55, %v1966_v27  ;;  %v7524_v55 = vld [vmem:[#allocation2 + $0x1a0] sm:$0xff] }
 0x14d   : > { %9969 = vst [vmem:[#allocation67_spill] sm:$0xff] %v7456_v39  ;;  %v5386_v39 = vpack.i.bf16 %v1954_v40, %v1952_v53  ;;  %v839_v53 = vsel %vm226_vm0, %v7487_v19, %v5030_v12  ;;  %v7491_v40 = vld [vmem:[#allocation2 + $0xd8] sm:$0xff]  ;;  %v5381_v12 = vpack.i.bf16 %v1949_v63, %v1947_v24  ;;  %v1961_v19 = vrot.slane %v7474_v15, 1 }
 0x14e   : > { %5367 = vrot.lane.b32.xlu1 %v5366_v17, %s6081_s20  ;;  %v1968_v17 = vrot.slane %v7460_v9, 1  ;;  %9975 = vst [vmem:[#allocation73_spill] sm:$0xff] %v7491_v40  ;;  %v852_v10 = vsel %vm226_vm0, %v7491_v40, %v5064_v0  ;;  %v7495_v9 = vld [vmem:[#allocation2 + $0xe0] sm:$0xff]  ;;  %v1960_v0 = vrot.slane %v7472_v14, 1  ;;  %v1963_v40 = vrot.slane %v7476_v43, 1 }
 0x14f   : > { %v885_v37 = vsel %vm866_vm5, %v852_v10, %v5144_v57 }
 0x150   : > { %v7480_v29 = vpop.permute.xlu1 %5157  ;;  %5377 = vrot.lane.b32.xlu0 %v5376_v35, %s6081_s20  ;;  %v853_v35 = vsel %vm226_vm0, %v7495_v9, %v5065_v48  ;;  %v7509_v48 = vld [vmem:[#allocation2 + $0x190] sm:$0x3]  ;;  %v1969_v6 = vsel %vm480_vm3, %v1966_v27, %v1968_v17  ;;  %v1964_v57 = vsel %vm480_vm3, %v1961_v19, %v1963_v40  ;;  %v2076_v27 = vrot.slane %v7257_v59, 2 }
 0x151   : > { %9972 = vst [vmem:[#allocation70_spill] sm:$0xff] %v7480_v29  ;;  %v872_v29 = vsel %vm866_vm5, %v839_v53, %v5110_v13  ;;  %v886_v13 = vsel %vm866_vm5, %v853_v35, %v5145_v42  ;;  %v1973_v24 = vrot.slane %v7509_v48, 1  ;;  %v1962_v53 = vsel %vm480_vm3, %v1960_v0, %v1961_v19  ;;  %v7522_v42 = vld [vmem:[#allocation2 + $0x198] sm:$0xff] }
 0x152   : > { %v7503_v52 = vpop.permute.xlu0 %5167  ;;  %5387 = vrot.lane.b32.xlu2 %v5386_v39, %s6081_s20  ;;  %v901_v18 = vpack.c.bf16 %v872_v29, %v871_v50  ;;  %v5391_v39 = vpack.i.bf16 %v1959_v11, %v1957_v2  ;;  %v908_v1 = vpack.c.bf16 %v886_v13, %v885_v37  ;;  %v5401_v10 = vpack.i.bf16 %v1969_v6, %v1967_v22  ;;  %v7533_v11 = vld [vmem:[#allocation2 + $0x1a8] sm:$0x3] }
 0x153   : > { %v2077_v50 = vrot.slane %v7261_v16, 2  ;;  %v2079_v17 = vrot.slane %v7263_v4, 2  ;;  %v5035_v19 = vunpack.i.h.bf16 %v7162_v21  ;;  %v1974_v40 = vsel %vm480_vm3, %v7117_v7, %v1973_v24 }
 0x154   : > { %v7515_v63 = vpop.permute.xlu2 %5222  ;;  %v5069_v35 = vunpack.i.l.bf16 %v7205_v20  ;;  %v5396_v16 = vpack.i.bf16 %v1964_v57, %v1962_v53  ;;  %v1975_v4 = vrot.slane %v7522_v42, 1  ;;  %v1976_v2 = vrot.slane %v7524_v55, 1 }
 0x155   : > { %v1978_v0 = vrot.slane %v7533_v11, 1  ;;  %v2078_v37 = vsel %vm657_vm4, %v2076_v27, %v2077_v50  ;;  %v2080_v13 = vsel %vm657_vm4, %v2077_v50, %v2079_v17  ;;  %v5070_v7 = vunpack.i.h.bf16 %v7205_v20  ;;  %v7561_v27 = vld [vmem:[#allocation2 + $0xf0] sm:$0xff] }
 0x156   : > { %5382 = vrot.lane.b32.xlu1 %v5381_v12, %s6081_s20  ;;  %4871 = vmatmul.msk.bf16.gmra.mxu0 %vm922_vm6, %v901_v18  ;;  %v5034_v12 = vunpack.i.l.bf16 %v7162_v21  ;;  %v5149_v22 = vunpack.i.l.bf16 %v7240_v32  ;;  %v5115_v6 = vunpack.i.h.bf16 %v7323_v62  ;;  %v5114_v24 = vunpack.i.l.bf16 %v7323_v62 }
 0x157   : > { %v2081_v21 = vrot.slane %v7247_v44, 2  ;;  %v2084_v53 = vrot.slane %v7251_v8, 2  ;;  %v1977_v20 = vsel %vm480_vm3, %v1975_v4, %v1976_v2  ;;  %v5416_v57 = vpack.i.bf16 %v2080_v13, %v2078_v37 }
 0x158   : > { %v7529_v29 = vpop.permute.xlu1 %5172  ;;  %5392 = vrot.lane.b32.xlu0 %v5391_v39, %s6081_s20  ;;  %4878 = vmatmul.msk.bf16.gmra.mxu2 %vm922_vm6, %v908_v1  ;;  %v5406_v39 = vpack.i.bf16 %v1974_v40, %v7126_v51  ;;  %v2082_v1 = vrot.slane %v7249_v3, 2  ;;  %v854_v51 = vsel %vm226_vm0, %v7561_v27, %v5069_v35  ;;  %v1979_v62 = vsel %vm480_vm3, %v1976_v2, %v1978_v0  ;;  %v7576_v40 = vld [vmem:[#allocation2 + $0x50] sm:$0xff] }
 0x159   : > { %v2091_v44 = vrot.slane %v7316_v54, 2  ;;  %v2092_v3 = vrot.slane %v7318_v28, 2  ;;  %v2094_v8 = vrot.slane %v7326_v33, 2  ;;  %v841_v35 = vsel %vm226_vm0, %v7576_v40, %v5035_v19 }
 0x15a   : > { %v7539_v59 = vpop.permute.xlu0 %5182  ;;  %5402 = vrot.lane.b32.xlu2 %v5401_v10, %s6081_s20  ;;  %v5150_v10 = vunpack.i.h.bf16 %v7240_v32  ;;  %v7572_v32 = vld [vmem:[#allocation2 + $0x48] sm:$0xff]  ;;  %v887_v28 = vsel %vm866_vm5, %v854_v51, %v5149_v22  ;;  %v874_v4 = vsel %vm866_vm5, %v841_v35, %v5115_v6  ;;  %v2083_v2 = vsel %vm657_vm4, %v2081_v21, %v2082_v1 }
 0x15b   : > { %v840_v17 = vsel %vm226_vm0, %v7572_v32, %v5034_v12  ;;  %v2085_v12 = vsel %vm657_vm4, %v2082_v1, %v2084_v53  ;;  %v5411_v37 = vpack.i.bf16 %v1979_v62, %v1977_v20  ;;  %v2086_v13 = vrot.slane %v7289_v34, 2  ;;  %v4889_v22 = vld [vmem:[%s9697_s1 + $0x8] sm:$0xf]  ;;  %v4998_v6 = vld [vmem:[%s9697_s1 + $0x8] sm:$0x30] }
 0x15c   : > { %v7551_v18 = vpop.permute.xlu2 %5237  ;;  %v873_v33 = vsel %vm866_vm5, %v840_v17, %v5114_v24  ;;  %v2093_v24 = vsel %vm657_vm4, %v2091_v44, %v2092_v3  ;;  %v2095_v21 = vsel %vm657_vm4, %v2092_v3, %v2094_v8  ;;  %v4890_v1 = vor.u32 %v4998_v6, %v4889_v22 }
 0x15d   : > { %v5040_v53 = vunpack.i.h.bf16 %v7081_v61  ;;  %v902_v34 = vpack.c.bf16 %v874_v4, %v873_v33  ;;  %v2096_v20 = vrot.slane %v7302_v25, 2  ;;  %v2099_v51 = vrot.slane %v7306_v49, 2 }
 0x15e   : > { %5397 = vrot.lane.b32.xlu1 %v5396_v16, %s6081_s20  ;;  %v7580_v16 = vld [vmem:[#allocation2 + $0xf8] sm:$0xff]  ;;  %v1680_v62 = vsel %vm657_vm4, %v4890_v1, 0  ;;  %v5431_v8 = vpack.i.bf16 %v2095_v21, %v2093_v24  ;;  %v2106_v25 = vrot.slane %v7362_v41, 2  ;;  %v2109_v49 = vrot.slane %v7367_v47, 2  ;;  %v7630_v41 = vld [vmem:[#allocation2 + $0x60] sm:$0xff]  ;;  %v9977_v24 = vld [vmem:[#allocation58_spill] sm:$0xff] }
 0x15f   : > { %v855_v54 = vsel %vm226_vm0, %v7580_v16, %v5070_v7  ;;  %v2087_v7 = vrot.slane %v7291_v5, 2  ;;  %v5421_v5 = vpack.i.bf16 %v2085_v12, %v2083_v2  ;;  %5004 = vmatpush.bf16.msra.mxu3 %v1680_v62  ;;  %1689 = vmatpush.bf16.msra.mxu1 %v1680_v62  ;;  %v2102_v47 = vrot.slane %v7337_v45, 2  ;;  %v9978_v1 = vld [vmem:[#allocation56_spill] sm:$0xff] }
 0x160   : > { %v7569_v50 = vpop.permute.xlu1 %5187  ;;  %5407 = vrot.lane.b32.xlu0 %v5406_v39, %s6081_s20  ;;  %v888_v19 = vsel %vm866_vm5, %v855_v54, %v5150_v10  ;;  %v2089_v39 = vrot.slane %v7293_v58, 2  ;;  %v5039_v58 = vunpack.i.l.bf16 %v7081_v61  ;;  %v2104_v2 = vrot.slane %v7339_v36, 2 }
 0x161   : > { %v909_v44 = vpack.c.bf16 %v888_v19, %v887_v28  ;;  %v2088_v3 = vsel %vm657_vm4, %v2086_v13, %v2087_v7  ;;  %v7637_v19 = vld [vmem:[#allocation2 + $0x68] sm:$0xff]  ;;  %v5074_v45 = vunpack.i.l.bf16 %v7130_v26  ;;  %v5119_v36 = vunpack.i.l.bf16 %v7196_v38 }
 0x162   : > { %v7589_v0 = vpop.permute.xlu0 %5197  ;;  %5417 = vrot.lane.b32.xlu2 %v5416_v57, %s6082_s25  ;;  %v2097_v57 = vrot.slane %v7304_v30, 2  ;;  %v2090_v17 = vsel %vm657_vm4, %v2087_v7, %v2089_v39  ;;  %v2107_v30 = vrot.slane %v7365_v60, 2  ;;  %v2101_v60 = vrot.slane %v7335_v31, 2 }
 0x163   : > { %v5426_v33 = vpack.i.bf16 %v2090_v17, %v2088_v3  ;;  %v842_v4 = vsel %vm226_vm0, %v7630_v41, %v5039_v58  ;;  %v843_v13 = vsel %vm226_vm0, %v7637_v19, %v5040_v53  ;;  %v5075_v31 = vunpack.i.h.bf16 %v7130_v26 }
 0x164   : > { %v7605_v10 = vpop.permute.xlu2 %5252  ;;  %v2098_v61 = vsel %vm657_vm4, %v2096_v20, %v2097_v57  ;;  %v2100_v54 = vsel %vm657_vm4, %v2097_v57, %v2099_v51  ;;  %v2108_v12 = vsel %vm657_vm4, %v2106_v25, %v2107_v30  ;;  %v5120_v7 = vunpack.i.h.bf16 %v7196_v38  ;;  %v9979_v38 = vld [vmem:[#allocation22_spill] sm:$0xff] }
 0x165   : > { %v5436_v6 = vpack.i.bf16 %v2100_v54, %v2098_v61  ;;  %v2111_v39 = vrot.slane %v7350_v23, 2  ;;  %v2112_v21 = vrot.slane %v9977_v24, 2  ;;  %v5154_v53 = vunpack.i.l.bf16 %v7436_v56  ;;  %v9980_v23 = vld [vmem:[#allocation57_spill] sm:$0xff] }
 0x166   : > { %5412 = vrot.lane.b32.xlu1 %v5411_v37, %s6081_s20  ;;  %4872 = vmatmul.msk.bf16.gmra.mxu0 %vm922_vm6, %v902_v34  ;;  %v2110_v37 = vsel %vm657_vm4, %v2107_v30, %v2109_v49  ;;  %v2114_v34 = vrot.slane %v9978_v1, 2  ;;  %v2103_v26 = vsel %vm657_vm4, %v2101_v60, %v2102_v47  ;;  %v2105_v57 = vsel %vm657_vm4, %v2102_v47, %v2104_v2  ;;  %v7667_v30 = vld [vmem:[#allocation2 + $0x110] sm:$0xff]  ;;  %v7687_v1 = vld [vmem:[#allocation2 + $0x78] sm:$0xff] }
 0x167   : > { %v5446_v20 = vpack.i.bf16 %v2110_v37, %v2108_v12  ;;  %v2121_v51 = vrot.slane %v7419_v46, 2  ;;  %v2122_v62 = vrot.slane %v9979_v38, 2  ;;  %v2124_v58 = vrot.slane %v9980_v23, 2  ;;  %v9982_v12 = vld [vmem:[#allocation61_spill] sm:$0xff]  ;;  %v9987_v38 = vld [vmem:[#allocation50_spill] sm:$0xff] }
 0x168   : > { %v7619_v35 = vpop.permute.xlu1 %5202  ;;  %5422 = vrot.lane.b32.xlu0 %v5421_v5, %s6082_s25  ;;  %4879 = vmatmul.msk.bf16.gmra.mxu2 %vm922_vm6, %v909_v44  ;;  %v5155_v5 = vunpack.i.h.bf16 %v7436_v56  ;;  %v9981_v44 = vld [vmem:[#allocation52_spill] sm:$0xff]  ;;  %v7663_v56 = vld [vmem:[#allocation2 + $0x108] sm:$0xff]  ;;  %v857_v46 = vsel %vm226_vm0, %v7667_v30, %v5075_v31  ;;  %v875_v49 = vsel %vm866_vm5, %v842_v4, %v5119_v36  ;;  %v876_v61 = vsel %vm866_vm5, %v843_v13, %v5120_v7  ;;  %v9984_v4 = vld [vmem:[#allocation63_spill] sm:$0xff] }
 0x169   : > { %v5045_v3 = vunpack.i.h.bf16 %v9981_v44  ;;  %v856_v25 = vsel %vm226_vm0, %v7663_v56, %v5074_v45  ;;  %v2113_v54 = vsel %vm657_vm4, %v2111_v39, %v2112_v21  ;;  %v5441_v47 = vpack.i.bf16 %v2105_v57, %v2103_v26  ;;  %v9983_v45 = vld [vmem:[#allocation62_spill] sm:$0xff]  ;;  %v9985_v26 = vld [vmem:[#allocation36_spill] sm:$0xff]  ;;  %v9988_v23 = vld [vmem:[#allocation65_spill] sm:$0xff] }
 0x16a   : > { %v7625_v28 = vpop.permute.xlu0 %5212  ;;  %5432 = vrot.lane.b32.xlu2 %v5431_v8, %s6082_s25  ;;  %v5044_v8 = vunpack.i.l.bf16 %v9981_v44  ;;  %v889_v2 = vsel %vm866_vm5, %v856_v25, %v5154_v53  ;;  %v2116_v37 = vrot.slane %v9982_v12, 2  ;;  %v890_v31 = vsel %vm866_vm5, %v857_v46, %v5155_v5  ;;  %v7693_v53 = vld [vmem:[#allocation2 + $0x80] sm:$0xff]  ;;  %v9990_v12 = vld [vmem:[#allocation49_spill] sm:$0xff] }
 0x16b   : > { %9976 = vst [vmem:[#allocation74_spill] sm:$0xff] %v7625_v28  ;;  %v2119_v36 = vrot.slane %v9984_v4, 2  ;;  %v2123_v13 = vsel %vm657_vm4, %v2121_v51, %v2122_v62  ;;  %v2125_v7 = vsel %vm657_vm4, %v2122_v62, %v2124_v58  ;;  %v903_v39 = vpack.c.bf16 %v876_v61, %v875_v49  ;;  %v9986_v57 = vld [vmem:[#allocation64_spill] sm:$0xff] }
 0x16c   : > { %v7644_v22 = vpop.permute.xlu2 %5267  ;;  %v7697_v5 = vsel %vm226_vm0, %v7693_v53, %v5045_v3  ;;  %v2126_v51 = vrot.slane %v9986_v57, 2  ;;  %v2127_v62 = vrot.slane %v9987_v38, 2  ;;  %v2129_v58 = vrot.slane %v9988_v23, 2  ;;  %v7721_v4 = vld [vmem:[#allocation2 + $0x120] sm:$0xff]  ;;  %v9993_v57 = vld [vmem:[#allocation70_spill] sm:$0xff] }
 0x16d   : > { %v910_v44 = vpack.c.bf16 %v890_v31, %v889_v2  ;;  %v5461_v25 = vpack.i.bf16 %v2125_v7, %v2123_v13  ;;  %v2136_v3 = vrot.slane %v7472_v14, 2  ;;  %v2137_v49 = vrot.slane %v7474_v15, 2  ;;  %v9992_v31 = vld [vmem:[#allocation46_spill] sm:$0xff] }
 0x16e   : > { %5427 = vrot.lane.b32.xlu1 %v5426_v33, %s6082_s25  ;;  %v2115_v33 = vsel %vm657_vm4, %v2112_v21, %v2114_v34  ;;  %v7691_v34 = vsel %vm226_vm0, %v7687_v1, %v5044_v8  ;;  %v2139_v61 = vrot.slane %v7476_v43, 2  ;;  %v5125_v14 = vunpack.i.h.bf16 %v9992_v31 }
 0x16f   : > { %v5451_v21 = vpack.i.bf16 %v2115_v33, %v2113_v54  ;;  %v5080_v54 = vunpack.i.h.bf16 %v9985_v26  ;;  %v2128_v15 = vsel %vm657_vm4, %v2126_v51, %v2127_v62  ;;  %v2130_v43 = vsel %vm657_vm4, %v2127_v62, %v2129_v58 }
 0x170   : > { %v7660_v17 = vpop.permute.xlu1 %5217  ;;  %5437 = vrot.lane.b32.xlu0 %v5436_v6, %s6082_s25  ;;  %v2117_v6 = vrot.slane %v9983_v45, 2  ;;  %v9991_v45 = vld [vmem:[#allocation37_spill] sm:$0xff]  ;;  %v5124_v13 = vunpack.i.l.bf16 %v9992_v31  ;;  %v5160_v51 = vunpack.i.h.bf16 %v9993_v57  ;;  %v5159_v38 = vunpack.i.l.bf16 %v9993_v57 }
 0x171   : > { %v5220_v7 = vunpack.i.h.bf16 %v7660_v17  ;;  %v2138_v62 = vsel %vm657_vm4, %v2136_v3, %v2137_v49  ;;  %v2140_v23 = vsel %vm657_vm4, %v2137_v49, %v2139_v61  ;;  %v5466_v58 = vpack.i.bf16 %v2130_v43, %v2128_v15  ;;  %v9996_v31 = vld [vmem:[#allocation69_spill] sm:$0xff] }
 0x172   : > { %v7675_v60 = vpop.permute.xlu0 %5227  ;;  %5447 = vrot.lane.b32.xlu2 %v5446_v20, %s6082_s25  ;;  %v5079_v20 = vunpack.i.l.bf16 %v9985_v26  ;;  %v2118_v8 = vsel %vm657_vm4, %v2116_v37, %v2117_v6  ;;  %v2120_v46 = vsel %vm657_vm4, %v2117_v6, %v2119_v36  ;;  %v2132_v37 = vrot.slane %v9990_v12, 2  ;;  %v9997_v3 = vld [vmem:[#allocation73_spill] sm:$0xff] }
 0x173   : > { %v2134_v6 = vrot.slane %v9991_v45, 2  ;;  %v5456_v26 = vpack.i.bf16 %v2120_v46, %v2118_v8  ;;  %v9995_v46 = vld [vmem:[#allocation68_spill] sm:$0xff]  ;;  %v2144_v28 = vrot.slane %v9996_v31, 2  ;;  %v5476_v57 = vpack.i.bf16 %v2140_v23, %v2138_v62  ;;  %v7753_v23 = vld [vmem:[#allocation2 + $0x128] sm:$0xff]  ;;  %v10000_v31 = vld [vmem:[#allocation66_spill] sm:$0xff] }
 0x174   : > { %v7685_v24 = vpop.permute.xlu2 %5282  ;;  %v858_v36 = vsel %vm226_vm0, %v7721_v4, %v5079_v20  ;;  %v1560_v61 = vsel %vm226_vm0, %v7495_v9, %v5220_v7  ;;  %v2152_v15 = vrot.slane %v7524_v55, 2  ;;  %v2154_v43 = vrot.slane %v7533_v11, 2 }
 0x175   : > { %v859_v9 = vsel %vm226_vm0, %v7753_v23, %v5080_v54  ;;  %v878_v55 = vsel %vm866_vm5, %v7697_v5, %v5125_v14 }
 0x176   : > { %5442 = vrot.lane.b32.xlu1 %v5441_v47, %s6082_s25  ;;  %4873 = vmatmul.msk.bf16.gmra.mxu0 %vm922_vm6, %v903_v39  ;;  %v9989_v47 = vld [vmem:[#allocation48_spill] sm:$0xff]  ;;  %v5219_v39 = vunpack.i.l.bf16 %v7660_v17  ;;  %v9994_v17 = vld [vmem:[#allocation29_spill] sm:$0xff]  ;;  %v892_v54 = vsel %vm866_vm5, %v859_v9, %v5160_v51  ;;  %v2155_v14 = vsel %vm657_vm4, %v2152_v15, %v2154_v43 }
 0x177   : > { %v2131_v2 = vrot.slane %v9989_v47, 2  ;;  %v2135_v47 = vsel %vm657_vm4, %v2132_v37, %v2134_v6  ;;  %v2141_v12 = vrot.slane %v9994_v17, 2  ;;  %v10004_v9 = vld [vmem:[#allocation41_spill] sm:$0xff] }
 0x178   : > { %v7711_v33 = vpop.permute.xlu1 %5232  ;;  %5452 = vrot.lane.b32.xlu0 %v5451_v21, %s6082_s25  ;;  %4880 = vmatmul.msk.bf16.gmra.mxu2 %vm922_vm6, %v910_v44  ;;  %v1559_v49 = vsel %vm226_vm0, %v9997_v3, %v5219_v39 }
 0x179   : > { %v2133_v44 = vsel %vm657_vm4, %v2131_v2, %v2132_v37  ;;  %v2151_v2 = vrot.slane %v7522_v42, 2  ;;  %v877_v42 = vsel %vm866_vm5, %v7691_v34, %v5124_v13 }
 0x17a   : > { %v7728_v21 = vpop.permute.xlu0 %5242  ;;  %5462 = vrot.lane.b32.xlu2 %v5461_v25, %s6082_s25  ;;  %v2142_v25 = vrot.slane %v9995_v46, 2  ;;  %v2149_v46 = vrot.slane %v7509_v48, 2 }
 0x17b   : > { %v2153_v5 = vsel %vm657_vm4, %v2151_v2, %v2152_v15  ;;  %v10002_v2 = vld [vmem:[#allocation55_spill] sm:$0xff] }
 0x17c   : > { %v5298_v20 = vpop.permute.xlu2 %5297  ;;  %v2143_v11 = vsel %vm657_vm4, %v2141_v12, %v2142_v25  ;;  %v2145_v7 = vsel %vm657_vm4, %v2142_v25, %v2144_v28  ;;  %v904_v12 = vpack.c.bf16 %v878_v55, %v877_v42  ;;  %v5491_v3 = vpack.i.bf16 %v2155_v14, %v2153_v5  ;;  %v7801_v14 = vld [vmem:[#allocation2 + $0x170] sm:$0xff] }
 0x17d   : > { %v5300_v45 = vunpack.i.h.bf16 %v5298_v20  ;;  %v5299_v8 = vunpack.i.l.bf16 %v5298_v20  ;;  %v9998_v20 = vld [vmem:[#allocation51_spill] sm:$0xff]  ;;  %v5085_v42 = vunpack.i.h.bf16 %v10004_v9  ;;  %v5084_v55 = vunpack.i.l.bf16 %v10004_v9 }
 0x17e   : > { %5457 = vrot.lane.b32.xlu1 %v5456_v26, %s6082_s25  ;;  %v5180_v17 = vunpack.i.h.bf16 %v9998_v20  ;;  %v5179_v26 = vunpack.i.l.bf16 %v9998_v20  ;;  %v10007_v9 = vld [vmem:[#allocation71_spill] sm:$0xff] }
 0x17f   : > { %v1591_v37 = vsel %vm866_vm5, %v1559_v49, %v5299_v8  ;;  %v1592_v6 = vsel %vm866_vm5, %v1560_v61, %v5300_v45  ;;  %v5471_v8 = vpack.i.bf16 %v2135_v47, %v2133_v44  ;;  %v5481_v44 = vpack.i.bf16 %v2145_v7, %v2143_v11  ;;  %v9999_v47 = vld [vmem:[#allocation28_spill] sm:$0xff]  ;;  %v7793_v7 = vld [vmem:[#allocation2 + $0x90] sm:$0xff] }
 0x180   : > { %v5248_v62 = vpop.permute.xlu1 %5247  ;;  %5467 = vrot.lane.b32.xlu0 %v5466_v58, %s6082_s25  ;;  %v1615_v39 = vpack.c.bf16 %v1592_v6, %v1591_v37  ;;  %v891_v58 = vsel %vm866_vm5, %v858_v36, %v5159_v38  ;;  %v1543_v25 = vsel %vm226_vm0, %v9999_v47, %v5179_v26  ;;  %v1544_v36 = vsel %vm226_vm0, %v10000_v31, %v5180_v17  ;;  %v10001_v49 = vld [vmem:[#allocation44_spill] sm:$0xff]  ;;  %v10003_v17 = vld [vmem:[#allocation53_spill] sm:$0xff] }
 0x181   : > { %v911_v38 = vpack.c.bf16 %v892_v54, %v891_v58  ;;  %v2150_v61 = vsel %vm657_vm4, %v10001_v49, %v2149_v46  ;;  %v5049_v37 = vunpack.i.l.bf16 %v10002_v2  ;;  %v5250_v15 = vunpack.i.h.bf16 %v5248_v62 }
 0x182   : > { %v5258_v45 = vpop.permute.xlu0 %5257  ;;  %5477 = vrot.lane.b32.xlu2 %v5476_v57, %s6082_s25  ;;  %4899 = vmatmul.msk.bf16.vlgmr.msra.gmra.mxu3 %vm922_vm6, %v1615_v39  ;;  %v5249_v43 = vunpack.i.l.bf16 %v5248_v62  ;;  %v5486_v26 = vpack.i.bf16 %v2150_v61, %v10003_v17  ;;  %v5050_v39 = vunpack.i.h.bf16 %v10002_v2  ;;  %v5184_v31 = vunpack.i.l.bf16 %v7539_v59 }
 0x183   : > { %v5260_v34 = vunpack.i.h.bf16 %v5258_v45  ;;  %v5259_v13 = vunpack.i.l.bf16 %v5258_v45  ;;  %v846_v45 = vsel %vm226_vm0, %v7793_v7, %v5049_v37 }
 0x184   : > { %v7770_v28 = vpop.permute.xlu2 %5312 }
 0x185   : > { %v1575_v51 = vsel %vm866_vm5, %v1543_v25, %v5259_v13  ;;  %v1576_v48 = vsel %vm866_vm5, %v1544_v36, %v5260_v34  ;;  %v10006_v34 = vld [vmem:[#allocation45_spill] sm:$0xff]  ;;  %v5185_v25 = vunpack.i.h.bf16 %v7539_v59 }
 0x186   : > { %5472 = vrot.lane.b32.xlu1 %v5471_v8, %s6082_s25  ;;  %4874 = vmatmul.msk.bf16.gmra.mxu0 %vm922_vm6, %v904_v12  ;;  %v1607_v57 = vpack.c.bf16 %v1576_v48, %v1575_v51  ;;  %v10005_v8 = vld [vmem:[#allocation60_spill] sm:$0xff]  ;;  %v5165_v13 = vunpack.i.h.bf16 %v10006_v34  ;;  %v5164_v5 = vunpack.i.l.bf16 %v10006_v34  ;;  %v1572_v12 = vsel %vm226_vm0, %v7801_v14, %v5250_v15  ;;  %v7830_v15 = vld [vmem:[#allocation2 + $0x138] sm:$0xff] }
 0x187   : > { %v5130_v62 = vunpack.i.h.bf16 %v10005_v8  ;;  %v5129_v58 = vunpack.i.l.bf16 %v10005_v8  ;;  %v5225_v34 = vunpack.i.h.bf16 %v7515_v63 }
 0x188   : > { %v5263_v6 = vpop.permute.xlu1 %5262  ;;  %5482 = vrot.lane.b32.xlu0 %v5481_v44, %s6082_s25  ;;  %4881 = vmatmul.msk.bf16.gmra.mxu2 %vm922_vm6, %v911_v38  ;;  %v7805_v44 = vld [vmem:[#allocation2 + $0x168] sm:$0xff] }
 0x189   : > { %4891 = vmatmul.msk.bf16.vlgmr.msra.gmra.mxu1 %vm922_vm6, %v1607_v57  ;;  %v1571_v47 = vsel %vm226_vm0, %v7805_v44, %v5249_v43  ;;  %v5265_v48 = vunpack.i.h.bf16 %v5263_v6  ;;  %v5264_v38 = vunpack.i.l.bf16 %v5263_v6  ;;  %v879_v59 = vsel %vm866_vm5, %v846_v45, %v5129_v58  ;;  %v7834_v43 = vld [vmem:[#allocation2 + $0x140] sm:$0xff] }
 0x18a   : > { %v7786_v20 = vpop.permute.xlu0 %5272  ;;  %5492 = vrot.lane.b32.xlu2 %v5491_v3, %s6082_s25  ;;  %v7820_v3 = vld [vmem:[#allocation2 + $0x98] sm:$0xff]  ;;  %v860_v6 = vsel %vm226_vm0, %v7830_v15, %v5084_v55  ;;  %v861_v17 = vsel %vm226_vm0, %v7834_v43, %v5085_v42  ;;  %v10008_v45 = vld [vmem:[#allocation72_spill] sm:$0xff] }
 0x18b   : > { %v847_v49 = vsel %vm226_vm0, %v7820_v3, %v5050_v39  ;;  %v894_v39 = vsel %vm866_vm5, %v861_v17, %v5165_v13  ;;  %v1546_v8 = vsel %vm226_vm0, %v10008_v45, %v5185_v25  ;;  %v5224_v13 = vunpack.i.l.bf16 %v7515_v63 }
 0x18c   : > { %v5328_v11 = vpop.permute.xlu2 %5327  ;;  %v880_v2 = vsel %vm866_vm5, %v847_v49, %v5130_v62  ;;  %v1562_v63 = vsel %vm226_vm0, %v7580_v16, %v5225_v34  ;;  %v5189_v16 = vunpack.i.l.bf16 %v7569_v50  ;;  %v7876_v34 = vld [vmem:[#allocation2 + $0xa8] sm:$0xff] }
 0x18d   : > { %v5330_v54 = vunpack.i.h.bf16 %v5328_v11  ;;  %v5329_v46 = vunpack.i.l.bf16 %v5328_v11  ;;  %v1545_v11 = vsel %vm226_vm0, %v10007_v9, %v5184_v31  ;;  %v905_v62 = vpack.c.bf16 %v880_v2, %v879_v59  ;;  %v10009_v31 = vld [vmem:[#allocation33_spill] sm:$0xff]  ;;  %v10010_v2 = vld [vmem:[#allocation59_spill] sm:$0xff]  ;;  %v10011_v9 = vld [vmem:[#allocation54_spill] sm:$0xff] }
 0x18e   : > { %5487 = vrot.lane.b32.xlu1 %v5486_v26, %s6082_s25  ;;  %v893_v26 = vsel %vm866_vm5, %v860_v6, %v5164_v5  ;;  %v1577_v55 = vsel %vm866_vm5, %v1545_v11, %v5264_v38  ;;  %v5055_v38 = vunpack.i.h.bf16 %v10009_v31  ;;  %v1561_v59 = vsel %vm226_vm0, %v7561_v27, %v5224_v13 }
 0x18f   : > { %v7813_v36 = vsel %vm866_vm5, %v1571_v47, %v5329_v46  ;;  %v7816_v51 = vsel %vm866_vm5, %v1572_v12, %v5330_v54  ;;  %v1578_v54 = vsel %vm866_vm5, %v1546_v8, %v5265_v48  ;;  %v912_v42 = vpack.c.bf16 %v894_v39, %v893_v26 }
 0x190   : > { %v7818_v57 = vpop.permute.xlu1 %5277  ;;  %v1621_v61 = vpack.c.bf16 %v7816_v51, %v7813_v36  ;;  %v1608_v46 = vpack.c.bf16 %v1578_v54, %v1577_v55  ;;  %v5054_v48 = vunpack.i.l.bf16 %v10009_v31  ;;  %v5135_v6 = vunpack.i.h.bf16 %v10010_v2 }
 0x191   : > { %v5134_v17 = vunpack.i.l.bf16 %v10010_v2  ;;  %v5090_v11 = vunpack.i.h.bf16 %v10011_v9  ;;  %v5089_v45 = vunpack.i.l.bf16 %v10011_v9  ;;  %v5169_v27 = vunpack.i.l.bf16 %v7503_v52 }
 0x192   : > { %v7828_v37 = vpop.permute.xlu0 %5287  ;;  %v5190_v55 = vunpack.i.h.bf16 %v7569_v50  ;;  %v5270_v54 = vunpack.i.h.bf16 %v7644_v22  ;;  %v848_v13 = vsel %vm226_vm0, %v7876_v34, %v5054_v48  ;;  %v1547_v2 = vsel %vm226_vm0, %v7572_v32, %v5189_v16 }
 0x193   : > { %v5255_v16 = vunpack.i.h.bf16 %v7605_v10 }
 0x194   : > { %v7844_v58 = vpop.permute.xlu2 %5342 }
 0x196   : > { %4875 = vmatmul.msk.bf16.gmra.mxu0 %vm922_vm6, %v905_v62  ;;  %v5170_v62 = vunpack.i.h.bf16 %v7503_v52 }
 0x198   : > { %v7851_v5 = vpop.permute.xlu1 %5292  ;;  %4882 = vmatmul.msk.bf16.gmra.mxu2 %vm922_vm6, %v912_v42  ;;  %v5269_v42 = vunpack.i.l.bf16 %v7644_v22  ;;  %v7888_v22 = vld [vmem:[#allocation2 + $0x150] sm:$0xff] }
 0x199   : > { %4892 = vmatmul.msk.bf16.gmra.mxu1 %vm922_vm6, %v1608_v46  ;;  %v862_v31 = vsel %vm226_vm0, %v7888_v22, %v5089_v45  ;;  %v5230_v45 = vunpack.i.h.bf16 %v7675_v60 }
 0x19a   : > { %v5303_v12 = vpop.permute.xlu0 %5302 }
 0x19b   : > { %v5305_v47 = vunpack.i.h.bf16 %v5303_v12  ;;  %v5304_v25 = vunpack.i.l.bf16 %v5303_v12  ;;  %v7880_v12 = vld [vmem:[#allocation2 + $0xb0] sm:$0xff] }
 0x19c   : > { %v7857_v49 = vpop.permute.xlu2 %5357  ;;  %v849_v52 = vsel %vm226_vm0, %v7880_v12, %v5055_v38 }
 0x19d   : > { %v1593_v26 = vsel %vm866_vm5, %v1561_v59, %v5304_v25  ;;  %v1594_v39 = vsel %vm866_vm5, %v1562_v63, %v5305_v47  ;;  %v881_v47 = vsel %vm866_vm5, %v848_v13, %v5134_v17  ;;  %v882_v50 = vsel %vm866_vm5, %v849_v52, %v5135_v6  ;;  %v7892_v59 = vld [vmem:[#allocation2 + $0x158] sm:$0xff] }
 0x19e   : > { %v1616_v8 = vpack.c.bf16 %v1594_v39, %v1593_v26  ;;  %v863_v48 = vsel %vm226_vm0, %v7892_v59, %v5090_v11  ;;  %v895_v63 = vsel %vm866_vm5, %v862_v31, %v5169_v27  ;;  %v1548_v6 = vsel %vm226_vm0, %v7576_v40, %v5190_v55  ;;  %v6010_v31 = vld [vmem:[#allocation2 + $0x180] sm:$0xff] }
 0x19f   : > { %v896_v38 = vsel %vm866_vm5, %v863_v48, %v5170_v62  ;;  %v906_v17 = vpack.c.bf16 %v882_v50, %v881_v47  ;;  %v1579_v39 = vsel %vm866_vm5, %v1547_v2, %v5269_v42  ;;  %v1580_v9 = vsel %vm866_vm5, %v1548_v6, %v5270_v54 }
 0x1a0   : > { %v5308_v46 = vpop.permute.xlu1 %5307  ;;  %4900 = vmatmul.msk.bf16.gmra.mxu3 %vm922_vm6, %v1616_v8  ;;  %v5229_v11 = vunpack.i.l.bf16 %v7675_v60  ;;  %v913_v8 = vpack.c.bf16 %v896_v38, %v895_v63  ;;  %v1609_v32 = vpack.c.bf16 %v1580_v9, %v1579_v39  ;;  %v5254_v40 = vunpack.i.l.bf16 %v7605_v10  ;;  %v6009_v10 = vld [vmem:[#allocation2 + $0x188] sm:$0xff] }
 0x1a1   : > { %v5310_v62 = vunpack.i.h.bf16 %v5308_v46  ;;  %v5309_v27 = vunpack.i.l.bf16 %v5308_v46  ;;  %v1564_v42 = vsel %vm226_vm0, %v7667_v30, %v5230_v45  ;;  %v1574_v50 = vsel %vm226_vm0, %v6009_v10, %v5255_v16  ;;  %v10012_v30 = vld [vmem:[#allocation47_spill] sm:$0xff]  ;;  %v10013_v9 = vld [vmem:[#allocation25_spill] sm:$0xff] }
 0x1a2   : > { %v7886_v25 = vpop.permute.xlu0 %5317  ;;  %v1563_v60 = vsel %vm226_vm0, %v7663_v56, %v5229_v11  ;;  %v1573_v48 = vsel %vm226_vm0, %v6010_v31, %v5254_v40  ;;  %v5095_v2 = vunpack.i.h.bf16 %v10012_v30  ;;  %v5094_v6 = vunpack.i.l.bf16 %v10012_v30 }
 0x1a3   : > { %v1595_v52 = vsel %vm866_vm5, %v1563_v60, %v5309_v27  ;;  %v1596_v47 = vsel %vm866_vm5, %v1564_v42, %v5310_v62  ;;  %v5195_v45 = vunpack.i.h.bf16 %v10013_v9  ;;  %v5194_v11 = vunpack.i.l.bf16 %v10013_v9 }
 0x1a4   : > { %v7902_v26 = vpop.permute.xlu2 %5372  ;;  %v5174_v62 = vunpack.i.l.bf16 %v7529_v29  ;;  %v5275_v27 = vunpack.i.h.bf16 %v7786_v20  ;;  %v865_v60 = vsel %vm226_vm0, %v7801_v14, %v5095_v2  ;;  %v5234_v14 = vunpack.i.l.bf16 %v7711_v33 }
 0x1a5   : > { %v5314_v31 = vunpack.i.l.bf16 %v7770_v28 }
 0x1a6   : > { %4876 = vmatmul.msk.bf16.gmra.mxu0 %vm922_vm6, %v906_v17  ;;  %v1617_v17 = vpack.c.bf16 %v1596_v47, %v1595_v52  ;;  %v1565_v30 = vsel %vm226_vm0, %v7721_v4, %v5234_v14  ;;  %v5279_v4 = vunpack.i.l.bf16 %v7818_v57  ;;  %v5239_v14 = vunpack.i.l.bf16 %v7551_v18 }
 0x1a7   : > { %v1597_v2 = vsel %vm866_vm5, %v1565_v30, %v5314_v31  ;;  %v5319_v31 = vunpack.i.l.bf16 %v7886_v25 }
 0x1a8   : > { %v7911_v55 = vpop.permute.xlu1 %5322  ;;  %4883 = vmatmul.msk.bf16.gmra.mxu2 %vm922_vm6, %v913_v8  ;;  %v5175_v8 = vunpack.i.h.bf16 %v7529_v29  ;;  %v1549_v29 = vsel %vm226_vm0, %v7630_v41, %v5194_v11  ;;  %v5200_v11 = vunpack.i.h.bf16 %v7589_v0 }
 0x1a9   : > { %4893 = vmatmul.msk.bf16.gmra.mxu1 %vm922_vm6, %v1609_v32  ;;  %v5274_v32 = vunpack.i.l.bf16 %v7786_v20  ;;  %v1550_v20 = vsel %vm226_vm0, %v7637_v19, %v5195_v45 }
 0x1aa   : > { %v5333_v54 = vpop.permute.xlu0 %5332  ;;  %v1582_v47 = vsel %vm866_vm5, %v1550_v20, %v5275_v27 }
 0x1ab   : > { %v5335_v13 = vunpack.i.h.bf16 %v5333_v54  ;;  %v5334_v46 = vunpack.i.l.bf16 %v5333_v54  ;;  %v864_v54 = vsel %vm226_vm0, %v7805_v44, %v5094_v6  ;;  %v1581_v52 = vsel %vm866_vm5, %v1549_v29, %v5274_v32 }
 0x1ac   : > { %v7923_v63 = vpop.permute.xlu2 %5387  ;;  %v897_v42 = vsel %vm866_vm5, %v864_v54, %v5174_v62  ;;  %v5235_v44 = vunpack.i.h.bf16 %v7711_v33  ;;  %v5280_v32 = vunpack.i.h.bf16 %v7818_v57  ;;  %v1552_v57 = vsel %vm226_vm0, %v7693_v53, %v5200_v11 }
 0x1ad   : > { %v7926_v38 = vsel %vm866_vm5, %v1573_v48, %v5334_v46  ;;  %v7929_v56 = vsel %vm866_vm5, %v1574_v50, %v5335_v13  ;;  %v898_v13 = vsel %vm866_vm5, %v865_v60, %v5175_v8  ;;  %v5315_v50 = vunpack.i.h.bf16 %v7770_v28 }
 0x1ae   : > { %v1622_v39 = vpack.c.bf16 %v7929_v56, %v7926_v38  ;;  %v914_v10 = vpack.c.bf16 %v898_v13, %v897_v42  ;;  %v1610_v48 = vpack.c.bf16 %v1582_v47, %v1581_v52  ;;  %v1566_v33 = vsel %vm226_vm0, %v7753_v23, %v5235_v44  ;;  %v6011_v23 = vld [vmem:[#allocation2 + $0x38] sm:$0xff]  ;;  %v6012_v42 = vld [vmem:[#allocation2 + $0x30] sm:$0xff] }
 0x1af   : > { %v1598_v6 = vsel %vm866_vm5, %v1566_v33, %v5315_v50  ;;  %v5199_v8 = vunpack.i.l.bf16 %v7589_v0  ;;  %v1584_v47 = vsel %vm866_vm5, %v1552_v57, %v5280_v32  ;;  %v5240_v44 = vunpack.i.h.bf16 %v7551_v18 }
 0x1b0   : > { %v5338_v16 = vpop.permute.xlu1 %5337  ;;  %4901 = vmatmul.msk.bf16.gmra.mxu3 %vm922_vm6, %v1617_v17  ;;  %v1618_v45 = vpack.c.bf16 %v1598_v6, %v1597_v2  ;;  %v5320_v50 = vunpack.i.h.bf16 %v7886_v25  ;;  %v1567_v53 = vsel %vm226_vm0, %v7830_v15, %v5239_v14  ;;  %v5244_v32 = vunpack.i.l.bf16 %v7728_v21 }
 0x1b1   : > { %v5340_v17 = vunpack.i.h.bf16 %v5338_v16  ;;  %v5339_v9 = vunpack.i.l.bf16 %v5338_v16  ;;  %v1551_v20 = vsel %vm226_vm0, %v7687_v1, %v5199_v8  ;;  %v1568_v18 = vsel %vm226_vm0, %v7834_v43, %v5240_v44  ;;  %v6014_v44 = vld [vmem:[#allocation2 + $0x48] sm:$0xff] }
 0x1b2   : > { %v7942_v40 = vpop.permute.xlu0 %5347  ;;  %v1583_v52 = vsel %vm866_vm5, %v1551_v20, %v5279_v4  ;;  %v1599_v2 = vsel %vm866_vm5, %v1567_v53, %v5319_v31  ;;  %v1600_v25 = vsel %vm866_vm5, %v1568_v18, %v5320_v50  ;;  %v5325_v4 = vunpack.i.h.bf16 %v7911_v55  ;;  %v10014_v31 = vld [vmem:[#allocation67_spill] sm:$0xff] }
 0x1b3   : > { %v2253_v60 = vsel %vm226_vm0, %v6011_v23, %v5340_v17  ;;  %v2252_v16 = vsel %vm226_vm0, %v6012_v42, %v5339_v9  ;;  %v1619_v6 = vpack.c.bf16 %v1600_v25, %v1599_v2  ;;  %v5204_v17 = vunpack.i.l.bf16 %v7619_v35 }
 0x1b4   : > { %v7954_v46 = vpop.permute.xlu2 %5402  ;;  %v5285_v9 = vunpack.i.h.bf16 %v7685_v24  ;;  %v5324_v23 = vunpack.i.l.bf16 %v7911_v55  ;;  %v5345_v42 = vunpack.i.h.bf16 %v7844_v58  ;;  %v5209_v53 = vunpack.i.l.bf16 %v10014_v31 }
 0x1b5   : > { %v1553_v8 = vsel %vm226_vm0, %v7793_v7, %v5204_v17  ;;  %v5344_v7 = vunpack.i.l.bf16 %v7844_v58  ;;  %v6013_v58 = vld [vmem:[#allocation2 + $0x50] sm:$0xff]  ;;  %v5290_v18 = vunpack.i.h.bf16 %v7828_v37  ;;  %v5289_v2 = vunpack.i.l.bf16 %v7828_v37 }
 0x1b6   : > { %v5349_v37 = vunpack.i.l.bf16 %v7942_v40 }
 0x1b8   : > { %v7962_v41 = vpop.permute.xlu1 %5352  ;;  %4884 = vmatmul.msk.bf16.gmra.mxu2 %vm922_vm6, %v914_v10 }
 0x1b9   : > { %4894 = vmatmul.msk.bf16.gmra.mxu1 %vm922_vm6, %v1610_v48  ;;  %v1611_v48 = vpack.c.bf16 %v1584_v47, %v1583_v52  ;;  %v2255_v47 = vsel %vm226_vm0, %v6013_v58, %v5345_v42  ;;  %v5354_v36 = vunpack.i.l.bf16 %v7962_v41 }
 0x1ba   : > { %v7966_v19 = vpop.permute.xlu0 %5362 }
 0x1bc   : > { %v5418_v28 = vpop.permute.xlu2 %5417 }
 0x1bd   : > { %v5420_v62 = vunpack.i.h.bf16 %v5418_v28  ;;  %v5419_v27 = vunpack.i.l.bf16 %v5418_v28  ;;  %v5205_v28 = vunpack.i.h.bf16 %v7619_v35 }
 0x1bf   : > { %v2285_v0 = vsel %vm866_vm5, %v2253_v60, %v5420_v62  ;;  %v2284_v29 = vsel %vm866_vm5, %v2252_v16, %v5419_v27  ;;  %v1554_v62 = vsel %vm226_vm0, %v7820_v3, %v5205_v28  ;;  %v1569_v16 = vsel %vm226_vm0, %v7888_v22, %v5244_v32  ;;  %v6016_v32 = vld [vmem:[#allocation2 + $0x60] sm:$0xff] }
 0x1c0   : > { %v7978_v54 = vpop.permute.xlu1 %5367  ;;  %4902 = vmatmul.msk.bf16.gmra.mxu3 %vm922_vm6, %v1618_v45  ;;  %v2316_v10 = vpack.c.bf16 %v2285_v0, %v2284_v29  ;;  %v5284_v45 = vunpack.i.l.bf16 %v7685_v24  ;;  %v1586_v27 = vsel %vm866_vm5, %v1554_v62, %v5285_v9  ;;  %v5245_v24 = vunpack.i.h.bf16 %v7728_v21 }
 0x1c1   : > { %v1601_v55 = vsel %vm866_vm5, %v1569_v16, %v5324_v23  ;;  %v5295_v16 = vunpack.i.h.bf16 %v7851_v5 }
 0x1c2   : > { %v7983_v13 = vpop.permute.xlu0 %5377  ;;  %v1585_v35 = vsel %vm866_vm5, %v1553_v8, %v5284_v45  ;;  %v1570_v3 = vsel %vm226_vm0, %v7892_v59, %v5245_v24  ;;  %v2254_v59 = vsel %vm226_vm0, %v6014_v44, %v5344_v7  ;;  %v5350_v8 = vunpack.i.h.bf16 %v7942_v40  ;;  %v6015_v24 = vld [vmem:[#allocation2 + $0x68] sm:$0xff]  ;;  %v10015_v7 = vld [vmem:[#allocation74_spill] sm:$0xff] }
 0x1c3   : > { %v1612_v60 = vpack.c.bf16 %v1586_v27, %v1585_v35  ;;  %v1602_v52 = vsel %vm866_vm5, %v1570_v3, %v5325_v4  ;;  %v5215_v40 = vunpack.i.h.bf16 %v10015_v7  ;;  %v5214_v3 = vunpack.i.l.bf16 %v10015_v7  ;;  %v6024_v7 = vld [vmem:[#allocation2 + $0xa8] sm:$0xff] }
 0x1c8   : > { %v7997_v30 = vpop.permute.xlu1 %5382  ;;  %4913 = vmatmul.msk.bf16.vlgmr.msrb.gmra.mxu2 %vm922_vm6, %v2316_v10  ;;  %v1620_v10 = vpack.c.bf16 %v1602_v52, %v1601_v55  ;;  %v6018_v52 = vld [vmem:[#allocation2 + $0xc8] sm:$0xff] }
 0x1c9   : > { %4895 = vmatmul.msk.bf16.gmra.mxu1 %vm922_vm6, %v1611_v48  ;;  %v5210_v48 = vunpack.i.h.bf16 %v10014_v31  ;;  %v1558_v58 = vsel %vm226_vm0, %v6018_v52, %v5215_v40  ;;  %v5370_v52 = vunpack.i.h.bf16 %v7978_v54 }
 0x1ca   : > { %v8001_v1 = vpop.permute.xlu0 %5392 }
 0x1cb   : > { %v8007_v33 = vpop.f32.mrf.mxu2  ;;  %v1556_v28 = vsel %vm226_vm0, %v7880_v12, %v5210_v48  ;;  %v2256_v12 = vsel %vm226_vm0, %v6016_v32, %v5349_v37  ;;  %v5364_v32 = vunpack.i.l.bf16 %v7966_v19 }
 0x1cc   : > { %v1588_v45 = vsel %vm866_vm5, %v1556_v28, %v5290_v18  ;;  %v5360_v28 = vunpack.i.h.bf16 %v7857_v49 }
 0x1cd   : > { %v2262_v40 = vsel %vm226_vm0, %v6024_v7, %v5364_v32 }
 0x1d0   : > { %v8015_v11 = vpop.permute.xlu1 %5397  ;;  %4903 = vmatmul.msk.bf16.gmra.mxu3 %vm922_vm6, %v1619_v6  ;;  %v1555_v6 = vsel %vm226_vm0, %v7876_v34, %v5209_v53  ;;  %v2257_v34 = vsel %vm226_vm0, %v6015_v24, %v5350_v8  ;;  %v6021_v8 = vld [vmem:[#allocation2 + $0x98] sm:$0xff] }
 0x1d1   : > { %v1587_v9 = vsel %vm866_vm5, %v1555_v6, %v5289_v2  ;;  %v2261_v37 = vsel %vm226_vm0, %v6021_v8, %v5360_v28  ;;  %v2615_v8 = vld [vmem:[#allocation3 + $0x10] sm:$0x3] }
 0x1d2   : > { %v8018_v15 = vpop.permute.xlu0 %5407  ;;  %v1613_v27 = vpack.c.bf16 %v1588_v45, %v1587_v9  ;;  %v2888_v32 = vrot.slane %v2615_v8, 2 }
 0x1d3   : > { %v8020_v43 = vpop.f32.mrf.mxu2 }
 0x1d8   : > { %v8039_v0 = vpop.permute.xlu1 %5412 }
 0x1d9   : > { %4896 = vmatmul.msk.bf16.gmra.mxu1 %vm922_vm6, %v1612_v60 }
 0x1da   : > { %v5423_v21 = vpop.permute.xlu0 %5422 }
 0x1db   : > { %v5425_v29 = vunpack.i.h.bf16 %v5423_v21  ;;  %v5424_v20 = vunpack.i.l.bf16 %v5423_v21  ;;  %v8041_v57 = vpop.f32.mrf.mxu2  ;;  %v5294_v21 = vunpack.i.l.bf16 %v7851_v5  ;;  %v1590_v5 = vsel %vm866_vm5, %v1558_v58, %v5295_v16 }
 0x1dc   : > { %v5369_v58 = vunpack.i.l.bf16 %v7978_v54 }
 0x1dd   : > { %v2286_v14 = vsel %vm866_vm5, %v2254_v59, %v5424_v20  ;;  %v2287_v22 = vsel %vm866_vm5, %v2255_v47, %v5425_v29  ;;  %v6017_v20 = vld [vmem:[#allocation2 + $0xc0] sm:$0xff]  ;;  %v5433_v47 = vpop.permute.xlu2 %5432  ;;  %v5355_v59 = vunpack.i.h.bf16 %v7962_v41 }
 0x1de   : > { %v2317_v50 = vpack.c.bf16 %v2287_v22, %v2286_v14  ;;  %v1557_v55 = vsel %vm226_vm0, %v6017_v20, %v5214_v3  ;;  %v5435_v51 = vunpack.i.h.bf16 %v5433_v47  ;;  %v6019_v22 = vld [vmem:[#allocation2 + $0x80] sm:$0xff] }
 0x1df   : > { %v1589_v44 = vsel %vm866_vm5, %v1557_v55, %v5294_v21 }
 0x1e0   : > { %4904 = vmatmul.msk.bf16.gmra.mxu3 %vm922_vm6, %v1620_v10  ;;  %4914 = vmatmul.msk.bf16.gmra.mxu2 %vm922_vm6, %v2317_v50  ;;  %v5428_v17 = vpop.permute.xlu1 %5427  ;;  %v1614_v14 = vpack.c.bf16 %v1590_v5, %v1589_v44  ;;  %v2259_v10 = vsel %vm226_vm0, %v6019_v22, %v5355_v59  ;;  %v6020_v50 = vld [vmem:[#allocation2 + $0x78] sm:$0xff]  ;;  %v6025_v5 = vld [vmem:[#allocation2 + $0xc8] sm:$0xff] }
 0x1e1   : > { %v5430_v62 = vunpack.i.h.bf16 %v5428_v17  ;;  %v5429_v35 = vunpack.i.l.bf16 %v5428_v17  ;;  %v2258_v31 = vsel %vm226_vm0, %v6020_v50, %v5354_v36  ;;  %v2291_v18 = vsel %vm866_vm5, %v2259_v10, %v5435_v51  ;;  %v6026_v36 = vld [vmem:[#allocation2 + $0xc0] sm:$0xff]  ;;  %v983_v10 = vpop.f32.mrf.mxu0 }
 0x1e2   : > { %v5438_v6 = vpop.permute.xlu0 %5437  ;;  %v5359_v17 = vunpack.i.l.bf16 %v7857_v49  ;;  %v2265_v59 = vsel %vm226_vm0, %v6025_v5, %v5370_v52  ;;  %v2264_v51 = vsel %vm226_vm0, %v6026_v36, %v5369_v58  ;;  %v5380_v36 = vunpack.i.h.bf16 %v7983_v13 }
 0x1e3   : > { %v8055_v25 = vpop.f32.mrf.mxu2  ;;  %v2288_v23 = vsel %vm866_vm5, %v2256_v12, %v5429_v35  ;;  %v2289_v60 = vsel %vm866_vm5, %v2257_v34, %v5430_v62  ;;  %v5440_v9 = vunpack.i.h.bf16 %v5438_v6  ;;  %v5439_v45 = vunpack.i.l.bf16 %v5438_v6  ;;  %v6022_v62 = vld [vmem:[#allocation2 + $0x90] sm:$0xff] }
 0x1e4   : > { %v2318_v42 = vpack.c.bf16 %v2289_v60, %v2288_v23  ;;  %v2260_v35 = vsel %vm226_vm0, %v6022_v62, %v5359_v17  ;;  %v5365_v34 = vunpack.i.h.bf16 %v7966_v19  ;;  %v6023_v60 = vld [vmem:[#allocation2 + $0xb0] sm:$0xff] }
 0x1e5   : > { %v2293_v38 = vsel %vm866_vm5, %v2261_v37, %v5440_v9  ;;  %v2292_v56 = vsel %vm866_vm5, %v2260_v35, %v5439_v45  ;;  %v5448_v19 = vpop.permute.xlu2 %5447  ;;  %v8138_v9 = vld [vmem:[#allocation3] sm:$0xff]  ;;  %v8140_v45 = vld [vmem:[#allocation3 + $0x8] sm:$0xff]  ;;  %v2712_v35 = vrot.slane %v2615_v8, 1 }
 0x1e6   : > { %v5449_v44 = vunpack.i.l.bf16 %v5448_v19  ;;  %v2709_v37 = vrot.slane %v8138_v9, 1  ;;  %v2710_v62 = vrot.slane %v8140_v45, 1 }
 0x1e8   : > { %v5443_v49 = vpop.permute.xlu1 %5442  ;;  %v2711_v7 = vsel %vm480_vm3, %v2709_v37, %v2710_v62 }
 0x1e9   : > { %4897 = vmatmul.msk.bf16.gmra.mxu1 %vm922_vm6, %v1613_v27  ;;  %v2320_v27 = vpack.c.bf16 %v2293_v38, %v2292_v56  ;;  %v5445_v12 = vunpack.i.h.bf16 %v5443_v49  ;;  %v5444_v23 = vunpack.i.l.bf16 %v5443_v49  ;;  %v985_v17 = vpop.f32.mrf.mxu0  ;;  %v2885_v38 = vrot.slane %v8138_v9, 2  ;;  %v6027_v56 = vld [vmem:[#allocation2 + $0xe0] sm:$0xff]  ;;  %v6028_v49 = vld [vmem:[#allocation2 + $0xd8] sm:$0xff] }
 0x1eb   : > { %v8068_v4 = vpop.f32.mrf.mxu2  ;;  %v2294_v3 = vsel %vm866_vm5, %v2262_v40, %v5444_v23  ;;  %v2713_v40 = vsel %vm480_vm3, %v2710_v62, %v2712_v35 }
 0x1f0   : > { %4905 = vmatmul.msk.bf16.gmra.mxu3 %vm922_vm6, %v1621_v61  ;;  %4915 = vmatmul.msk.bf16.gmra.mxu2 %vm922_vm6, %v2318_v42  ;;  %v5434_v61 = vunpack.i.l.bf16 %v5433_v47  ;;  %v2263_v42 = vsel %vm226_vm0, %v6023_v60, %v5365_v34  ;;  %v5450_v47 = vunpack.i.h.bf16 %v5448_v19  ;;  %v2886_v34 = vrot.slane %v8140_v45, 2  ;;  %v5458_v5 = vpop.permute.xlu1 %5457 }
 0x1f1   : > { %v2295_v16 = vsel %vm866_vm5, %v2263_v42, %v5445_v12  ;;  %v988_v58 = vpop.f32.mrf.mxu0 }
 0x1f2   : > { %v2290_v53 = vsel %vm866_vm5, %v2258_v31, %v5434_v61  ;;  %v2321_v20 = vpack.c.bf16 %v2295_v16, %v2294_v3  ;;  %v2297_v61 = vsel %vm866_vm5, %v2265_v59, %v5450_v47  ;;  %v5496_v3 = vpack.i.bf16 %v2713_v40, %v2711_v7 }
 0x1f3   : > { %v8081_v29 = vpop.f32.mrf.mxu2  ;;  %v2319_v2 = vpack.c.bf16 %v2291_v18, %v2290_v53  ;;  %v5453_v53 = vpop.permute.xlu0 %5452  ;;  %v5375_v18 = vunpack.i.h.bf16 %v7902_v26  ;;  %v2887_v16 = vsel %vm657_vm4, %v2885_v38, %v2886_v34 }
 0x1f4   : > { %v5455_v6 = vunpack.i.h.bf16 %v5453_v53  ;;  %v5454_v28 = vunpack.i.l.bf16 %v5453_v53  ;;  %5497 = vrot.lane.b32.xlu0 %v5496_v3, %s6081_s20  ;;  %v6029_v53 = vld [vmem:[#allocation2 + $0xf8] sm:$0xff] }
 0x1f9   : > { %4898 = vmatmul.msk.bf16.gmra.mxu1 %vm922_vm6, %v1614_v14  ;;  %v2296_v14 = vsel %vm866_vm5, %v2264_v51, %v5449_v44  ;;  %v8164_v44 = vld [vmem:[%s9698_s2] ss:$0 sm:$0xff]  ;;  %v5379_v51 = vunpack.i.l.bf16 %v7983_v13  ;;  %v990_v35 = vpop.f32.mrf.mxu0 }
 0x1fa   : > { %v2322_v50 = vpack.c.bf16 %v2297_v61, %v2296_v14  ;;  %v5460_v61 = vunpack.i.h.bf16 %v5458_v5  ;;  %v5459_v14 = vunpack.i.l.bf16 %v5458_v5 }
 0x1fb   : > { %v8092_v48 = vpop.f32.mrf.mxu2 }
 0x200   : > { %4906 = vmatmul.msk.bf16.gmra.mxu3 %vm922_vm6, %v1622_v39  ;;  %4916 = vmatmul.msk.bf16.gmra.mxu2 %vm922_vm6, %v2319_v2  ;;  %v5374_v2 = vunpack.i.l.bf16 %v7902_v26 }
 0x202   : > { %v2266_v26 = vsel %vm226_vm0, %v6028_v49, %v5374_v2  ;;  %v6030_v2 = vld [vmem:[#allocation2 + $0xf0] sm:$0xff] }
 0x203   : > { %v8101_v41 = vpop.f32.mrf.mxu2  ;;  %v2298_v23 = vsel %vm866_vm5, %v2266_v26, %v5454_v28 }
 0x206   : > { %v1691_v31 = vpop.f32.mrf.mxu1 }
 0x20b   : > { %v8109_v39 = vpop.f32.mrf.mxu2 }
 0x20e   : > { %v1693_v60 = vpop.f32.mrf.mxu1 }
 0x210   : > { %4917 = vmatmul.msk.bf16.gmra.mxu2 %vm922_vm6, %v2320_v27  ;;  %v2267_v27 = vsel %vm226_vm0, %v6027_v56, %v5375_v18  ;;  %v2269_v18 = vsel %vm226_vm0, %v6029_v53, %v5380_v36 }
 0x211   : > { %v2299_v12 = vsel %vm866_vm5, %v2267_v27, %v5455_v6  ;;  %v2268_v6 = vsel %vm226_vm0, %v6030_v2, %v5379_v51  ;;  %v2301_v37 = vsel %vm866_vm5, %v2269_v18, %v5460_v61  ;;  %v1065_v51 = vadd.f32 %v8164_v44, %v988_v58 }
 0x212   : > { %v2323_v52 = vpack.c.bf16 %v2299_v12, %v2298_v23  ;;  %v2300_v8 = vsel %vm866_vm5, %v2268_v6, %v5459_v14  ;;  %v5384_v12 = vunpack.i.l.bf16 %v7997_v30  ;;  %v8180_v23 = vpop.f32.mrf.mxu0 }
 0x213   : > { %v8112_v24 = vpop.f32.mrf.mxu2  ;;  %v2324_v56 = vpack.c.bf16 %v2301_v37, %v2300_v8 }
 0x216   : > { %v1696_v59 = vpop.f32.mrf.mxu1 }
 0x217   : > { %v1773_v37 = vadd.f32 %v1696_v59, %v1065_v51  ;;  %v5468_v59 = vpop.permute.xlu0 %5467 }
 0x21a   : > { %v995_v18 = vpop.f32.mrf.mxu0 }
 0x21b   : > { %v8120_v21 = vpop.f32.mrf.mxu2 }
 0x21e   : > { %v8173_v27 = vpop.f32.mrf.mxu1 }
 0x220   : > { %4918 = vmatmul.msk.bf16.gmra.mxu2 %vm922_vm6, %v2321_v20  ;;  %v2889_v20 = vsel %vm657_vm4, %v2886_v34, %v2888_v32  ;;  %v5385_v32 = vunpack.i.h.bf16 %v7997_v30 }
 0x221   : > { %v5501_v19 = vpack.i.bf16 %v2889_v20, %v2887_v16  ;;  %v6031_v16 = vld [vmem:[#allocation2 + $0x110] sm:$0xff] }
 0x222   : > { %v2271_v20 = vsel %vm226_vm0, %v6031_v16, %v5385_v32  ;;  %v5469_v16 = vunpack.i.l.bf16 %v5468_v59  ;;  %v8222_v51 = vpop.f32.mrf.mxu0 }
 0x223   : > { %v8123_v55 = vpop.f32.mrf.mxu2  ;;  %5502 = vrot.lane.b32.xlu1 %v5501_v19, %s6082_s25  ;;  %v6032_v19 = vld [vmem:[#allocation2 + $0x108] sm:$0xff] }
 0x22b   : > { %v8131_v22 = vpop.f32.mrf.mxu2 }
 0x230   : > { %4919 = vmatmul.msk.bf16.gmra.mxu2 %vm922_vm6, %v2322_v50  ;;  %v1063_v50 = vadd.f32 %v8164_v44, %v983_v10  ;;  %v1064_v10 = vadd.f32 %v8164_v44, %v985_v17  ;;  %v1701_v17 = vpop.f32.mrf.mxu1 }
 0x232   : > { %v1771_v28 = vadd.f32 %v1691_v31, %v1063_v50  ;;  %v1772_v49 = vadd.f32 %v1693_v60, %v1064_v10  ;;  %v5463_v31 = vpop.permute.xlu2 %5462  ;;  %v2270_v60 = vsel %vm226_vm0, %v6032_v19, %v5384_v12  ;;  %v5390_v12 = vunpack.i.h.bf16 %v7923_v63 }
 0x233   : > { %v8134_v54 = vpop.f32.mrf.mxu2  ;;  %v5465_v40 = vunpack.i.h.bf16 %v5463_v31  ;;  %v5464_v3 = vunpack.i.l.bf16 %v5463_v31 }
 0x235   : > { %v2302_v5 = vsel %vm866_vm5, %v2270_v60, %v5464_v3  ;;  %v5470_v3 = vunpack.i.h.bf16 %v5468_v59  ;;  %v6033_v60 = vld [vmem:[#allocation2 + $0x128] sm:$0xff] }
 0x238   : > { %v8209_v10 = vpop.f32.mrf.mxu1 }
 0x23b   : > { %v8150_v42 = vpop.f32.mrf.mxu2 }
 0x240   : > { %4920 = vmatmul.msk.bf16.gmra.mxu2 %vm922_vm6, %v2323_v52  ;;  %v2303_v52 = vsel %vm866_vm5, %v2271_v20, %v5465_v40  ;;  %v1066_v20 = vadd.f32 %v8164_v44, %v990_v35 }
 0x241   : > { %v2325_v30 = vpack.c.bf16 %v2303_v52, %v2302_v5  ;;  %v2273_v52 = vsel %vm226_vm0, %v6033_v60, %v5390_v12  ;;  %v6034_v5 = vld [vmem:[#allocation2 + $0x120] sm:$0xff] }
 0x243   : > { %v8159_v47 = vpop.f32.mrf.mxu2 }
 0x24b   : > { %v2400_v62 = vpop.f32.mrf.mxu2 }
 0x24c   : > { %v2480_v38 = vadd.f32 %v2400_v62, %v1771_v28 }
 0x24e   : > { %v2512_v13 = vmax.f32 %v2480_v38, 0.0 }
 0x250   : > { %2545 = vst.msk [vmem:[#allocation3 + $0x19] sm:$0xff] %vm226_vm0, %v2512_v13  ;;  %4921 = vmatmul.msk.bf16.gmra.mxu2 %vm922_vm6, %v2324_v56 }
 0x253   : > { %v2402_v26 = vpop.f32.mrf.mxu2 }
 0x254   : > { %v2481_v34 = vadd.f32 %v2402_v26, %v1772_v49 }
 0x256   : > { %v2513_v7 = vmax.f32 %v2481_v34, 0.0 }
 0x257   : > { %v8187_v36 = vld [vmem:[#allocation3 + $0x18] sm:$0xff] }
 0x258   : > { %2546 = vst.msk [vmem:[#allocation3 + $0x21] sm:$0xff] %vm226_vm0, %v2513_v7  ;;  %v2890_v50 = vrot.slane %v8187_v36, 2  ;;  %v2714_v53 = vrot.slane %v8187_v36, 1  ;;  %v5389_v7 = vunpack.i.l.bf16 %v7923_v63  ;;  %v2305_v63 = vsel %vm866_vm5, %v2273_v52, %v5470_v3 }
 0x259   : > { %v1068_v3 = vadd.f32 %v8164_v44, %v995_v18 }
 0x25f   : > { %v8190_v61 = vld [vmem:[#allocation3 + $0x20] sm:$0xff]  ;;  %v2618_v14 = vld [vmem:[#allocation3 + $0x28] sm:$0x3] }
 0x260   : > { %4922 = vmatmul.msk.bf16.gmra.mxu2 %vm922_vm6, %v2325_v30  ;;  %v8196_v2 = vrot.slane %v8190_v61, 2  ;;  %v2893_v6 = vrot.slane %v2618_v14, 2  ;;  %v2715_v28 = vrot.slane %v8190_v61, 1  ;;  %v2717_v8 = vrot.slane %v2618_v14, 1  ;;  %v8199_v62 = vld [vmem:[#allocation3 + $0x28] sm:$0x3] }
 0x261   : > { %v3419_v32 = vrot.slane %v8199_v62, 1  ;;  %v2272_v30 = vsel %vm226_vm0, %v6034_v5, %v5389_v7  ;;  %v1774_v14 = vadd.f32 %v8173_v27, %v1066_v20  ;;  %v5473_v27 = vpop.permute.xlu1 %5472  ;;  %v6035_v7 = vld [vmem:[#allocation2 + $0x138] sm:$0xff] }
 0x262   : > { %v8203_v58 = vsel %vm657_vm4, %v2890_v50, %v8196_v2  ;;  %v2894_v38 = vsel %vm657_vm4, %v8196_v2, %v2893_v6  ;;  %v2716_v56 = vsel %vm480_vm3, %v2714_v53, %v2715_v28  ;;  %v2718_v13 = vsel %vm480_vm3, %v2715_v28, %v2717_v8  ;;  %v8227_v8 = vpop.f32.mrf.mxu1 }
 0x263   : > { %v2405_v49 = vpop.f32.mrf.mxu2  ;;  %v5511_v26 = vpack.i.bf16 %v2894_v38, %v8203_v58  ;;  %v5506_v31 = vpack.i.bf16 %v2718_v13, %v2716_v56  ;;  %v3420_v19 = vsel %vm480_vm3, %v2715_v28, %v3419_v32  ;;  %v2304_v50 = vsel %vm866_vm5, %v2272_v30, %v5469_v16 }
 0x264   : > { %v2482_v34 = vadd.f32 %v2405_v49, %v1773_v37  ;;  %v5516_v35 = vpack.i.bf16 %v3420_v19, %v2716_v56  ;;  %v2326_v28 = vpack.c.bf16 %v2305_v63, %v2304_v50  ;;  %v1067_v38 = vadd.f32 %v8164_v44, %v8180_v23  ;;  %v6036_v63 = vld [vmem:[#allocation2 + $0x140] sm:$0xff] }
 0x265   : > { %5512 = vrot.lane.b32.xlu2 %v5511_v26, %s6082_s25  ;;  %5507 = vrot.lane.b32.xlu1 %v5506_v31, %s6081_s20  ;;  %v5394_v49 = vunpack.i.l.bf16 %v8001_v1  ;;  %v8237_v31 = vpop.f32.mrf.mxu0  ;;  %v5474_v32 = vunpack.i.l.bf16 %v5473_v27 }
 0x266   : > { %v2514_v40 = vmax.f32 %v2482_v34, 0.0  ;;  %v1775_v13 = vadd.f32 %v1701_v17, %v1067_v38  ;;  %v5395_v34 = vunpack.i.h.bf16 %v8001_v1  ;;  %v5475_v17 = vunpack.i.h.bf16 %v5473_v27 }
 0x268   : > { %2547 = vst.msk [vmem:[#allocation3 + $0x31] sm:$0xff] %vm226_vm0, %v2514_v40  ;;  %v2274_v40 = vsel %vm226_vm0, %v6035_v7, %v5394_v49  ;;  %v2275_v18 = vsel %vm226_vm0, %v6036_v63, %v5395_v34 }
 0x269   : > { %v2306_v50 = vsel %vm866_vm5, %v2274_v40, %v5474_v32  ;;  %v2307_v27 = vsel %vm866_vm5, %v2275_v18, %v5475_v17  ;;  %v3595_v40 = vrot.slane %v8199_v62, 2 }
 0x26a   : > { %v8243_v16 = vpop.f32.mrf.mxu1 }
 0x26b   : > { %v2407_v53 = vpop.f32.mrf.mxu2  ;;  %v3596_v62 = vsel %vm657_vm4, %v8196_v2, %v3595_v40 }
 0x26c   : > { %v2483_v6 = vadd.f32 %v2407_v53, %v1774_v14  ;;  %v1776_v53 = vadd.f32 %v8209_v10, %v1068_v3  ;;  %v1069_v3 = vadd.f32 %v8164_v44, %v8222_v51 }
 0x26d   : > { %5517 = vrot.lane.b32.xlu2 %v5516_v35, %s6081_s20 }
 0x26e   : > { %v2515_v37 = vmax.f32 %v2483_v6, 0.0 }
 0x26f   : > { %v8235_v56 = vld [vmem:[#allocation3 + $0x30] sm:$0xff] }
 0x270   : > { %2548 = vst.msk [vmem:[#allocation3 + $0x39] sm:$0xff] %vm226_vm0, %v2515_v37  ;;  %4923 = vmatmul.msk.bf16.gmra.mxu2 %vm922_vm6, %v2326_v28  ;;  %v4125_v23 = vrot.slane %v8235_v56, 1  ;;  %v2895_v52 = vrot.slane %v8235_v56, 2 }
 0x273   : > { %v2410_v26 = vpop.f32.mrf.mxu2 }
 0x274   : > { %v2484_v59 = vadd.f32 %v2410_v26, %v1775_v13 }
 0x276   : > { %v2516_v12 = vmax.f32 %v2484_v59, 0.0 }
 0x277   : > { %v8245_v20 = vld [vmem:[#allocation3 + $0x38] sm:$0xff]  ;;  %v4031_v19 = vld [vmem:[#allocation3 + $0x40] sm:$0x3] }
 0x278   : > { %v2621_v60 = vld [vmem:[#allocation3 + $0x40] sm:$0x3]  ;;  %2549 = vst.msk [vmem:[#allocation3 + $0x49] sm:$0xff] %vm226_vm0, %v2516_v12  ;;  %v4126_v1 = vrot.slane %v8245_v20, 1  ;;  %v4128_v5 = vrot.slane %v4031_v19, 1  ;;  %v8251_v30 = vrot.slane %v8245_v20, 2  ;;  %v8270_v12 = vpop.f32.mrf.mxu0 }
 0x279   : > { %v2898_v14 = vrot.slane %v2621_v60, 2  ;;  %v2722_v35 = vrot.slane %v2621_v60, 1  ;;  %v4304_v32 = vrot.slane %v4031_v19, 2  ;;  %v8278_v17 = vld [vmem:[#allocation3 + $0x40] sm:$0x3]  ;;  %v1711_v60 = vpop.f32.mrf.mxu1 }
 0x27a   : > { %v8257_v6 = vsel %vm480_vm3, %v4125_v23, %v4126_v1  ;;  %v4129_v28 = vsel %vm480_vm3, %v4126_v1, %v4128_v5  ;;  %v2897_v37 = vsel %vm657_vm4, %v2895_v52, %v8251_v30  ;;  %v2327_v23 = vpack.c.bf16 %v2307_v27, %v2306_v50  ;;  %v5478_v5 = vpop.permute.xlu2 %5477  ;;  %v6037_v27 = vld [vmem:[#allocation2 + $0x158] sm:$0xff] }
 0x27b   : > { %v2899_v38 = vsel %vm657_vm4, %v8251_v30, %v2898_v14  ;;  %v2412_v13 = vpop.f32.mrf.mxu2  ;;  %v5536_v49 = vpack.i.bf16 %v4129_v28, %v8257_v6  ;;  %v2723_v10 = vsel %vm480_vm3, %v4126_v1, %v2722_v35  ;;  %v4305_v19 = vsel %vm657_vm4, %v8251_v30, %v4304_v32 }
 0x27c   : > { %v5526_v26 = vpack.i.bf16 %v2899_v38, %v2897_v37  ;;  %v2485_v59 = vadd.f32 %v2412_v13, %v1776_v53  ;;  %v5521_v34 = vpack.i.bf16 %v2723_v10, %v8257_v6  ;;  %v5400_v52 = vunpack.i.h.bf16 %v8015_v11 }
 0x27d   : > { %5537 = vrot.lane.b32.xlu1 %v5536_v49, %s6081_s20  ;;  %v1777_v14 = vadd.f32 %v8227_v8, %v1069_v3  ;;  %v5531_v51 = vpack.i.bf16 %v2897_v37, %v3596_v62  ;;  %v3424_v18 = vrot.slane %v8278_v17, 1  ;;  %v5541_v35 = vpack.i.bf16 %v2897_v37, %v4305_v19  ;;  %v6038_v19 = vld [vmem:[#allocation2 + $0x150] sm:$0xff] }
 0x27e   : > { %5527 = vrot.lane.b32.xlu0 %v5526_v26, %s6082_s25  ;;  %v2517_v7 = vmax.f32 %v2485_v59, 0.0  ;;  %5522 = vrot.lane.b32.xlu2 %v5521_v34, %s6081_s20  ;;  %v5399_v28 = vunpack.i.l.bf16 %v8015_v11  ;;  %v5480_v38 = vunpack.i.h.bf16 %v5478_v5  ;;  %v2277_v13 = vsel %vm226_vm0, %v6037_v27, %v5400_v52 }
 0x27f   : > { %v4032_v50 = vld [vmem:[#allocation3 + $0x48] sm:$0xff]  ;;  %v5479_v2 = vunpack.i.l.bf16 %v5478_v5  ;;  %v1070_v26 = vadd.f32 %v8164_v44, %v8237_v31  ;;  %v3425_v10 = vsel %vm480_vm3, %v4126_v1, %v3424_v18 }
 0x280   : > { %2550 = vst.msk [vmem:[#allocation3 + $0x51] sm:$0xff] %vm226_vm0, %v2517_v7  ;;  %4924 = vmatmul.msk.bf16.gmra.mxu2 %vm922_vm6, %v2327_v23  ;;  %v4130_v8 = vrot.slane %v4032_v50, 1  ;;  %v2900_v11 = vrot.slane %v4032_v50, 2  ;;  %v1005_v32 = vpop.f32.mrf.mxu0  ;;  %v2276_v52 = vsel %vm226_vm0, %v6038_v19, %v5399_v28  ;;  %v2309_v5 = vsel %vm866_vm5, %v2277_v13, %v5480_v38 }
 0x281   : > { %v1778_v31 = vadd.f32 %v8243_v16, %v1070_v26  ;;  %v1713_v18 = vpop.f32.mrf.mxu1 }
 0x283   : > { %v2415_v63 = vpop.f32.mrf.mxu2 }
 0x284   : > { %v2486_v53 = vadd.f32 %v2415_v63, %v1777_v14 }
 0x286   : > { %5532 = vrot.lane.b32.xlu0 %v5531_v51, %s6082_s25  ;;  %v2518_v49 = vmax.f32 %v2486_v53, 0.0  ;;  %5542 = vrot.lane.b32.xlu2 %v5541_v35, %s6082_s25  ;;  %v2308_v51 = vsel %vm866_vm5, %v2276_v52, %v5479_v2  ;;  %v5546_v53 = vpack.i.bf16 %v3425_v10, %v8257_v6  ;;  %v5405_v52 = vunpack.i.h.bf16 %v7954_v46 }
 0x287   : > { %v4033_v59 = vld [vmem:[#allocation3 + $0x50] sm:$0xff]  ;;  %v4034_v37 = vld [vmem:[#allocation3 + $0x58] sm:$0x3]  ;;  %v2328_v27 = vpack.c.bf16 %v2309_v5, %v2308_v51  ;;  %v5404_v5 = vunpack.i.l.bf16 %v7954_v46  ;;  %v1072_v51 = vadd.f32 %v8164_v44, %v1005_v32 }
 0x288   : > { %v2624_v34 = vld [vmem:[#allocation3 + $0x58] sm:$0x3]  ;;  %2551 = vst.msk [vmem:[#allocation3 + $0x61] sm:$0xff] %vm226_vm0, %v2518_v49  ;;  %v4131_v23 = vrot.slane %v4033_v59, 1  ;;  %v4133_v7 = vrot.slane %v4034_v37, 1  ;;  %v8295_v40 = vrot.slane %v4033_v59, 2  ;;  %v1008_v26 = vpop.f32.mrf.mxu0 }
 0x289   : > { %v2903_v3 = vrot.slane %v2624_v34, 2  ;;  %v2727_v38 = vrot.slane %v2624_v34, 1  ;;  %v3600_v49 = vrot.slane %v8278_v17, 2  ;;  %v8323_v2 = vld [vmem:[#allocation3 + $0x58] sm:$0x3]  ;;  %v5483_v34 = vpop.permute.xlu0 %5482 }
 0x28a   : > { %v8301_v1 = vsel %vm480_vm3, %v4130_v8, %v4131_v23  ;;  %v4134_v14 = vsel %vm480_vm3, %v4131_v23, %v4133_v7  ;;  %v8306_v62 = vsel %vm657_vm4, %v2900_v11, %v8295_v40  ;;  %v1071_v8 = vadd.f32 %v8164_v44, %v8270_v12 }
 0x28b   : > { %v2904_v63 = vsel %vm657_vm4, %v8295_v40, %v2903_v3  ;;  %v2417_v50 = vpop.f32.mrf.mxu2  ;;  %v5566_v16 = vpack.i.bf16 %v4134_v14, %v8301_v1  ;;  %v2728_v6 = vsel %vm480_vm3, %v4131_v23, %v2727_v38  ;;  %v3601_v59 = vsel %vm657_vm4, %v8251_v30, %v3600_v49  ;;  %v6039_v38 = vld [vmem:[#allocation2 + $0x170] sm:$0xff] }
 0x28c   : > { %v5556_v35 = vpack.i.bf16 %v2904_v63, %v8306_v62  ;;  %v2487_v28 = vadd.f32 %v2417_v50, %v1778_v31  ;;  %v1779_v10 = vadd.f32 %v1711_v60, %v1071_v8  ;;  %v5561_v17 = vpack.i.bf16 %v8306_v62, %v3601_v59  ;;  %v1716_v31 = vpop.f32.mrf.mxu1 }
 0x28d   : > { %v5551_v7 = vpack.i.bf16 %v2728_v6, %v8301_v1  ;;  %v4309_v12 = vrot.slane %v4034_v37, 2  ;;  %v3429_v19 = vrot.slane %v8323_v2, 1  ;;  %v5485_v60 = vunpack.i.h.bf16 %v5483_v34 }
 0x28e   : > { %5547 = vrot.lane.b32.xlu0 %v5546_v53, %s6081_s20  ;;  %5557 = vrot.lane.b32.xlu1 %v5556_v35, %s6082_s25  ;;  %v2519_v13 = vmax.f32 %v2487_v28, 0.0  ;;  %v5484_v63 = vunpack.i.l.bf16 %v5483_v34  ;;  %v1780_v6 = vadd.f32 %v1713_v18, %v1072_v51 }
 0x28f   : > { %5567 = vrot.lane.b32.xlu2 %v5566_v16, %s6081_s20  ;;  %v2625_v30 = vld [vmem:[#allocation3 + $0x60] sm:$0xff]  ;;  %v4310_v37 = vsel %vm657_vm4, %v8295_v40, %v4309_v12  ;;  %v3430_v46 = vsel %vm480_vm3, %v4131_v23, %v3429_v19 }
 0x290   : > { %2552 = vst.msk [vmem:[#allocation3 + $0x69] sm:$0xff] %vm226_vm0, %v2519_v13  ;;  %4925 = vmatmul.msk.bf16.gmra.mxu2 %vm922_vm6, %v2328_v27  ;;  %v2905_v16 = vrot.slane %v2625_v30, 2  ;;  %v2279_v27 = vsel %vm226_vm0, %v6039_v38, %v5405_v52  ;;  %v6040_v13 = vld [vmem:[#allocation2 + $0x168] sm:$0xff]  ;;  %v1010_v12 = vpop.f32.mrf.mxu0 }
 0x291   : > { %v2278_v49 = vsel %vm226_vm0, %v6040_v13, %v5404_v5  ;;  %v2311_v8 = vsel %vm866_vm5, %v2279_v27, %v5485_v60 }
 0x292   : > { %v2310_v59 = vsel %vm866_vm5, %v2278_v49, %v5484_v63 }
 0x293   : > { %v2420_v11 = vpop.f32.mrf.mxu2  ;;  %v2329_v5 = vpack.c.bf16 %v2311_v8, %v2310_v59 }
 0x294   : > { %v2488_v3 = vadd.f32 %v2420_v11, %v1779_v10  ;;  %v5576_v11 = vpack.i.bf16 %v3430_v46, %v8301_v1  ;;  %v1073_v1 = vadd.f32 %v8164_v44, %v1008_v26  ;;  %v1718_v63 = vpop.f32.mrf.mxu1  ;;  %v5488_v46 = vpop.permute.xlu1 %5487  ;;  %v5409_v26 = vunpack.i.l.bf16 %v8018_v15 }
 0x296   : > { %5562 = vrot.lane.b32.xlu1 %v5561_v17, %s6082_s25  ;;  %5552 = vrot.lane.b32.xlu0 %v5551_v7, %s6081_s20  ;;  %v2520_v14 = vmax.f32 %v2488_v3, 0.0  ;;  %v5571_v17 = vpack.i.bf16 %v8306_v62, %v4310_v37  ;;  %v3605_v62 = vrot.slane %v8323_v2, 2 }
 0x297   : > { %v2626_v50 = vld [vmem:[#allocation3 + $0x68] sm:$0xff]  ;;  %v2627_v53 = vld [vmem:[#allocation3 + $0x70] sm:$0x3] }
 0x298   : > { %2553 = vst.msk [vmem:[#allocation3 + $0x79] sm:$0xff] %vm226_vm0, %v2520_v14  ;;  %v8339_v35 = vrot.slane %v2626_v50, 2  ;;  %v2908_v28 = vrot.slane %v2627_v53, 2  ;;  %v4037_v32 = vld [vmem:[#allocation3 + $0x70] sm:$0x3]  ;;  %v4136_v19 = vrot.slane %v2626_v50, 1  ;;  %v3606_v38 = vsel %vm657_vm4, %v8295_v40, %v3605_v62 }
 0x299   : > { %v4138_v18 = vrot.slane %v4037_v32, 1  ;;  %v2732_v52 = vrot.slane %v2627_v53, 1  ;;  %v4135_v14 = vrot.slane %v2625_v30, 1  ;;  %v5410_v53 = vunpack.i.h.bf16 %v8018_v15  ;;  %v8365_v30 = vld [vmem:[#allocation3 + $0x70] sm:$0x3]  ;;  %v1013_v15 = vpop.f32.mrf.mxu0 }
 0x29a   : > { %v8346_v10 = vsel %vm657_vm4, %v2905_v16, %v8339_v35  ;;  %v2909_v23 = vsel %vm657_vm4, %v8339_v35, %v2908_v28  ;;  %v1781_v16 = vadd.f32 %v1716_v31, %v1073_v1  ;;  %v4314_v8 = vrot.slane %v4037_v32, 2 }
 0x29b   : > { %v2422_v34 = vpop.f32.mrf.mxu2  ;;  %v5586_v7 = vpack.i.bf16 %v2909_v23, %v8346_v10  ;;  %v4137_v51 = vsel %vm480_vm3, %v4135_v14, %v4136_v19  ;;  %v4139_v37 = vsel %vm480_vm3, %v4136_v19, %v4138_v18  ;;  %v2733_v50 = vsel %vm480_vm3, %v4136_v19, %v2732_v52 }
 0x29c   : > { %v2489_v3 = vadd.f32 %v2422_v34, %v1780_v6  ;;  %v5596_v2 = vpack.i.bf16 %v4139_v37, %v4137_v51  ;;  %v5581_v27 = vpack.i.bf16 %v2733_v50, %v4137_v51  ;;  %v5591_v49 = vpack.i.bf16 %v8346_v10, %v3606_v38 }
 0x29d   : > { %5587 = vrot.lane.b32.xlu2 %v5586_v7, %s6082_s25  ;;  %v5490_v6 = vunpack.i.h.bf16 %v5488_v46  ;;  %v5489_v23 = vunpack.i.l.bf16 %v5488_v46  ;;  %v3434_v31 = vrot.slane %v8365_v30, 1  ;;  %v1074_v32 = vadd.f32 %v8164_v44, %v1010_v12 }
 0x29e   : > { %5577 = vrot.lane.b32.xlu1 %v5576_v11, %s6081_s20  ;;  %5572 = vrot.lane.b32.xlu0 %v5571_v17, %s6082_s25  ;;  %v2521_v60 = vmax.f32 %v2489_v3, 0.0  ;;  %v6041_v11 = vld [vmem:[#allocation2 + $0x188] sm:$0xff]  ;;  %v6042_v17 = vld [vmem:[#allocation2 + $0x180] sm:$0xff] }
 0x29f   : > { %v2628_v59 = vld [vmem:[#allocation3 + $0x78] sm:$0xff]  ;;  %v2281_v40 = vsel %vm226_vm0, %v6041_v11, %v5410_v53  ;;  %v2280_v7 = vsel %vm226_vm0, %v6042_v17, %v5409_v26  ;;  %v1782_v50 = vadd.f32 %v1718_v63, %v1074_v32  ;;  %v1721_v53 = vpop.f32.mrf.mxu1  ;;  %v3435_v12 = vsel %vm480_vm3, %v4136_v19, %v3434_v31  ;;  %v4931_v17 = vld [vmem:[%s9699_s3] sm:$0xf] }
 0x2a0   : > { %2554 = vst.msk [vmem:[#allocation3 + $0x81] sm:$0xff] %vm226_vm0, %v2521_v60  ;;  %4926 = vmatmul.msk.bf16.gmra.mxu2 %vm922_vm6, %v2329_v5  ;;  %v4315_v5 = vsel %vm657_vm4, %v8339_v35, %v4314_v8  ;;  %v2910_v60 = vrot.slane %v2628_v59, 2  ;;  %v2312_v62 = vsel %vm866_vm5, %v2280_v7, %v5489_v23  ;;  %v2313_v37 = vsel %vm866_vm5, %v2281_v40, %v5490_v6  ;;  %v5498_v40 = vpop.permute.xlu0 %5497 }
 0x2a1   : > { %v5601_v38 = vpack.i.bf16 %v8346_v10, %v4315_v5  ;;  %v2330_v8 = vpack.c.bf16 %v2313_v37, %v2312_v62  ;;  %v3610_v6 = vrot.slane %v8365_v30, 2  ;;  %v1075_v23 = vadd.f32 %v8164_v44, %v1013_v15  ;;  %v5503_v5 = vpop.permute.xlu1 %5502 }
 0x2a2   : > { %v5505_v62 = vunpack.i.h.bf16 %v5503_v5  ;;  %v5504_v37 = vunpack.i.l.bf16 %v5503_v5 }
 0x2a3   : > { %v2425_v28 = vpop.f32.mrf.mxu2  ;;  %v1783_v11 = vadd.f32 %v1721_v53, %v1075_v23  ;;  %v3611_v32 = vsel %vm657_vm4, %v8339_v35, %v3610_v6 }
 0x2a4   : > { %v2490_v13 = vadd.f32 %v2425_v28, %v1781_v16 }
 0x2a5   : > { %5592 = vrot.lane.b32.xlu2 %v5591_v49, %s6082_s25  ;;  %v4140_v49 = vrot.slane %v2628_v59, 1  ;;  %v8410_v59 = vpop.f32.mrf.mxu3 }
 0x2a6   : > { %5597 = vrot.lane.b32.xlu0 %v5596_v2, %s6081_s20  ;;  %5582 = vrot.lane.b32.xlu1 %v5581_v27, %s6081_s20  ;;  %v2522_v34 = vmax.f32 %v2490_v13, 0.0  ;;  %v5606_v13 = vpack.i.bf16 %v3435_v12, %v4137_v51 }
 0x2a7   : > { %v2629_v3 = vld [vmem:[#allocation3 + $0x80] sm:$0xff]  ;;  %v2630_v18 = vld [vmem:[#allocation3 + $0x88] sm:$0x3]  ;;  %v1723_v53 = vpop.f32.mrf.mxu1 }
 0x2a8   : > { %v8378_v52 = vld [vmem:[#allocation3 + $0x88] sm:$0x3]  ;;  %2555 = vst.msk [vmem:[#allocation3 + $0x91] sm:$0xff] %vm226_vm0, %v2522_v34  ;;  %v8383_v14 = vrot.slane %v2629_v3, 2  ;;  %v2913_v1 = vrot.slane %v2630_v18, 2  ;;  %v8394_v26 = vrot.slane %v2629_v3, 1  ;;  %v1015_v34 = vpop.f32.mrf.mxu0  ;;  %v5500_v3 = vunpack.i.h.bf16 %v5498_v40 }
 0x2a9   : > { %v4143_v28 = vrot.slane %v8378_v52, 1  ;;  %v2737_v19 = vrot.slane %v2630_v18, 1  ;;  %v8416_v15 = vld [vmem:[#allocation3 + $0x88] sm:$0x3]  ;;  %v5499_v18 = vunpack.i.l.bf16 %v5498_v40 }
 0x2aa   : > { %v8390_v46 = vsel %vm657_vm4, %v2910_v60, %v8383_v14  ;;  %v2914_v16 = vsel %vm657_vm4, %v8383_v14, %v2913_v1  ;;  %v8406_v10 = vsel %vm480_vm3, %v4140_v49, %v8394_v26  ;;  %v5000_v60 = vld [vmem:[%s9699_s3] sm:$0x30]  ;;  %v3062_v35 = vsel %vm226_vm0, %v8140_v45, %v5500_v3 }
 0x2ab   : > { %v2427_v2 = vpop.f32.mrf.mxu2  ;;  %v5616_v27 = vpack.i.bf16 %v2914_v16, %v8390_v46  ;;  %v4144_v51 = vsel %vm480_vm3, %v8394_v26, %v4143_v28  ;;  %v2738_v30 = vsel %vm480_vm3, %v8394_v26, %v2737_v19  ;;  %v5621_v1 = vpack.i.bf16 %v8390_v46, %v3611_v32 }
 0x2ac   : > { %v2491_v63 = vadd.f32 %v2427_v2, %v1782_v50  ;;  %v5626_v7 = vpack.i.bf16 %v4144_v51, %v8406_v10  ;;  %v4932_v50 = vor.u32 %v5000_v60, %v4931_v17  ;;  %v5611_v16 = vpack.i.bf16 %v2738_v30, %v8406_v10 }
 0x2ad   : > { %5607 = vrot.lane.b32.xlu2 %v5606_v13, %s6081_s20  ;;  %v3439_v28 = vrot.slane %v8416_v15, 1  ;;  %v3061_v2 = vsel %vm226_vm0, %v8138_v9, %v5499_v18  ;;  %v3094_v13 = vsel %vm866_vm5, %v3062_v35, %v5505_v62  ;;  %v5415_v19 = vunpack.i.h.bf16 %v8039_v0  ;;  %v8454_v60 = vpop.f32.mrf.mxu3 }
 0x2ae   : > { %5602 = vrot.lane.b32.xlu1 %v5601_v38, %s6082_s25  ;;  %5617 = vrot.lane.b32.xlu0 %v5616_v27, %s6082_s25  ;;  %v2523_v31 = vmax.f32 %v2491_v63, 0.0  ;;  %v5493_v38 = vpop.permute.xlu2 %5492  ;;  %v3093_v63 = vsel %vm866_vm5, %v3061_v2, %v5504_v37  ;;  %v3197_v49 = vsel %vm657_vm4, %v4932_v50, 0  ;;  %v5414_v9 = vunpack.i.l.bf16 %v8039_v0  ;;  %v6043_v0 = vld [vmem:[#allocation2 + $0x1a0] sm:$0xff] }
 0x2af   : > { %v2631_v45 = vld [vmem:[#allocation3 + $0x90] sm:$0xff]  ;;  %v3125_v6 = vpack.c.bf16 %v3094_v13, %v3093_v63  ;;  %3206 = vmatpush.bf16.msrb.mxu3 %v3197_v49  ;;  %v5494_v51 = vunpack.i.l.bf16 %v5493_v38  ;;  %v3440_v17 = vsel %vm480_vm3, %v8394_v26, %v3439_v28  ;;  %v2283_v3 = vsel %vm226_vm0, %v6043_v0, %v5415_v19  ;;  %v1726_v13 = vpop.f32.mrf.mxu1 }
 0x2b0   : > { %2556 = vst.msk [vmem:[#allocation3 + $0x99] sm:$0xff] %vm226_vm0, %v2523_v31  ;;  %4927 = vmatmul.msk.bf16.gmra.mxu2 %vm922_vm6, %v2330_v8  ;;  %v4319_v8 = vrot.slane %v8378_v52, 2  ;;  %v5495_v31 = vunpack.i.h.bf16 %v5493_v38  ;;  %v2915_v52 = vrot.slane %v2631_v45, 2  ;;  %v5636_v35 = vpack.i.bf16 %v3440_v17, %v8406_v10 }
 0x2b1   : > { %v3615_v10 = vrot.slane %v8416_v15, 2 }
 0x2b2   : > { %v4320_v18 = vsel %vm657_vm4, %v8383_v14, %v4319_v8  ;;  %4933 = vmatmul.msk.bf16.vlgmr.msrb.gmra.mxu3 %vm922_vm6, %v3125_v6  ;;  %v4145_v6 = vrot.slane %v2631_v45, 1 }
 0x2b3   : > { %v2430_v12 = vpop.f32.mrf.mxu2  ;;  %v3616_v15 = vsel %vm657_vm4, %v8383_v14, %v3615_v10 }
 0x2b4   : > { %v2492_v27 = vadd.f32 %v2430_v12, %v1783_v11  ;;  %v1076_v11 = vadd.f32 %v8164_v44, %v1015_v34  ;;  %v6044_v34 = vld [vmem:[#allocation2 + $0x198] sm:$0xff]  ;;  %v2315_v12 = vsel %vm866_vm5, %v2283_v3, %v5495_v31 }
 0x2b5   : > { %5612 = vrot.lane.b32.xlu2 %v5611_v16, %s6081_s20  ;;  %v2282_v5 = vsel %vm226_vm0, %v6044_v34, %v5414_v9 }
 0x2b6   : > { %5627 = vrot.lane.b32.xlu1 %v5626_v7, %s6081_s20  ;;  %5622 = vrot.lane.b32.xlu0 %v5621_v1, %s6082_s25  ;;  %v2524_v23 = vmax.f32 %v2492_v27, 0.0  ;;  %v1018_v1 = vpop.f32.mrf.mxu0  ;;  %v1784_v62 = vadd.f32 %v1723_v53, %v1076_v11  ;;  %v2314_v16 = vsel %vm866_vm5, %v2282_v5, %v5494_v51  ;;  %v5631_v53 = vpack.i.bf16 %v8390_v46, %v4320_v18  ;;  %v8479_v11 = vpop.f32.mrf.mxu3 }
 0x2b7   : > { %v2632_v30 = vld [vmem:[#allocation3 + $0x98] sm:$0xff]  ;;  %v2633_v40 = vld [vmem:[#allocation3 + $0xa0] sm:$0x3]  ;;  %v2331_v19 = vpack.c.bf16 %v2315_v12, %v2314_v16  ;;  %v1077_v9 = vadd.f32 %v8164_v44, %v1018_v1  ;;  %v1728_v1 = vpop.f32.mrf.mxu1 }
 0x2b8   : > { %2557 = vst.msk [vmem:[#allocation3 + $0xa9] sm:$0xff] %vm226_vm0, %v2524_v23  ;;  %v8447_v7 = vrot.slane %v2632_v30, 2  ;;  %v2918_v32 = vrot.slane %v2633_v40, 2  ;;  %v4043_v50 = vld [vmem:[#allocation3 + $0xa0] sm:$0x3]  ;;  %v4146_v27 = vrot.slane %v2632_v30, 1 }
 0x2b9   : > { %v2742_v63 = vrot.slane %v2633_v40, 1  ;;  %v4148_v49 = vrot.slane %v4043_v50, 1  ;;  %v8477_v51 = vld [vmem:[#allocation3 + $0xa0] sm:$0x3]  ;;  %v1785_v30 = vadd.f32 %v1726_v13, %v1077_v9 }
 0x2ba   : > { %v8458_v26 = vsel %vm657_vm4, %v2915_v52, %v8447_v7  ;;  %v2919_v37 = vsel %vm657_vm4, %v8447_v7, %v2918_v32  ;;  %v4147_v46 = vsel %vm480_vm3, %v4145_v6, %v4146_v27  ;;  %v4324_v52 = vrot.slane %v4043_v50, 2  ;;  %v4975_v9 = vld [vmem:[%s9699_s3 + $0x10] sm:$0xf] }
 0x2bb   : > { %v2432_v28 = vpop.f32.mrf.mxu2  ;;  %v5646_v2 = vpack.i.bf16 %v2919_v37, %v8458_v26  ;;  %v2743_v23 = vsel %vm480_vm3, %v4146_v27, %v2742_v63  ;;  %v4149_v31 = vsel %vm480_vm3, %v4146_v27, %v4148_v49  ;;  %v5651_v40 = vpack.i.bf16 %v8458_v26, %v3616_v15  ;;  %v4953_v49 = vld [vmem:[%s9699_s3 + $0x8] sm:$0xf] }
 0x2bc   : > { %v2493_v38 = vadd.f32 %v2432_v28, %v1784_v62  ;;  %v5641_v17 = vpack.i.bf16 %v2743_v23, %v4147_v46  ;;  %v5656_v3 = vpack.i.bf16 %v4149_v31, %v4147_v46  ;;  %v3444_v18 = vrot.slane %v8477_v51, 1  ;;  %v5002_v23 = vld [vmem:[%s9699_s3 + $0x10] sm:$0x30] }
 0x2bd   : > { %5632 = vrot.lane.b32.xlu2 %v5631_v53, %s6082_s25  ;;  %v4325_v62 = vsel %vm657_vm4, %v8447_v7, %v4324_v52  ;;  %v3620_v52 = vrot.slane %v8477_v51, 2 }
 0x2be   : > { %5637 = vrot.lane.b32.xlu0 %v5636_v35, %s6081_s20  ;;  %5647 = vrot.lane.b32.xlu1 %v5646_v2, %s6082_s25  ;;  %v2525_v8 = vmax.f32 %v2493_v38, 0.0  ;;  %v1020_v32 = vpop.f32.mrf.mxu0  ;;  %v3445_v12 = vsel %vm480_vm3, %v4146_v27, %v3444_v18  ;;  %v5001_v27 = vld [vmem:[%s9699_s3 + $0x8] sm:$0x30]  ;;  %v5661_v6 = vpack.i.bf16 %v8458_v26, %v4325_v62  ;;  %v8517_v31 = vpop.f32.mrf.mxu3 }
 0x2bf   : > { %v2634_v34 = vld [vmem:[#allocation3 + $0xa8] sm:$0xff]  ;;  %v1078_v14 = vadd.f32 %v8164_v44, %v1020_v32  ;;  %v8495_v53 = vpop.permute.xlu2 %5512  ;;  %v4954_v26 = vor.u32 %v5001_v27, %v4953_v49  ;;  %v4976_v32 = vor.u32 %v5002_v23, %v4975_v9  ;;  %v1080_v27 = vadd.f32 %v8164_v44, %v8020_v43 }
 0x2c0   : > { %2558 = vst.msk [vmem:[#allocation3 + $0xb1] sm:$0xff] %vm226_vm0, %v2525_v8  ;;  %4928 = vmatmul.msk.bf16.gmra.mxu2 %vm922_vm6, %v2331_v19  ;;  %v2920_v16 = vrot.slane %v2634_v34, 2  ;;  %v5666_v8 = vpack.i.bf16 %v3445_v12, %v4147_v46  ;;  %v5515_v43 = vunpack.i.h.bf16 %v8495_v53 }
 0x2c1   : > { %v1786_v38 = vadd.f32 %v1728_v1, %v1078_v14 }
 0x2c3   : > { %v2435_v45 = vpop.f32.mrf.mxu2 }
 0x2c4   : > { %v2494_v0 = vadd.f32 %v2435_v45, %v1785_v30 }
 0x2c5   : > { %5657 = vrot.lane.b32.xlu2 %v5656_v3, %s6081_s20  ;;  %v3905_v3 = vsel %vm657_vm4, %v4954_v26, 0  ;;  %v1788_v26 = vadd.f32 %v8454_v60, %v1080_v27 }
 0x2c6   : > { %5652 = vrot.lane.b32.xlu1 %v5651_v40, %s6082_s25  ;;  %5642 = vrot.lane.b32.xlu0 %v5641_v17, %s6081_s20  ;;  %v2526_v5 = vmax.f32 %v2494_v0, 0.0  ;;  %v4150_v17 = vrot.slane %v2634_v34, 1  ;;  %v1079_v0 = vadd.f32 %v8164_v44, %v8007_v33  ;;  %v4614_v34 = vsel %vm657_vm4, %v4976_v32, 0 }
 0x2c7   : > { %v2635_v37 = vld [vmem:[#allocation3 + $0xb0] sm:$0xff]  ;;  %v2636_v50 = vld [vmem:[#allocation3 + $0xb8] sm:$0x3]  ;;  %3914 = vmatpush.bf16.msrb.mxu0 %v3905_v3  ;;  %v3621_v33 = vsel %vm657_vm4, %v8447_v7, %v3620_v52  ;;  %4623 = vmatpush.bf16.msrb.mxu1 %v4614_v34  ;;  %v5514_v44 = vunpack.i.l.bf16 %v8495_v53 }
 0x2c8   : > { %2559 = vst.msk [vmem:[#allocation3 + $0xc1] sm:$0xff] %vm226_vm0, %v2526_v5  ;;  %v8493_v28 = vrot.slane %v2635_v37, 2  ;;  %v2923_v35 = vrot.slane %v2636_v50, 2  ;;  %v4046_v2 = vld [vmem:[#allocation3 + $0xb8] sm:$0x3]  ;;  %v4151_v15 = vrot.slane %v2635_v37, 1  ;;  %v1787_v51 = vadd.f32 %v8410_v59, %v1079_v0  ;;  %v8542_v59 = vpop.f32.mrf.mxu3 }
 0x2c9   : > { %v4153_v45 = vrot.slane %v4046_v2, 1  ;;  %v2747_v40 = vrot.slane %v2636_v50, 1  ;;  %v8530_v1 = vld [vmem:[#allocation3 + $0xb8] sm:$0x3] }
 0x2ca   : > { %v8499_v63 = vsel %vm657_vm4, %v2920_v16, %v8493_v28  ;;  %v2924_v13 = vsel %vm657_vm4, %v8493_v28, %v2923_v35  ;;  %v4152_v18 = vsel %vm480_vm3, %v4150_v17, %v4151_v15  ;;  %v3449_v12 = vrot.slane %v8530_v1, 1  ;;  %v8537_v35 = vpop.permute.xlu2 %5517 }
 0x2cb   : > { %v2437_v19 = vpop.f32.mrf.mxu2  ;;  %v5676_v10 = vpack.i.bf16 %v2924_v13, %v8499_v63  ;;  %v4154_v5 = vsel %vm480_vm3, %v4151_v15, %v4153_v45  ;;  %v2748_v14 = vsel %vm480_vm3, %v4151_v15, %v2747_v40  ;;  %v4329_v16 = vrot.slane %v4046_v2, 2 }
 0x2cc   : > { %v2495_v30 = vadd.f32 %v2437_v19, %v1786_v38  ;;  %v5686_v37 = vpack.i.bf16 %v4154_v5, %v4152_v18  ;;  %v5671_v50 = vpack.i.bf16 %v2748_v14, %v4152_v18  ;;  %v5681_v13 = vpack.i.bf16 %v8499_v63, %v3621_v33 }
 0x2cd   : > { %5677 = vrot.lane.b32.xlu2 %v5676_v10, %s6082_s25  ;;  %v3450_v2 = vsel %vm480_vm3, %v4151_v15, %v3449_v12 }
 0x2ce   : > { %5667 = vrot.lane.b32.xlu1 %v5666_v8, %s6081_s20  ;;  %5662 = vrot.lane.b32.xlu0 %v5661_v6, %s6082_s25  ;;  %v2527_v46 = vmax.f32 %v2495_v30, 0.0  ;;  %v4330_v8 = vsel %vm657_vm4, %v8493_v28, %v4329_v16  ;;  %v5696_v60 = vpack.i.bf16 %v3450_v2, %v4152_v18 }
 0x2cf   : > { %v2637_v49 = vld [vmem:[#allocation3 + $0xc0] sm:$0xff]  ;;  %v5691_v3 = vpack.i.bf16 %v8499_v63, %v4330_v8 }
 0x2d0   : > { %2560 = vst.msk [vmem:[#allocation3 + $0xc9] sm:$0xff] %vm226_vm0, %v2527_v46  ;;  %v2925_v9 = vrot.slane %v2637_v49, 2  ;;  %v4155_v63 = vrot.slane %v2637_v49, 1  ;;  %v8584_v16 = vpop.f32.mrf.mxu3 }
 0x2d3   : > { %v2440_v62 = vpop.f32.mrf.mxu2 }
 0x2d4   : > { %v2496_v38 = vadd.f32 %v2440_v62, %v1787_v51 }
 0x2d5   : > { %5682 = vrot.lane.b32.xlu2 %v5681_v13, %s6082_s25 }
 0x2d6   : > { %5687 = vrot.lane.b32.xlu0 %v5686_v37, %s6081_s20  ;;  %5672 = vrot.lane.b32.xlu1 %v5671_v50, %s6081_s20  ;;  %v2528_v7 = vmax.f32 %v2496_v38, 0.0  ;;  %v3625_v37 = vrot.slane %v8530_v1, 2  ;;  %v8580_v50 = vld [vmem:[%s9698_s2] ss:$0 sm:$0xff] }
 0x2d7   : > { %v5508_v19 = vpop.permute.xlu1 %5507  ;;  %v2638_v6 = vld [vmem:[#allocation3 + $0xc8] sm:$0xff]  ;;  %v2639_v10 = vld [vmem:[#allocation3 + $0xd0] sm:$0x3]  ;;  %v1081_v12 = vadd.f32 %v8580_v50, %v8041_v57 }
 0x2d8   : > { %2561 = vst.msk [vmem:[#allocation3 + $0xd9] sm:$0xff] %vm226_vm0, %v2528_v7  ;;  %v5510_v23 = vunpack.i.h.bf16 %v5508_v19  ;;  %v5509_v30 = vunpack.i.l.bf16 %v5508_v19  ;;  %v8551_v45 = vrot.slane %v2638_v6, 2  ;;  %v2928_v40 = vrot.slane %v2639_v10, 2  ;;  %v4049_v15 = vld [vmem:[#allocation3 + $0xd0] sm:$0x3]  ;;  %v8569_v14 = vpop.permute.xlu2 %5522 }
 0x2d9   : > { %v4156_v34 = vrot.slane %v2638_v6, 1  ;;  %v4158_v51 = vrot.slane %v4049_v15, 1  ;;  %v2752_v62 = vrot.slane %v2639_v10, 1  ;;  %v3343_v49 = vld [vmem:[#allocation3 + $0xd0] sm:$0x3]  ;;  %v1789_v7 = vadd.f32 %v8479_v11, %v1081_v12 }
 0x2da   : > { %v3064_v46 = vsel %vm226_vm0, %v8190_v61, %v5510_v23  ;;  %v3063_v17 = vsel %vm226_vm0, %v8187_v36, %v5509_v30  ;;  %v8562_v52 = vsel %vm657_vm4, %v2925_v9, %v8551_v45  ;;  %v2929_v32 = vsel %vm657_vm4, %v8551_v45, %v2928_v40 }
 0x2db   : > { %v2442_v0 = vpop.f32.mrf.mxu2  ;;  %v5706_v53 = vpack.i.bf16 %v2929_v32, %v8562_v52  ;;  %v3095_v5 = vsel %vm866_vm5, %v3063_v17, %v5514_v44  ;;  %v3096_v36 = vsel %vm866_vm5, %v3064_v46, %v5515_v43  ;;  %v4157_v38 = vsel %vm480_vm3, %v4155_v63, %v4156_v34  ;;  %v8608_v17 = vpop.f32.mrf.mxu3 }
 0x2dc   : > { %v2497_v61 = vadd.f32 %v2442_v0, %v1788_v26  ;;  %v3126_v33 = vpack.c.bf16 %v3096_v36, %v3095_v5  ;;  %v4159_v13 = vsel %vm480_vm3, %v4156_v34, %v4158_v51  ;;  %v2753_v1 = vsel %vm480_vm3, %v4156_v34, %v2752_v62 }
 0x2dd   : > { %5697 = vrot.lane.b32.xlu2 %v5696_v60, %s6081_s20  ;;  %v3626_v27 = vsel %vm657_vm4, %v8493_v28, %v3625_v37  ;;  %v5716_v2 = vpack.i.bf16 %v4159_v13, %v4157_v38  ;;  %v5701_v6 = vpack.i.bf16 %v2753_v1, %v4157_v38  ;;  %v3454_v10 = vrot.slane %v3343_v49, 1 }
 0x2de   : > { %5692 = vrot.lane.b32.xlu1 %v5691_v3, %s6082_s25  ;;  %5707 = vrot.lane.b32.xlu0 %v5706_v53, %s6082_s25  ;;  %v2529_v18 = vmax.f32 %v2497_v61, 0.0  ;;  %v5711_v57 = vpack.i.bf16 %v8562_v52, %v3626_v27  ;;  %v4334_v23 = vrot.slane %v4049_v15, 2  ;;  %v1082_v11 = vadd.f32 %v8580_v50, %v8055_v25 }
 0x2df   : > { %4934 = vmatmul.msk.bf16.gmra.mxu3 %vm922_vm6, %v3126_v33  ;;  %v2640_v9 = vld [vmem:[#allocation3 + $0xd8] sm:$0xff]  ;;  %v3455_v44 = vsel %vm480_vm3, %v4156_v34, %v3454_v10  ;;  %v5525_v5 = vunpack.i.h.bf16 %v8569_v14  ;;  %v5524_v36 = vunpack.i.l.bf16 %v8569_v14 }
 0x2e0   : > { %2562 = vst.msk [vmem:[#allocation3 + $0xe1] sm:$0xff] %vm226_vm0, %v2529_v18  ;;  %v8596_v30 = vpop.permute.xlu2 %5542  ;;  %v2930_v26 = vrot.slane %v2640_v9, 2  ;;  %v4335_v46 = vsel %vm657_vm4, %v8551_v45, %v4334_v23  ;;  %v1790_v15 = vadd.f32 %v8517_v31, %v1082_v11  ;;  %v5726_v53 = vpack.i.bf16 %v3455_v44, %v4157_v38 }
 0x2e1   : > { %v5721_v31 = vpack.i.bf16 %v8562_v52, %v4335_v46  ;;  %v2754_v63 = vrot.slane %v2640_v9, 1  ;;  %v1083_v52 = vadd.f32 %v8580_v50, %v8068_v4  ;;  %v3066_v14 = vsel %vm226_vm0, %v8245_v20, %v5525_v5 }
 0x2e2   : > { %v5520_v44 = vunpack.i.h.bf16 %v8537_v35 }
 0x2e3   : > { %v2445_v19 = vpop.f32.mrf.mxu2  ;;  %v8648_v11 = vpop.f32.mrf.mxu3 }
 0x2e4   : > { %v2498_v8 = vadd.f32 %v2445_v19, %v1789_v7  ;;  %v3065_v7 = vsel %vm226_vm0, %v8235_v56, %v5524_v36  ;;  %v1791_v19 = vadd.f32 %v8542_v59, %v1083_v52 }
 0x2e5   : > { %5702 = vrot.lane.b32.xlu2 %v5701_v6, %s6081_s20 }
 0x2e6   : > { %5717 = vrot.lane.b32.xlu1 %v5716_v2, %s6081_s20  ;;  %5712 = vrot.lane.b32.xlu0 %v5711_v57, %s6082_s25  ;;  %v2530_v40 = vmax.f32 %v2498_v8, 0.0 }
 0x2e7   : > { %v2641_v28 = vld [vmem:[#allocation3 + $0xe0] sm:$0xff]  ;;  %v8614_v25 = vld [vmem:[#allocation3 + $0xe8] sm:$0x3] }
 0x2e8   : > { %2563 = vst.msk [vmem:[#allocation3 + $0xf1] sm:$0xff] %vm226_vm0, %v2530_v40  ;;  %v8602_v43 = vrot.slane %v2641_v28, 2  ;;  %v8616_v0 = vld [vmem:[#allocation3 + $0xe8] sm:$0x3]  ;;  %v2755_v34 = vrot.slane %v2641_v28, 1  ;;  %v2757_v51 = vrot.slane %v8614_v25, 1  ;;  %v1084_v40 = vadd.f32 %v8580_v50, %v8081_v29 }
 0x2e9   : > { %v4163_v33 = vrot.slane %v8616_v0, 1  ;;  %v8632_v37 = vpop.permute.xlu2 %5567  ;;  %v3346_v1 = vld [vmem:[#allocation3 + $0xe8] sm:$0x3] }
 0x2ea   : > { %v8612_v32 = vsel %vm657_vm4, %v2930_v26, %v8602_v43  ;;  %v2758_v27 = vsel %vm480_vm3, %v2755_v34, %v2757_v51  ;;  %v3459_v23 = vrot.slane %v3346_v1, 1  ;;  %v1792_v29 = vadd.f32 %v8584_v16, %v1084_v40 }
 0x2eb   : > { %v2447_v60 = vpop.f32.mrf.mxu2  ;;  %v5736_v3 = vpack.i.bf16 %v8203_v58, %v8612_v32  ;;  %v3630_v58 = vrot.slane %v3343_v49, 2  ;;  %v2756_v49 = vsel %vm480_vm3, %v2754_v63, %v2755_v34  ;;  %v4164_v4 = vsel %vm480_vm3, %v2755_v34, %v4163_v33  ;;  %v6047_v63 = vld [vmem:[#allocation3 + $0x30] sm:$0xff]  ;;  %v8688_v40 = vpop.f32.mrf.mxu3 }
 0x2ec   : > { %v2499_v61 = vadd.f32 %v2447_v60, %v1790_v15  ;;  %v5731_v59 = vpack.i.bf16 %v2758_v27, %v2756_v49  ;;  %v5746_v26 = vpack.i.bf16 %v4164_v4, %v2756_v49  ;;  %v3635_v15 = vrot.slane %v3346_v1, 2 }
 0x2ed   : > { %5722 = vrot.lane.b32.xlu2 %v5721_v31, %s6082_s25  ;;  %v3631_v8 = vsel %vm657_vm4, %v8551_v45, %v3630_v58  ;;  %v4339_v45 = vrot.slane %v8616_v0, 2  ;;  %v3460_v31 = vsel %vm480_vm3, %v2755_v34, %v3459_v23 }
 0x2ee   : > { %5737 = vrot.lane.b32.xlu1 %v5736_v3, %s6082_s25  ;;  %5727 = vrot.lane.b32.xlu0 %v5726_v53, %s6081_s20  ;;  %v2531_v62 = vmax.f32 %v2499_v61, 0.0  ;;  %v5741_v56 = vpack.i.bf16 %v8612_v32, %v3631_v8  ;;  %v5544_v53 = vunpack.i.l.bf16 %v8596_v30  ;;  %v3636_v34 = vsel %vm657_vm4, %v8602_v43, %v3635_v15 }
 0x2ef   : > { %v5538_v12 = vpop.permute.xlu1 %5537  ;;  %v4053_v60 = vld [vmem:[#allocation3 + $0xf0] sm:$0xff] }
 0x2f0   : > { %v5528_v18 = vpop.permute.xlu0 %5527  ;;  %2564 = vst.msk [vmem:[#allocation3 + $0xf9] sm:$0xff] %vm226_vm0, %v2531_v62  ;;  %v5540_v6 = vunpack.i.h.bf16 %v5538_v12  ;;  %v5539_v46 = vunpack.i.l.bf16 %v5538_v12  ;;  %v4341_v62 = vrot.slane %v4053_v60, 2 }
 0x2f1   : > { %v5530_v38 = vunpack.i.h.bf16 %v5528_v18  ;;  %v5529_v13 = vunpack.i.l.bf16 %v5528_v18  ;;  %v6046_v18 = vld [vmem:[#allocation3 + $0x20] sm:$0xff] }
 0x2f2   : > { %v4478_v5 = vsel %vm226_vm0, %v8245_v20, %v5540_v6  ;;  %v3769_v16 = vsel %vm226_vm0, %v6046_v18, %v5520_v44  ;;  %v4477_v52 = vsel %vm226_vm0, %v6047_v63, %v5539_v46  ;;  %v4340_v20 = vsel %vm657_vm4, %v8602_v43, %v4339_v45 }
 0x2f3   : > { %v3097_v2 = vsel %vm866_vm5, %v3065_v7, %v5529_v13  ;;  %v3098_v57 = vsel %vm866_vm5, %v3066_v14, %v5530_v38  ;;  %v2450_v10 = vpop.f32.mrf.mxu2  ;;  %v4510_v13 = vsel %vm866_vm5, %v4478_v5, %v5544_v53  ;;  %v5751_v6 = vpack.i.bf16 %v8612_v32, %v4340_v20 }
 0x2f4   : > { %v3127_v9 = vpack.c.bf16 %v3098_v57, %v3097_v2  ;;  %v2500_v28 = vadd.f32 %v2450_v10, %v1791_v19  ;;  %v5756_v2 = vpack.i.bf16 %v3460_v31, %v2756_v49  ;;  %v2759_v49 = vrot.slane %v4053_v60, 1 }
 0x2f5   : > { %5747 = vrot.lane.b32.xlu2 %v5746_v26, %s6081_s20  ;;  %v1085_v26 = vadd.f32 %v8580_v50, %v8092_v48  ;;  %v2933_v48 = vrot.slane %v8614_v25, 2 }
 0x2f6   : > { %4935 = vmatmul.msk.bf16.gmra.mxu3 %vm922_vm6, %v3127_v9  ;;  %5742 = vrot.lane.b32.xlu1 %v5741_v56, %s6082_s25  ;;  %v2532_v3 = vmax.f32 %v2500_v28, 0.0 }
 0x2f7   : > { %5732 = vrot.lane.b32.xlu0 %v5731_v59, %s6081_s20  ;;  %v4054_v36 = vld [vmem:[#allocation3 + $0xf8] sm:$0xff]  ;;  %v8662_v33 = vpop.permute.xlu2 %5587  ;;  %v8672_v14 = vld [vmem:[#allocation3 + $0x100] sm:$0x3]  ;;  %v1793_v53 = vadd.f32 %v8608_v17, %v1085_v26  ;;  %v1087_v17 = vadd.f32 %v8580_v50, %v8109_v39 }
 0x2f8   : > { %v5533_v61 = vpop.permute.xlu0 %5532  ;;  %2565 = vst.msk [vmem:[#allocation3 + $0x109] sm:$0xff] %vm226_vm0, %v2532_v3  ;;  %v8664_v58 = vrot.slane %v4054_v36, 2  ;;  %v4055_v7 = vld [vmem:[#allocation3 + $0x100] sm:$0x3]  ;;  %v2760_v10 = vrot.slane %v4054_v36, 1  ;;  %v2762_v9 = vrot.slane %v8672_v14, 1  ;;  %v5545_v3 = vunpack.i.h.bf16 %v8596_v30 }
 0x2f9   : > { %v5535_v0 = vunpack.i.h.bf16 %v5533_v61  ;;  %v5534_v51 = vunpack.i.l.bf16 %v5533_v61  ;;  %v3349_v27 = vld [vmem:[#allocation3 + $0x100] sm:$0x3]  ;;  %v4168_v56 = vrot.slane %v4055_v7, 1  ;;  %v4344_v36 = vrot.slane %v4055_v7, 2 }
 0x2fa   : > { %v8681_v1 = vsel %vm657_vm4, %v4341_v62, %v8664_v58  ;;  %v3464_v23 = vrot.slane %v3349_v27, 1  ;;  %v2761_v45 = vsel %vm480_vm3, %v2759_v49, %v2760_v10  ;;  %v2763_v15 = vsel %vm480_vm3, %v2760_v10, %v2762_v9  ;;  %v6049_v49 = vld [vmem:[#allocation3 + $0x48] sm:$0xff] }
 0x2fb   : > { %v4509_v12 = vsel %vm866_vm5, %v4477_v52, %v5535_v0  ;;  %v8676_v38 = vsel %vm866_vm5, %v3769_v16, %v5534_v51  ;;  %v2452_v19 = vpop.f32.mrf.mxu2  ;;  %v5766_v57 = vpack.i.bf16 %v8681_v1, %v3636_v34  ;;  %v4169_v60 = vsel %vm480_vm3, %v2760_v10, %v4168_v56 }
 0x2fc   : > { %v4541_v4 = vpack.c.bf16 %v4510_v13, %v4509_v12  ;;  %v2501_v8 = vadd.f32 %v2452_v19, %v1792_v29  ;;  %v3465_v29 = vsel %vm480_vm3, %v2760_v10, %v3464_v23  ;;  %v5761_v31 = vpack.i.bf16 %v2763_v15, %v2761_v45  ;;  %v6048_v23 = vld [vmem:[#allocation3 + $0x50] sm:$0xff] }
 0x2fd   : > { %5767 = vrot.lane.b32.xlu2 %v5766_v57, %s6082_s25  ;;  %v3640_v0 = vrot.slane %v3349_v27, 2  ;;  %v1086_v30 = vadd.f32 %v8580_v50, %v8101_v41  ;;  %v5771_v18 = vpack.i.bf16 %v4169_v60, %v2761_v45  ;;  %v5781_v16 = vpack.i.bf16 %v3465_v29, %v2761_v45 }
 0x2fe   : > { %4977 = vmatmul.msk.bf16.vlgmr.msrb.gmra.mxu1 %vm922_vm6, %v4541_v4  ;;  %5757 = vrot.lane.b32.xlu1 %v5756_v2, %s6081_s20  ;;  %v2533_v28 = vmax.f32 %v2501_v8, 0.0  ;;  %v5569_v41 = vunpack.i.l.bf16 %v8632_v37  ;;  %v2934_v13 = vsel %vm657_vm4, %v8602_v43, %v2933_v48  ;;  %v4345_v39 = vsel %vm657_vm4, %v8664_v58, %v4344_v36  ;;  %v8735_v4 = vpop.f32.mrf.mxu3 }
 0x2ff   : > { %5752 = vrot.lane.b32.xlu0 %v5751_v6, %s6082_s25  ;;  %v8700_v46 = vpop.permute.xlu2 %5592  ;;  %v1794_v25 = vadd.f32 %v8648_v11, %v1086_v30  ;;  %v8722_v20 = vld [vmem:[#allocation3 + $0x108] sm:$0xff]  ;;  %v3641_v11 = vsel %vm657_vm4, %v8664_v58, %v3640_v0  ;;  %v5776_v26 = vpack.i.bf16 %v2934_v13, %v4345_v39  ;;  %v1088_v30 = vadd.f32 %v8580_v50, %v8112_v24 }
 0x300   : > { %v8692_v59 = vpop.permute.xlu0 %5547  ;;  %v8694_v32 = vpop.permute.xlu1 %5557  ;;  %2566 = vst.msk [vmem:[#allocation3 + $0x111] sm:$0xff] %vm226_vm0, %v2533_v28  ;;  %v2764_v10 = vrot.slane %v8722_v20, 1  ;;  %v4346_v24 = vrot.slane %v8722_v20, 2 }
 0x301   : > { %v5549_v44 = vunpack.i.l.bf16 %v8692_v59  ;;  %v5550_v19 = vunpack.i.h.bf16 %v8692_v59  ;;  %v5559_v6 = vunpack.i.l.bf16 %v8694_v32 }
 0x303   : > { %v3770_v5 = vsel %vm226_vm0, %v6047_v63, %v5549_v44  ;;  %v2455_v61 = vpop.f32.mrf.mxu2  ;;  %v5570_v63 = vunpack.i.h.bf16 %v8632_v37  ;;  %v5560_v37 = vunpack.i.h.bf16 %v8694_v32  ;;  %v5786_v44 = vpack.i.bf16 %v3641_v11, %v8681_v1 }
 0x304   : > { %v8711_v51 = vsel %vm866_vm5, %v3770_v5, %v5545_v3  ;;  %v2502_v62 = vadd.f32 %v2455_v61, %v1793_v53 }
 0x305   : > { %5782 = vrot.lane.b32.xlu2 %v5781_v16, %s6081_s20 }
 0x306   : > { %5762 = vrot.lane.b32.xlu1 %v5761_v31, %s6081_s20  ;;  %v2534_v52 = vmax.f32 %v2502_v62, 0.0  ;;  %v2938_v31 = vrot.slane %v8672_v14, 2  ;;  %v6050_v62 = vld [vmem:[#allocation3 + $0x38] sm:$0xff] }
 0x307   : > { %5772 = vrot.lane.b32.xlu0 %v5771_v18, %s6081_s20  ;;  %v2647_v7 = vld [vmem:[#allocation3 + $0x110] sm:$0xff]  ;;  %v8733_v27 = vld [vmem:[#allocation3 + $0x118] sm:$0x3]  ;;  %v8740_v43 = vpop.permute.xlu2 %5607  ;;  %v3771_v18 = vsel %vm226_vm0, %v6050_v62, %v5550_v19 }
 0x308   : > { %v8725_v34 = vpop.permute.xlu1 %5562  ;;  %v5553_v12 = vpop.permute.xlu0 %5552  ;;  %2567 = vst.msk [vmem:[#allocation3 + $0x121] sm:$0xff] %vm226_vm0, %v2534_v52  ;;  %v4058_v8 = vld [vmem:[#allocation3 + $0x118] sm:$0x3]  ;;  %v8744_v9 = vrot.slane %v2647_v7, 1  ;;  %v2767_v56 = vrot.slane %v8733_v27, 1  ;;  %v8762_v36 = vrot.slane %v2647_v7, 2  ;;  %v1795_v52 = vadd.f32 %v8688_v40, %v1087_v17 }
 0x309   : > { %v5555_v2 = vunpack.i.h.bf16 %v5553_v12  ;;  %v5554_v57 = vunpack.i.l.bf16 %v5553_v12  ;;  %v5564_v45 = vunpack.i.l.bf16 %v8725_v34  ;;  %v4173_v60 = vrot.slane %v4058_v8, 1  ;;  %v3352_v17 = vld [vmem:[#allocation3 + $0x118] sm:$0x3] }
 0x30a   : > { %v8753_v32 = vsel %vm480_vm3, %v2764_v10, %v8744_v9  ;;  %v2768_v3 = vsel %vm480_vm3, %v8744_v9, %v2767_v56  ;;  %v4349_v0 = vrot.slane %v4058_v8, 2  ;;  %v5565_v16 = vunpack.i.h.bf16 %v8725_v34 }
 0x30b   : > { %v3068_v28 = vsel %vm226_vm0, %v6048_v23, %v5555_v2  ;;  %v3067_v59 = vsel %vm226_vm0, %v6049_v49, %v5554_v57  ;;  %v2457_v15 = vpop.f32.mrf.mxu2  ;;  %v5796_v53 = vpack.i.bf16 %v2768_v3, %v8753_v32  ;;  %v4174_v13 = vsel %vm480_vm3, %v8744_v9, %v4173_v60  ;;  %v8791_v57 = vpop.f32.mrf.mxu3 }
 0x30c   : > { %v2503_v29 = vadd.f32 %v2457_v15, %v1794_v25  ;;  %v3099_v48 = vsel %vm866_vm5, %v3067_v59, %v5559_v6  ;;  %v3100_v5 = vsel %vm866_vm5, %v3068_v28, %v5560_v37  ;;  %v8776_v39 = vsel %vm866_vm5, %v3771_v18, %v5564_v45 }
 0x30d   : > { %v3128_v61 = vpack.c.bf16 %v3100_v5, %v3099_v48  ;;  %5797 = vrot.lane.b32.xlu2 %v5796_v53, %s6081_s20  ;;  %v4480_v34 = vsel %vm226_vm0, %v6048_v23, %v5570_v63  ;;  %v4479_v37 = vsel %vm226_vm0, %v6049_v49, %v5569_v41  ;;  %v2939_v2 = vsel %vm657_vm4, %v8664_v58, %v2938_v31 }
 0x30e   : > { %5777 = vrot.lane.b32.xlu1 %v5776_v26, %s6082_s25  ;;  %v2535_v25 = vmax.f32 %v2503_v29, 0.0  ;;  %v8787_v20 = vsel %vm657_vm4, %v4346_v24, %v8762_v36  ;;  %v4350_v63 = vsel %vm657_vm4, %v8762_v36, %v4349_v0  ;;  %v4511_v6 = vsel %vm866_vm5, %v4479_v37, %v5565_v16 }
 0x30f   : > { %5787 = vrot.lane.b32.xlu0 %v5786_v44, %s6082_s25  ;;  %4936 = vmatmul.msk.bf16.gmra.mxu3 %vm922_vm6, %v3128_v61  ;;  %v8780_v40 = vpop.permute.xlu2 %5612  ;;  %v5801_v56 = vpack.i.bf16 %v4174_v13, %v8753_v32  ;;  %v3469_v26 = vrot.slane %v3352_v17, 1  ;;  %v5594_v44 = vunpack.i.l.bf16 %v8700_v46  ;;  %v5791_v15 = vpack.i.bf16 %v2939_v2, %v8681_v1  ;;  %v2649_v1 = vld [vmem:[#allocation3 + $0x120] sm:$0xff] }
 0x310   : > { %v5578_v14 = vpop.permute.xlu1 %5577  ;;  %v5573_v12 = vpop.permute.xlu0 %5572  ;;  %2568 = vst.msk [vmem:[#allocation3 + $0x129] sm:$0xff] %vm226_vm0, %v2535_v25  ;;  %v5806_v3 = vpack.i.bf16 %v4350_v63, %v8787_v20  ;;  %v1089_v60 = vadd.f32 %v8580_v50, %v8120_v21  ;;  %v1796_v29 = vadd.f32 %v8735_v4, %v1088_v30  ;;  %v5590_v5 = vunpack.i.h.bf16 %v8662_v33 }
 0x311   : > { %v5580_v11 = vunpack.i.h.bf16 %v5578_v14  ;;  %v5579_v7 = vunpack.i.l.bf16 %v5578_v14  ;;  %v5574_v19 = vunpack.i.l.bf16 %v5573_v12  ;;  %v5575_v8 = vunpack.i.h.bf16 %v5573_v12 }
 0x312   : > { %v5589_v61 = vunpack.i.l.bf16 %v8662_v33  ;;  %v3470_v4 = vsel %vm480_vm3, %v8744_v9, %v3469_v26  ;;  %v5609_v16 = vunpack.i.l.bf16 %v8740_v43  ;;  %v2943_v33 = vrot.slane %v8733_v27, 2 }
 0x313   : > { %v4512_v10 = vsel %vm866_vm5, %v4480_v34, %v5574_v19  ;;  %v3773_v41 = vsel %vm226_vm0, %v6048_v23, %v5580_v11  ;;  %v3772_v58 = vsel %vm226_vm0, %v6049_v49, %v5579_v7  ;;  %v2460_v28 = vpop.f32.mrf.mxu2  ;;  %v3645_v23 = vrot.slane %v3352_v17, 2  ;;  %v8837_v11 = vld [vmem:[#allocation3 + $0x68] sm:$0xff]  ;;  %v6052_v19 = vld [vmem:[#allocation3 + $0x60] sm:$0xff] }
 0x314   : > { %v4542_v59 = vpack.c.bf16 %v4512_v10, %v4511_v6  ;;  %v2504_v45 = vadd.f32 %v2460_v28, %v1795_v52  ;;  %v3833_v49 = vpack.c.bf16 %v8776_v39, %v8711_v51  ;;  %v8811_v48 = vsel %vm866_vm5, %v3772_v58, %v5575_v8 }
 0x315   : > { %5807 = vrot.lane.b32.xlu2 %v5806_v3, %s6082_s25  ;;  %v8814_v21 = vsel %vm866_vm5, %v3773_v41, %v5594_v44  ;;  %v2769_v12 = vrot.slane %v2649_v1, 1  ;;  %v3646_v24 = vsel %vm657_vm4, %v8762_v36, %v3645_v23  ;;  %v5811_v27 = vpack.i.bf16 %v3470_v4, %v8753_v32 }
 0x316   : > { %4978 = vmatmul.msk.bf16.gmra.mxu1 %vm922_vm6, %v4542_v59  ;;  %5802 = vrot.lane.b32.xlu1 %v5801_v56, %s6081_s20  ;;  %v2536_v53 = vmax.f32 %v2504_v45, 0.0  ;;  %v3834_v18 = vpack.c.bf16 %v8814_v21, %v8811_v48  ;;  %v1758_v56 = vpop.f32.mrf.mxu3  ;;  %v5816_v28 = vpack.i.bf16 %v3646_v24, %v8787_v20  ;;  %v4351_v3 = vrot.slane %v2649_v1, 2 }
 0x317   : > { %5792 = vrot.lane.b32.xlu0 %v5791_v15, %s6082_s25  ;;  %v8820_v30 = vld [vmem:[#allocation3 + $0x128] sm:$0xff]  ;;  %v8822_v62 = vld [vmem:[#allocation3 + $0x130] sm:$0x3]  ;;  %v8828_v14 = vpop.permute.xlu2 %5632  ;;  %v1797_v23 = vadd.f32 %v8791_v57, %v1089_v60  ;;  %v5615_v1 = vunpack.i.h.bf16 %v8780_v40 }
 0x318   : > { %v5598_v31 = vpop.permute.xlu0 %5597  ;;  %v5583_v0 = vpop.permute.xlu1 %5582  ;;  %2569 = vst.msk [vmem:[#allocation3 + $0x139] sm:$0xff] %vm226_vm0, %v2536_v53  ;;  %v8832_v9 = vrot.slane %v8820_v30, 1  ;;  %v2772_v13 = vrot.slane %v8822_v62, 1  ;;  %v4061_v37 = vld [vmem:[#allocation3 + $0x130] sm:$0x3]  ;;  %v8855_v26 = vrot.slane %v8820_v30, 2 }
 0x319   : > { %v5585_v25 = vunpack.i.h.bf16 %v5583_v0  ;;  %v5584_v52 = vunpack.i.l.bf16 %v5583_v0  ;;  %v5599_v34 = vunpack.i.l.bf16 %v5598_v31  ;;  %v5600_v59 = vunpack.i.h.bf16 %v5598_v31  ;;  %v3355_v60 = vld [vmem:[#allocation3 + $0x130] sm:$0x3] }
 0x31a   : > { %v8845_v63 = vsel %vm480_vm3, %v2769_v12, %v8832_v9  ;;  %v2773_v8 = vsel %vm480_vm3, %v8832_v9, %v2772_v13  ;;  %v4354_v44 = vrot.slane %v4061_v37, 2  ;;  %v4178_v45 = vrot.slane %v4061_v37, 1 }
 0x31b   : > { %v3070_v7 = vsel %vm226_vm0, %v8837_v11, %v5585_v25  ;;  %v3069_v17 = vsel %vm226_vm0, %v6052_v19, %v5584_v52  ;;  %v2462_v2 = vpop.f32.mrf.mxu2  ;;  %v5826_v58 = vpack.i.bf16 %v2773_v8, %v8845_v63  ;;  %v4481_v53 = vsel %vm226_vm0, %v6052_v19, %v5599_v34 }
 0x31c   : > { %v3101_v6 = vsel %vm866_vm5, %v3069_v17, %v5589_v61  ;;  %v3102_v10 = vsel %vm866_vm5, %v3070_v7, %v5590_v5  ;;  %v2505_v41 = vadd.f32 %v2462_v2, %v1796_v29  ;;  %v5595_v29 = vunpack.i.h.bf16 %v8700_v46 }
 0x31d   : > { %v3129_v32 = vpack.c.bf16 %v3102_v10, %v3101_v6  ;;  %5817 = vrot.lane.b32.xlu2 %v5816_v28, %s6082_s25  ;;  %v2944_v31 = vsel %vm657_vm4, %v8762_v36, %v2943_v33  ;;  %v3774_v0 = vsel %vm226_vm0, %v6052_v19, %v5609_v16  ;;  %v8871_v57 = vsel %vm657_vm4, %v4351_v3, %v8855_v26 }
 0x31e   : > { %5812 = vrot.lane.b32.xlu1 %v5811_v27, %s6081_s20  ;;  %v2537_v15 = vmax.f32 %v2505_v41, 0.0  ;;  %v4355_v46 = vsel %vm657_vm4, %v8855_v26, %v4354_v44  ;;  %v4482_v36 = vsel %vm226_vm0, %v8837_v11, %v5600_v59  ;;  %v4179_v16 = vsel %vm480_vm3, %v8832_v9, %v4178_v45  ;;  %v8893_v10 = vpop.f32.mrf.mxu3  ;;  %v6054_v44 = vld [vmem:[#allocation3 + $0x78] sm:$0xff] }
 0x31f   : > { %5827 = vrot.lane.b32.xlu0 %v5826_v58, %s6081_s20  ;;  %4937 = vmatmul.msk.bf16.gmra.mxu3 %vm922_vm6, %v3129_v32  ;;  %v8867_v25 = vpop.permute.xlu2 %5657  ;;  %v5614_v33 = vunpack.i.l.bf16 %v8780_v40  ;;  %v4513_v12 = vsel %vm866_vm5, %v4481_v53, %v5595_v29  ;;  %v5821_v24 = vpack.i.bf16 %v2944_v31, %v8787_v20  ;;  %v5836_v19 = vpack.i.bf16 %v4355_v46, %v8871_v57  ;;  %v8898_v28 = vld [vmem:[#allocation3 + $0x138] sm:$0xff] }
 0x320   : > { %v5603_v5 = vpop.permute.xlu1 %5602  ;;  %v5618_v61 = vpop.permute.xlu0 %5617  ;;  %2570 = vst.msk [vmem:[#allocation3 + $0x141] sm:$0xff] %vm226_vm0, %v2537_v15  ;;  %v3650_v17 = vrot.slane %v3355_v60, 2  ;;  %v3474_v27 = vrot.slane %v3355_v60, 1  ;;  %v5831_v6 = vpack.i.bf16 %v4179_v16, %v8845_v63  ;;  %v1090_v40 = vadd.f32 %v8580_v50, %v8123_v55  ;;  %v8900_v55 = vld [vmem:[#allocation3 + $0x80] sm:$0xff] }
 0x321   : > { %v5604_v4 = vunpack.i.l.bf16 %v5603_v5  ;;  %v5605_v52 = vunpack.i.h.bf16 %v5603_v5  ;;  %v5620_v37 = vunpack.i.h.bf16 %v5618_v61  ;;  %v5619_v2 = vunpack.i.l.bf16 %v5618_v61 }
 0x322   : > { %v5610_v41 = vunpack.i.h.bf16 %v8740_v43  ;;  %v1798_v32 = vadd.f32 %v1758_v56, %v1090_v40  ;;  %v3072_v59 = vsel %vm226_vm0, %v8900_v55, %v5615_v1  ;;  %v3071_v45 = vsel %vm226_vm0, %v6054_v44, %v5614_v33 }
 0x323   : > { %v4514_v13 = vsel %vm866_vm5, %v4482_v36, %v5604_v4  ;;  %v2465_v34 = vpop.f32.mrf.mxu2  ;;  %v8891_v20 = vsel %vm866_vm5, %v3774_v0, %v5605_v52  ;;  %v3651_v43 = vsel %vm657_vm4, %v8855_v26, %v3650_v17  ;;  %v3103_v53 = vsel %vm866_vm5, %v3071_v45, %v5619_v2 }
 0x324   : > { %v4543_v7 = vpack.c.bf16 %v4514_v13, %v4513_v12  ;;  %v2506_v8 = vadd.f32 %v2465_v34, %v1797_v23  ;;  %v3104_v56 = vsel %vm866_vm5, %v3072_v59, %v5620_v37  ;;  %v3475_v31 = vsel %vm480_vm3, %v8832_v9, %v3474_v27 }
 0x325   : > { %5822 = vrot.lane.b32.xlu2 %v5821_v24, %s6082_s25  ;;  %v4180_v4 = vrot.slane %v8898_v28, 1  ;;  %v3775_v1 = vsel %vm226_vm0, %v8837_v11, %v5610_v41  ;;  %v5846_v52 = vpack.i.bf16 %v3651_v43, %v8871_v57  ;;  %v2948_v16 = vrot.slane %v8822_v62, 2 }
 0x326   : > { %4979 = vmatmul.msk.bf16.gmra.mxu1 %vm922_vm6, %v4543_v7  ;;  %5837 = vrot.lane.b32.xlu1 %v5836_v19, %s6082_s25  ;;  %v2538_v58 = vmax.f32 %v2506_v8, 0.0  ;;  %v3130_v12 = vpack.c.bf16 %v3104_v56, %v3103_v53  ;;  %v5841_v9 = vpack.i.bf16 %v3475_v31, %v8845_v63  ;;  %v5634_v2 = vunpack.i.l.bf16 %v8828_v14 }
 0x327   : > { %5832 = vrot.lane.b32.xlu0 %v5831_v6, %s6081_s20  ;;  %v8907_v23 = vld [vmem:[#allocation3 + $0x140] sm:$0xff]  ;;  %v4064_v29 = vld [vmem:[#allocation3 + $0x148] sm:$0x3]  ;;  %v8912_v61 = vpop.permute.xlu2 %5677  ;;  %v1091_v45 = vadd.f32 %v8580_v50, %v8131_v22 }
 0x328   : > { %v5628_v15 = vpop.permute.xlu1 %5627  ;;  %v5623_v3 = vpop.permute.xlu0 %5622  ;;  %2571 = vst.msk [vmem:[#allocation3 + $0x151] sm:$0xff] %vm226_vm0, %v2538_v58  ;;  %v8918_v46 = vrot.slane %v8907_v23, 1  ;;  %v4183_v60 = vrot.slane %v4064_v29, 1  ;;  %v8924_v33 = vld [vmem:[#allocation3 + $0x148] sm:$0x3]  ;;  %v8939_v63 = vrot.slane %v8907_v23, 2  ;;  %v2949_v58 = vsel %vm657_vm4, %v8855_v26, %v2948_v16 }
 0x329   : > { %v5630_v5 = vunpack.i.h.bf16 %v5628_v15  ;;  %v5629_v0 = vunpack.i.l.bf16 %v5628_v15  ;;  %v5624_v36 = vunpack.i.l.bf16 %v5623_v3  ;;  %v5625_v7 = vunpack.i.h.bf16 %v5623_v3  ;;  %v1763_v15 = vpop.f32.mrf.mxu3  ;;  %v8963_v56 = vld [vmem:[#allocation3 + $0x148] sm:$0x3] }
 0x32a   : > { %v8929_v24 = vsel %vm480_vm3, %v4180_v4, %v8918_v46  ;;  %v4184_v34 = vsel %vm480_vm3, %v8918_v46, %v4183_v60  ;;  %v4359_v27 = vrot.slane %v4064_v29, 2  ;;  %v3479_v37 = vrot.slane %v8924_v33, 1 }
 0x32b   : > { %v2467_v13 = vpop.f32.mrf.mxu2  ;;  %v4484_v11 = vsel %vm226_vm0, %v8900_v55, %v5630_v5  ;;  %v5861_v62 = vpack.i.bf16 %v4184_v34, %v8929_v24  ;;  %v4483_v17 = vsel %vm226_vm0, %v6054_v44, %v5629_v0  ;;  %v8946_v6 = vsel %vm866_vm5, %v3775_v1, %v5624_v36 }
 0x32c   : > { %v2507_v19 = vadd.f32 %v2467_v13, %v1798_v32  ;;  %v4356_v32 = vrot.slane %v8898_v28, 2  ;;  %v3835_v59 = vpack.c.bf16 %v8946_v6, %v8891_v20  ;;  %v4515_v29 = vsel %vm866_vm5, %v4483_v17, %v5625_v7 }
 0x32d   : > { %5862 = vrot.lane.b32.xlu2 %v5861_v62, %s6081_s20  ;;  %v4516_v53 = vsel %vm866_vm5, %v4484_v11, %v5634_v2  ;;  %v5635_v26 = vunpack.i.h.bf16 %v8828_v14  ;;  %v4360_v22 = vsel %vm657_vm4, %v8939_v63, %v4359_v27  ;;  %v3480_v31 = vsel %vm480_vm3, %v8918_v46, %v3479_v37 }
 0x32e   : > { %5847 = vrot.lane.b32.xlu1 %v5846_v52, %s6082_s25  ;;  %v2539_v8 = vmax.f32 %v2507_v19, 0.0  ;;  %v8968_v5 = vsel %vm657_vm4, %v4356_v32, %v8939_v63  ;;  %v1799_v0 = vadd.f32 %v8893_v10, %v1091_v45  ;;  %v5851_v60 = vpack.i.bf16 %v2949_v58, %v8871_v57 }
 0x32f   : > { %5842 = vrot.lane.b32.xlu0 %v5841_v9, %s6081_s20  ;;  %4938 = vmatmul.msk.bf16.gmra.mxu3 %vm922_vm6, %v3130_v12  ;;  %v8959_v43 = vpop.permute.xlu2 %5682  ;;  %v4544_v36 = vpack.c.bf16 %v4516_v53, %v4515_v29  ;;  %v2777_v52 = vrot.slane %v8963_v56, 1  ;;  %v3655_v16 = vrot.slane %v8924_v33, 2  ;;  %v1092_v12 = vadd.f32 %v8580_v50, %v8134_v54  ;;  %v8994_v54 = vld [vmem:[#allocation3 + $0x150] sm:$0xff] }
 0x330   : > { %v5638_v40 = vpop.permute.xlu0 %5637  ;;  %v8949_v41 = vpop.permute.xlu1 %5647  ;;  %2572 = vst.msk [vmem:[#allocation3 + $0x159] sm:$0xff] %vm226_vm0, %v2539_v8  ;;  %v5866_v9 = vpack.i.bf16 %v4360_v22, %v8968_v5  ;;  %v5871_v10 = vpack.i.bf16 %v3480_v31, %v8929_v24  ;;  %v1093_v57 = vadd.f32 %v8580_v50, %v8150_v42  ;;  %v5660_v11 = vunpack.i.h.bf16 %v8867_v25  ;;  %v6056_v22 = vld [vmem:[#allocation3 + $0x90] sm:$0xff] }
 0x331   : > { %v5639_v3 = vunpack.i.l.bf16 %v5638_v40  ;;  %v1800_v34 = vadd.f32 %v1763_v15, %v1092_v12  ;;  %v5659_v33 = vunpack.i.l.bf16 %v8867_v25  ;;  %v5650_v19 = vunpack.i.h.bf16 %v8949_v41  ;;  %v1766_v53 = vpop.f32.mrf.mxu3 }
 0x332   : > { %v2778_v17 = vsel %vm480_vm3, %v8918_v46, %v2777_v52  ;;  %v3656_v27 = vsel %vm657_vm4, %v8939_v63, %v3655_v16  ;;  %v2953_v2 = vrot.slane %v8963_v56, 2  ;;  %v5649_v8 = vunpack.i.l.bf16 %v8949_v41  ;;  %v6055_v56 = vld [vmem:[#allocation3 + $0x98] sm:$0xff] }
 0x333   : > { %v3776_v4 = vsel %vm226_vm0, %v6054_v44, %v5639_v3  ;;  %v2470_v1 = vpop.f32.mrf.mxu2  ;;  %v5640_v44 = vunpack.i.h.bf16 %v5638_v40  ;;  %v2779_v15 = vrot.slane %v8994_v54, 1 }
 0x334   : > { %v8978_v14 = vsel %vm866_vm5, %v3776_v4, %v5635_v26  ;;  %v2508_v13 = vadd.f32 %v2470_v1, %v1799_v0  ;;  %v5856_v0 = vpack.i.bf16 %v2778_v17, %v8929_v24 }
 0x335   : > { %5872 = vrot.lane.b32.xlu2 %v5871_v10, %s6081_s20  ;;  %v3777_v46 = vsel %vm226_vm0, %v8900_v55, %v5640_v44 }
 0x336   : > { %4980 = vmatmul.msk.bf16.gmra.mxu1 %vm922_vm6, %v4544_v36  ;;  %5852 = vrot.lane.b32.xlu1 %v5851_v60, %s6082_s25  ;;  %v2540_v7 = vmax.f32 %v2508_v13, 0.0  ;;  %v5876_v36 = vpack.i.bf16 %v3656_v27, %v8968_v5 }
 0x337   : > { %5867 = vrot.lane.b32.xlu0 %v5866_v9, %s6082_s25  ;;  %v9001_v37 = vld [vmem:[#allocation3 + $0x158] sm:$0xff]  ;;  %v9003_v25 = vld [vmem:[#allocation3 + $0x160] sm:$0x3]  ;;  %v9008_v45 = vpop.permute.xlu2 %5697 }
 0x338   : > { %v5653_v42 = vpop.permute.xlu1 %5652  ;;  %v5643_v62 = vpop.permute.xlu0 %5642  ;;  %2573 = vst.msk [vmem:[#allocation3 + $0x169] sm:$0xff] %vm226_vm0, %v2540_v7  ;;  %v9014_v3 = vrot.slane %v9001_v37, 1  ;;  %v2782_v29 = vrot.slane %v9003_v25, 1  ;;  %v4067_v55 = vld [vmem:[#allocation3 + $0x160] sm:$0x3]  ;;  %v9037_v7 = vrot.slane %v9001_v37, 2 }
 0x339   : > { %v5654_v40 = vunpack.i.l.bf16 %v5653_v42  ;;  %v5645_v58 = vunpack.i.h.bf16 %v5643_v62  ;;  %v5644_v32 = vunpack.i.l.bf16 %v5643_v62  ;;  %v5655_v4 = vunpack.i.h.bf16 %v5653_v42  ;;  %v3361_v27 = vld [vmem:[#allocation3 + $0x160] sm:$0x3] }
 0x33a   : > { %v9028_v52 = vsel %vm480_vm3, %v2779_v15, %v9014_v3  ;;  %v2783_v12 = vsel %vm480_vm3, %v9014_v3, %v2782_v29  ;;  %v4188_v44 = vrot.slane %v4067_v55, 1  ;;  %v1801_v42 = vadd.f32 %v1766_v53, %v1093_v57 }
 0x33b   : > { %v9018_v41 = vsel %vm866_vm5, %v3777_v46, %v5654_v40  ;;  %v3074_v26 = vsel %vm226_vm0, %v6055_v56, %v5645_v58  ;;  %v3073_v31 = vsel %vm226_vm0, %v6056_v22, %v5644_v32  ;;  %v2472_v1 = vpop.f32.mrf.mxu2  ;;  %v5881_v9 = vpack.i.bf16 %v2783_v12, %v9028_v52 }
 0x33c   : > { %v3836_v60 = vpack.c.bf16 %v9018_v41, %v8978_v14  ;;  %v2509_v16 = vadd.f32 %v2472_v1, %v1800_v34  ;;  %v3105_v13 = vsel %vm866_vm5, %v3073_v31, %v5649_v8  ;;  %v3106_v24 = vsel %vm866_vm5, %v3074_v26, %v5650_v19 }
 0x33d   : > { %v3131_v10 = vpack.c.bf16 %v3106_v24, %v3105_v13  ;;  %v4486_v62 = vsel %vm226_vm0, %v6055_v56, %v5660_v11  ;;  %v4364_v17 = vrot.slane %v4067_v55, 2  ;;  %v4485_v8 = vsel %vm226_vm0, %v6056_v22, %v5659_v33  ;;  %5882 = vrot.lane.b32.xlu2 %v5881_v9, %s6081_s20  ;;  %v1768_v24 = vpop.f32.mrf.mxu3 }
 0x33e   : > { %5857 = vrot.lane.b32.xlu1 %v5856_v0, %s6081_s20  ;;  %v2541_v34 = vmax.f32 %v2509_v16, 0.0  ;;  %v5684_v19 = vunpack.i.l.bf16 %v8959_v43  ;;  %v4189_v57 = vsel %vm480_vm3, %v9014_v3, %v4188_v44  ;;  %v4361_v11 = vrot.slane %v8994_v54, 2 }
 0x33f   : > { %5877 = vrot.lane.b32.xlu0 %v5876_v36, %s6082_s25  ;;  %4939 = vmatmul.msk.bf16.gmra.mxu3 %vm922_vm6, %v3131_v10  ;;  %v9049_v33 = vpop.permute.xlu2 %5702  ;;  %v4517_v53 = vsel %vm866_vm5, %v4485_v8, %v5655_v4  ;;  %v2954_v26 = vsel %vm657_vm4, %v8939_v63, %v2953_v2  ;;  %v3484_v0 = vrot.slane %v3361_v27, 1  ;;  %v4365_v16 = vsel %vm657_vm4, %v9037_v7, %v4364_v17  ;;  %v9079_v17 = vld [vmem:[#allocation3 + $0x168] sm:$0xff] }
 0x340   : > { %v5668_v40 = vpop.permute.xlu1 %5667  ;;  %v5663_v58 = vpop.permute.xlu0 %5662  ;;  %2574 = vst.msk [vmem:[#allocation3 + $0x171] sm:$0xff] %vm226_vm0, %v2541_v34  ;;  %v9056_v31 = vsel %vm657_vm4, %v4361_v11, %v9037_v7  ;;  %v5886_v13 = vpack.i.bf16 %v4189_v57, %v9028_v52  ;;  %v5896_v9 = vpack.i.bf16 %v2954_v26, %v8968_v5  ;;  %v1094_v10 = vadd.f32 %v8580_v50, %v8159_v47 }
 0x341   : > { %v5670_v32 = vunpack.i.h.bf16 %v5668_v40  ;;  %v5669_v46 = vunpack.i.l.bf16 %v5668_v40  ;;  %v5665_v15 = vunpack.i.h.bf16 %v5663_v58  ;;  %v5664_v29 = vunpack.i.l.bf16 %v5663_v58 }
 0x342   : > { %v5891_v44 = vpack.i.bf16 %v4365_v16, %v9056_v31  ;;  %v1802_v8 = vadd.f32 %v1768_v24, %v1094_v10  ;;  %v3485_v47 = vsel %vm480_vm3, %v9014_v3, %v3484_v0  ;;  %v5699_v58 = vunpack.i.l.bf16 %v9008_v45  ;;  %v6058_v0 = vld [vmem:[#allocation3 + $0xa8] sm:$0xff] }
 0x343   : > { %v3779_v55 = vsel %vm226_vm0, %v6055_v56, %v5670_v32  ;;  %v3778_v1 = vsel %vm226_vm0, %v6056_v22, %v5669_v46  ;;  %v4518_v36 = vsel %vm866_vm5, %v4486_v62, %v5664_v29  ;;  %v2475_v2 = vpop.f32.mrf.mxu2  ;;  %v3660_v62 = vrot.slane %v3361_v27, 2 }
 0x344   : > { %v9064_v12 = vsel %vm866_vm5, %v3778_v1, %v5665_v15  ;;  %v9067_v4 = vsel %vm866_vm5, %v3779_v55, %v5684_v19  ;;  %v4545_v63 = vpack.c.bf16 %v4518_v36, %v4517_v53  ;;  %v2510_v22 = vadd.f32 %v2475_v2, %v1801_v42 }
 0x345   : > { %v3837_v56 = vpack.c.bf16 %v9067_v4, %v9064_v12  ;;  %v5680_v42 = vunpack.i.h.bf16 %v8912_v61  ;;  %5892 = vrot.lane.b32.xlu2 %v5891_v44, %s6082_s25  ;;  %v5679_v27 = vunpack.i.l.bf16 %v8912_v61  ;;  %v2784_v46 = vrot.slane %v9079_v17, 1  ;;  %v6057_v61 = vld [vmem:[#allocation3 + $0xb0] sm:$0xff] }
 0x346   : > { %4981 = vmatmul.msk.bf16.gmra.mxu1 %vm922_vm6, %v4545_v63  ;;  %5887 = vrot.lane.b32.xlu1 %v5886_v13, %s6081_s20  ;;  %v2542_v34 = vmax.f32 %v2510_v22, 0.0  ;;  %v3661_v29 = vsel %vm657_vm4, %v9037_v7, %v3660_v62  ;;  %v5901_v1 = vpack.i.bf16 %v3485_v47, %v9028_v52 }
 0x347   : > { %5897 = vrot.lane.b32.xlu0 %v5896_v9, %s6082_s25  ;;  %v9085_v50 = vld [vmem:[#allocation3 + $0x170] sm:$0xff]  ;;  %v9087_v40 = vld [vmem:[#allocation3 + $0x178] sm:$0x3]  ;;  %v9092_v32 = vpop.permute.xlu2 %5722  ;;  %v5906_v10 = vpack.i.bf16 %v3661_v29, %v9056_v31 }
 0x348   : > { %v5688_v5 = vpop.permute.xlu0 %5687  ;;  %v5673_v19 = vpop.permute.xlu1 %5672  ;;  %2575 = vst.msk [vmem:[#allocation3 + $0x181] sm:$0xff] %vm226_vm0, %v2542_v34  ;;  %v9096_v15 = vrot.slane %v9085_v50, 1  ;;  %v2787_v3 = vrot.slane %v9087_v40, 1  ;;  %v4070_v36 = vld [vmem:[#allocation3 + $0x178] sm:$0x3]  ;;  %v9116_v62 = vrot.slane %v9085_v50, 2 }
 0x349   : > { %v5675_v57 = vunpack.i.h.bf16 %v5673_v19  ;;  %v5674_v11 = vunpack.i.l.bf16 %v5673_v19  ;;  %v5689_v53 = vunpack.i.l.bf16 %v5688_v5  ;;  %v5690_v52 = vunpack.i.h.bf16 %v5688_v5 }
 0x34a   : > { %v9106_v63 = vsel %vm480_vm3, %v2784_v46, %v9096_v15  ;;  %v2788_v2 = vsel %vm480_vm3, %v9096_v15, %v2787_v3  ;;  %v4369_v34 = vrot.slane %v4070_v36, 2  ;;  %v4193_v19 = vrot.slane %v4070_v36, 1  ;;  %v3364_v36 = vld [vmem:[#allocation3 + $0x178] sm:$0x3] }
 0x34b   : > { %v3076_v26 = vsel %vm226_vm0, %v6057_v61, %v5675_v57  ;;  %v3075_v55 = vsel %vm226_vm0, %v6058_v0, %v5674_v11  ;;  %v2477_v16 = vpop.f32.mrf.mxu2  ;;  %v5911_v9 = vpack.i.bf16 %v2788_v2, %v9106_v63  ;;  %v4487_v57 = vsel %vm226_vm0, %v6058_v0, %v5689_v53 }
 0x34c   : > { %v3107_v13 = vsel %vm866_vm5, %v3075_v55, %v5679_v27  ;;  %v3108_v24 = vsel %vm866_vm5, %v3076_v26, %v5680_v42  ;;  %v2511_v22 = vadd.f32 %v2477_v16, %v1802_v8  ;;  %v4366_v27 = vrot.slane %v9079_v17, 2 }
 0x34d   : > { %v3132_v44 = vpack.c.bf16 %v3108_v24, %v3107_v13  ;;  %v2958_v8 = vrot.slane %v9003_v25, 2  ;;  %v5685_v42 = vunpack.i.h.bf16 %v8959_v43  ;;  %5907 = vrot.lane.b32.xlu2 %v5906_v10, %s6082_s25  ;;  %v4370_v43 = vsel %vm657_vm4, %v9116_v62, %v4369_v34 }
 0x34e   : > { %5902 = vrot.lane.b32.xlu1 %v5901_v1, %s6081_s20  ;;  %v2543_v47 = vmax.f32 %v2511_v22, 0.0  ;;  %v9130_v26 = vsel %vm657_vm4, %v4366_v27, %v9116_v62  ;;  %v5700_v25 = vunpack.i.h.bf16 %v9008_v45  ;;  %v3780_v53 = vsel %vm226_vm0, %v6058_v0, %v5699_v58 }
 0x34f   : > { %5912 = vrot.lane.b32.xlu0 %v5911_v9, %s6081_s20  ;;  %4940 = vmatmul.msk.bf16.gmra.mxu3 %vm922_vm6, %v3132_v44  ;;  %v9126_v29 = vpop.permute.xlu2 %5747  ;;  %v4488_v55 = vsel %vm226_vm0, %v6057_v61, %v5690_v52  ;;  %v4194_v1 = vsel %vm480_vm3, %v9096_v15, %v4193_v19  ;;  %v4519_v16 = vsel %vm866_vm5, %v4487_v57, %v5685_v42  ;;  %v5705_v45 = vunpack.i.h.bf16 %v9049_v33 }
 0x350   : > { %v5693_v5 = vpop.permute.xlu1 %5692  ;;  %v5708_v11 = vpop.permute.xlu0 %5707  ;;  %2576 = vst.msk [vmem:[#allocation3 + $0x189] sm:$0xff] %vm226_vm0, %v2543_v47  ;;  %v2959_v24 = vsel %vm657_vm4, %v9037_v7, %v2958_v8  ;;  %v5704_v58 = vunpack.i.l.bf16 %v9049_v33  ;;  %v5921_v22 = vpack.i.bf16 %v4370_v43, %v9130_v26  ;;  %v5916_v44 = vpack.i.bf16 %v4194_v1, %v9106_v63  ;;  %v9154_v7 = vld [vmem:[#allocation3 + $0x180] sm:$0xff]  ;;  %v9157_v47 = vld [vmem:[#allocation3 + $0xc8] sm:$0xff] }
 0x351   : > { %v5695_v46 = vunpack.i.h.bf16 %v5693_v5  ;;  %v5694_v3 = vunpack.i.l.bf16 %v5693_v5  ;;  %v5710_v9 = vunpack.i.h.bf16 %v5708_v11  ;;  %v5709_v10 = vunpack.i.l.bf16 %v5708_v11  ;;  %v6060_v8 = vld [vmem:[#allocation3 + $0xc0] sm:$0xff] }
 0x352   : > { %v3665_v52 = vrot.slane %v3364_v36, 2  ;;  %v5926_v34 = vpack.i.bf16 %v2959_v24, %v9056_v31  ;;  %v3489_v19 = vrot.slane %v3364_v36, 1  ;;  %v3781_v33 = vsel %vm226_vm0, %v6057_v61, %v5700_v25 }
 0x353   : > { %v9141_v2 = vsel %vm866_vm5, %v3780_v53, %v5695_v46  ;;  %v4520_v13 = vsel %vm866_vm5, %v4488_v55, %v5694_v3  ;;  %v3078_v27 = vsel %vm226_vm0, %v9157_v47, %v5705_v45  ;;  %v3077_v42 = vsel %vm226_vm0, %v6060_v8, %v5704_v58 }
 0x354   : > { %v4546_v0 = vpack.c.bf16 %v4520_v13, %v4519_v16  ;;  %v3109_v46 = vsel %vm866_vm5, %v3077_v42, %v5709_v10  ;;  %v3110_v3 = vsel %vm866_vm5, %v3078_v27, %v5710_v9  ;;  %v3666_v43 = vsel %vm657_vm4, %v9116_v62, %v3665_v52 }
 0x355   : > { %5927 = vrot.lane.b32.xlu2 %v5926_v34, %s6082_s25  ;;  %v3490_v25 = vsel %vm480_vm3, %v9096_v15, %v3489_v19  ;;  %v4195_v53 = vrot.slane %v9154_v7, 1  ;;  %v5519_v45 = vunpack.i.l.bf16 %v8537_v35  ;;  %v3133_v9 = vpack.c.bf16 %v3110_v3, %v3109_v46 }
 0x356   : > { %4982 = vmatmul.msk.bf16.gmra.mxu1 %vm922_vm6, %v4546_v0  ;;  %5922 = vrot.lane.b32.xlu1 %v5921_v22, %s6082_s25  ;;  %v5936_v0 = vpack.i.bf16 %v3666_v43, %v9130_v26  ;;  %v5931_v10 = vpack.i.bf16 %v3490_v25, %v9106_v63  ;;  %v2963_v52 = vrot.slane %v9087_v40, 2  ;;  %v5724_v63 = vunpack.i.l.bf16 %v9092_v32 }
 0x357   : > { %5917 = vrot.lane.b32.xlu0 %v5916_v44, %s6081_s20  ;;  %v9163_v31 = vld [vmem:[#allocation3 + $0x188] sm:$0xff]  ;;  %v4073_v11 = vld [vmem:[#allocation3 + $0x190] sm:$0x3]  ;;  %v9176_v24 = vpop.permute.xlu2 %5767  ;;  %v4371_v46 = vrot.slane %v9154_v7, 2 }
 0x358   : > { %v5718_v57 = vpop.permute.xlu1 %5717  ;;  %v5713_v5 = vpop.permute.xlu0 %5712  ;;  %v4196_v55 = vrot.slane %v9163_v31, 1  ;;  %v4198_v1 = vrot.slane %v4073_v11, 1  ;;  %v3367_v22 = vld [vmem:[#allocation3 + $0x190] sm:$0x3]  ;;  %v4372_v35 = vrot.slane %v9163_v31, 2  ;;  %v2964_v25 = vsel %vm657_vm4, %v9116_v62, %v2963_v52 }
 0x359   : > { %v5714_v61 = vunpack.i.l.bf16 %v5713_v5  ;;  %v5720_v36 = vunpack.i.h.bf16 %v5718_v57  ;;  %v5719_v16 = vunpack.i.l.bf16 %v5718_v57  ;;  %v5715_v34 = vunpack.i.h.bf16 %v5713_v5 }
 0x35a   : > { %v4197_v15 = vsel %vm480_vm3, %v4195_v53, %v4196_v55  ;;  %v4199_v44 = vsel %vm480_vm3, %v4196_v55, %v4198_v1  ;;  %v3494_v57 = vrot.slane %v3367_v22, 1  ;;  %v5951_v62 = vpack.i.bf16 %v2964_v25, %v9130_v26 }
 0x35b   : > { %v9174_v13 = vsel %vm866_vm5, %v3781_v33, %v5714_v61  ;;  %v5941_v19 = vpack.i.bf16 %v4199_v44, %v4197_v15  ;;  %v4374_v33 = vrot.slane %v4073_v11, 2  ;;  %v4490_v27 = vsel %vm226_vm0, %v9157_v47, %v5720_v36  ;;  %v6061_v11 = vld [vmem:[#allocation3 + $0x18] sm:$0xff] }
 0x35c   : > { %v3838_v58 = vpack.c.bf16 %v9174_v13, %v9141_v2  ;;  %v4489_v42 = vsel %vm226_vm0, %v6060_v8, %v5719_v16  ;;  %v3768_v3 = vsel %vm226_vm0, %v6061_v11, %v5519_v45  ;;  %v4522_v1 = vsel %vm866_vm5, %v4490_v27, %v5724_v63 }
 0x35d   : > { %5942 = vrot.lane.b32.xlu2 %v5941_v19, %s6081_s20  ;;  %v4521_v53 = vsel %vm866_vm5, %v4489_v42, %v5715_v34  ;;  %v4373_v36 = vsel %vm657_vm4, %v4371_v46, %v4372_v35  ;;  %v4375_v16 = vsel %vm657_vm4, %v4372_v35, %v4374_v33  ;;  %v5749_v46 = vunpack.i.l.bf16 %v9126_v29 }
 0x35e   : > { %5937 = vrot.lane.b32.xlu1 %v5936_v0, %s6082_s25  ;;  %v5725_v0 = vunpack.i.h.bf16 %v9092_v32  ;;  %v4547_v52 = vpack.c.bf16 %v4522_v1, %v4521_v53  ;;  %v5946_v19 = vpack.i.bf16 %v4375_v16, %v4373_v36  ;;  %v5769_v25 = vunpack.i.l.bf16 %v9176_v24  ;;  %v6062_v16 = vld [vmem:[#allocation3 + $0xe0] sm:$0xff] }
 0x35f   : > { %5932 = vrot.lane.b32.xlu0 %v5931_v10, %s6081_s20  ;;  %4941 = vmatmul.msk.bf16.gmra.mxu3 %vm922_vm6, %v3133_v9  ;;  %v3495_v10 = vsel %vm480_vm3, %v4196_v55, %v3494_v57  ;;  %v9212_v34 = vpop.permute.xlu2 %5782 }
 0x360   : > { %v9195_v40 = vpop.permute.xlu1 %5737  ;;  %v5728_v5 = vpop.permute.xlu0 %5727  ;;  %v5956_v32 = vpack.i.bf16 %v3495_v10, %v4197_v15 }
 0x361   : > { %v5740_v61 = vunpack.i.h.bf16 %v9195_v40  ;;  %v5729_v43 = vunpack.i.l.bf16 %v5728_v5  ;;  %v5730_v33 = vunpack.i.h.bf16 %v5728_v5  ;;  %v5750_v5 = vunpack.i.h.bf16 %v9126_v29 }
 0x362   : > { %v5739_v51 = vunpack.i.l.bf16 %v9195_v40 }
 0x363   : > { %v3800_v9 = vsel %vm866_vm5, %v3768_v3, %v5740_v61  ;;  %v3782_v45 = vsel %vm226_vm0, %v6060_v8, %v5729_v43  ;;  %v3670_v8 = vrot.slane %v3367_v22, 2  ;;  %v3783_v42 = vsel %vm226_vm0, %v9157_v47, %v5730_v33 }
 0x364   : > { %v3832_v44 = vpack.c.bf16 %v8676_v38, %v3800_v9  ;;  %v9215_v27 = vsel %vm866_vm5, %v3782_v45, %v5725_v0  ;;  %v6063_v0 = vld [vmem:[#allocation3 + $0xd8] sm:$0xff] }
 0x365   : > { %5957 = vrot.lane.b32.xlu2 %v5956_v32, %s6081_s20  ;;  %v3671_v57 = vsel %vm657_vm4, %v4372_v35, %v3670_v8  ;;  %v4491_v9 = vsel %vm226_vm0, %v6063_v0, %v5749_v46 }
 0x366   : > { %4955 = vmatmul.msk.bf16.vlgmr.msrb.gmra.mxu0 %vm922_vm6, %v3832_v44  ;;  %5952 = vrot.lane.b32.xlu1 %v5951_v62, %s6082_s25  ;;  %v5961_v22 = vpack.i.bf16 %v3671_v57, %v4373_v36  ;;  %v4492_v36 = vsel %vm226_vm0, %v6062_v16, %v5750_v5  ;;  %v5785_v57 = vunpack.i.h.bf16 %v9212_v34 }
 0x367   : > { %5947 = vrot.lane.b32.xlu0 %v5946_v19, %s6082_s25  ;;  %4983 = vmatmul.msk.bf16.gmra.mxu1 %vm922_vm6, %v4547_v52  ;;  %v9232_v11 = vpop.permute.xlu2 %5797 }
 0x368   : > { %v5743_v38 = vpop.permute.xlu1 %5742 }
 0x369   : > { %v5744_v26 = vunpack.i.l.bf16 %v5743_v38  ;;  %v5733_v55 = vpop.permute.xlu0 %5732  ;;  %v5745_v3 = vunpack.i.h.bf16 %v5743_v38 }
 0x36a   : > { %v5735_v5 = vunpack.i.h.bf16 %v5733_v55 }
 0x36b   : > { %v9226_v63 = vsel %vm866_vm5, %v3783_v42, %v5744_v26  ;;  %v4523_v10 = vsel %vm866_vm5, %v4491_v9, %v5745_v3  ;;  %v5734_v26 = vunpack.i.l.bf16 %v5733_v55  ;;  %v5770_v3 = vunpack.i.h.bf16 %v9176_v24 }
 0x36c   : > { %v3839_v15 = vpack.c.bf16 %v9226_v63, %v9215_v27  ;;  %v3080_v55 = vsel %vm226_vm0, %v6062_v16, %v5735_v5 }
 0x36d   : > { %v3079_v39 = vsel %vm226_vm0, %v6063_v0, %v5734_v26 }
 0x36f   : > { %5962 = vrot.lane.b32.xlu0 %v5961_v22, %s6082_s25  ;;  %v9255_v8 = vpop.permute.xlu2 %5807  ;;  %v5784_v22 = vunpack.i.l.bf16 %v9212_v34 }
 0x370   : > { %v5758_v61 = vpop.permute.xlu1 %5757  ;;  %v5810_v48 = vunpack.i.h.bf16 %v9255_v8  ;;  %v5809_v21 = vunpack.i.l.bf16 %v9255_v8 }
 0x371   : > { %v5760_v47 = vunpack.i.h.bf16 %v5758_v61  ;;  %v5759_v43 = vunpack.i.l.bf16 %v5758_v61  ;;  %v5753_v35 = vpop.permute.xlu0 %5752 }
 0x372   : > { %v5755_v53 = vunpack.i.h.bf16 %v5753_v35  ;;  %v5754_v1 = vunpack.i.l.bf16 %v5753_v35 }
 0x373   : > { %v3785_v29 = vsel %vm226_vm0, %v6062_v16, %v5760_v47  ;;  %v3784_v45 = vsel %vm226_vm0, %v6063_v0, %v5759_v43  ;;  %v6065_v43 = vld [vmem:[#allocation3 + $0xf8] sm:$0xff]  ;;  %v3111_v0 = vsel %vm866_vm5, %v3079_v39, %v5739_v51 }
 0x374   : > { %v9242_v44 = vsel %vm866_vm5, %v3784_v45, %v5755_v53  ;;  %v9245_v62 = vsel %vm866_vm5, %v3785_v29, %v5769_v25  ;;  %v4524_v52 = vsel %vm866_vm5, %v4492_v36, %v5754_v1  ;;  %v3787_v35 = vsel %vm226_vm0, %v6065_v43, %v5785_v57 }
 0x375   : > { %v3840_v19 = vpack.c.bf16 %v9245_v62, %v9242_v44  ;;  %v4548_v33 = vpack.c.bf16 %v4524_v52, %v4523_v10  ;;  %v10018_v44 = vld [vmem:[#allocation6_spill] sm:$0xff] }
 0x376   : > { %4956 = vmatmul.msk.bf16.gmra.mxu0 %vm922_vm6, %v3833_v49  ;;  %v6064_v49 = vld [vmem:[#allocation3 + $0xf0] sm:$0xff] }
 0x377   : > { %4984 = vmatmul.msk.bf16.gmra.mxu1 %vm922_vm6, %v4548_v33  ;;  %v3786_v25 = vsel %vm226_vm0, %v6064_v49, %v5784_v22  ;;  %v5818_v9 = vpop.permute.xlu2 %5817 }
 0x378   : > { %v5763_v32 = vpop.permute.xlu1 %5762 }
 0x379   : > { %v5773_v38 = vpop.permute.xlu0 %5772 }
 0x37a   : > { %v5774_v42 = vunpack.i.l.bf16 %v5773_v38  ;;  %v5775_v46 = vunpack.i.h.bf16 %v5773_v38 }
 0x37c   : > { %v4493_v61 = vsel %vm226_vm0, %v6064_v49, %v5774_v42  ;;  %v4494_v24 = vsel %vm226_vm0, %v6065_v43, %v5775_v46  ;;  %v5765_v46 = vunpack.i.h.bf16 %v5763_v32 }
 0x37d   : > { %v4525_v45 = vsel %vm866_vm5, %v4493_v61, %v5770_v3  ;;  %v5764_v3 = vunpack.i.l.bf16 %v5763_v32 }
 0x37f   : > { %v5823_v51 = vpop.permute.xlu2 %5822 }
 0x380   : > { %v5778_v47 = vpop.permute.xlu1 %5777 }
 0x381   : > { %v5780_v53 = vunpack.i.h.bf16 %v5778_v47  ;;  %v5779_v1 = vunpack.i.l.bf16 %v5778_v47  ;;  %v5788_v34 = vpop.permute.xlu0 %5787  ;;  %v6066_v47 = vld [vmem:[#allocation3 + $0x110] sm:$0xff] }
 0x382   : > { %v5790_v36 = vunpack.i.h.bf16 %v5788_v34  ;;  %v5789_v40 = vunpack.i.l.bf16 %v5788_v34 }
 0x383   : > { %v3112_v29 = vsel %vm866_vm5, %v3080_v55, %v5780_v53  ;;  %v4526_v10 = vsel %vm866_vm5, %v4494_v24, %v5779_v1  ;;  %v3081_v1 = vsel %vm226_vm0, %v6064_v49, %v5764_v3 }
 0x384   : > { %v3134_v52 = vpack.c.bf16 %v3112_v29, %v3111_v0  ;;  %v4549_v33 = vpack.c.bf16 %v4526_v10, %v4525_v45  ;;  %v9272_v38 = vsel %vm866_vm5, %v3786_v25, %v5789_v40  ;;  %v9275_v16 = vsel %vm866_vm5, %v3787_v35, %v5790_v36  ;;  %v6067_v25 = vld [vmem:[#allocation3 + $0x108] sm:$0xff] }
 0x385   : > { %v3841_v26 = vpack.c.bf16 %v9275_v16, %v9272_v38  ;;  %v5820_v45 = vunpack.i.h.bf16 %v5818_v9  ;;  %v5819_v10 = vunpack.i.l.bf16 %v5818_v9 }
 0x386   : > { %4942 = vmatmul.msk.bf16.gmra.mxu3 %vm922_vm6, %v3134_v52  ;;  %4957 = vmatmul.msk.bf16.gmra.mxu0 %vm922_vm6, %v3834_v18  ;;  %v3082_v18 = vsel %vm226_vm0, %v6065_v43, %v5765_v46 }
 0x387   : > { %4985 = vmatmul.msk.bf16.gmra.mxu1 %vm922_vm6, %v4549_v33 }
 0x388   : > { %v5803_v42 = vpop.permute.xlu1 %5802 }
 0x389   : > { %v5793_v57 = vpop.permute.xlu0 %5792  ;;  %v5805_v22 = vunpack.i.h.bf16 %v5803_v42  ;;  %v5804_v5 = vunpack.i.l.bf16 %v5803_v42 }
 0x38a   : > { %v5795_v39 = vunpack.i.h.bf16 %v5793_v57  ;;  %v5794_v61 = vunpack.i.l.bf16 %v5793_v57  ;;  %v5863_v57 = vpop.permute.xlu2 %5862 }
 0x38b   : > { %v4496_v35 = vsel %vm226_vm0, %v6066_v47, %v5805_v22  ;;  %v4495_v53 = vsel %vm226_vm0, %v6067_v25, %v5804_v5 }
 0x38c   : > { %v3114_v32 = vsel %vm866_vm5, %v3082_v18, %v5795_v39  ;;  %v3113_v55 = vsel %vm866_vm5, %v3081_v1, %v5794_v61  ;;  %v4527_v0 = vsel %vm866_vm5, %v4495_v53, %v5809_v21  ;;  %v4528_v29 = vsel %vm866_vm5, %v4496_v35, %v5810_v48 }
 0x38d   : > { %v3135_v49 = vpack.c.bf16 %v3114_v32, %v3113_v55  ;;  %v4550_v52 = vpack.c.bf16 %v4528_v29, %v4527_v0  ;;  %v5800_v39 = vunpack.i.h.bf16 %v9232_v11  ;;  %v5799_v61 = vunpack.i.l.bf16 %v9232_v11 }
 0x38e   : > { %v5825_v35 = vunpack.i.h.bf16 %v5823_v51  ;;  %v5824_v53 = vunpack.i.l.bf16 %v5823_v51 }
 0x38f   : > { %v3084_v18 = vsel %vm226_vm0, %v6066_v47, %v5800_v39  ;;  %v3083_v1 = vsel %vm226_vm0, %v6067_v25, %v5799_v61  ;;  %v9342_v39 = vpop.f32.mrf.mxu1 }
 0x390   : > { %v5813_v34 = vpop.permute.xlu1 %5812  ;;  %v3115_v32 = vsel %vm866_vm5, %v3083_v1, %v5824_v53  ;;  %v3116_v55 = vsel %vm866_vm5, %v3084_v18, %v5825_v35 }
 0x391   : > { %v5815_v24 = vunpack.i.h.bf16 %v5813_v34  ;;  %v5814_v36 = vunpack.i.l.bf16 %v5813_v34  ;;  %v9293_v40 = vpop.permute.xlu0 %5827 }
 0x392   : > { %v5873_v11 = vpop.permute.xlu2 %5872  ;;  %v5830_v35 = vunpack.i.h.bf16 %v9293_v40  ;;  %v5829_v53 = vunpack.i.l.bf16 %v9293_v40 }
 0x393   : > { %v3789_v8 = vsel %vm226_vm0, %v6066_v47, %v5815_v24  ;;  %v3788_v43 = vsel %vm226_vm0, %v6067_v25, %v5814_v36  ;;  %v3136_v47 = vpack.c.bf16 %v3116_v55, %v3115_v32  ;;  %v5875_v18 = vunpack.i.h.bf16 %v5873_v11 }
 0x394   : > { %v9300_v33 = vsel %vm866_vm5, %v3788_v43, %v5819_v10  ;;  %v9303_v42 = vsel %vm866_vm5, %v3789_v8, %v5820_v45  ;;  %v9324_v10 = vpop.f32.mrf.mxu3  ;;  %v6069_v8 = vld [vmem:[#allocation3 + $0x128] sm:$0xff]  ;;  %v5874_v1 = vunpack.i.l.bf16 %v5873_v11 }
 0x395   : > { %v3842_v9 = vpack.c.bf16 %v9303_v42, %v9300_v33 }
 0x396   : > { %4943 = vmatmul.msk.bf16.gmra.mxu3 %vm922_vm6, %v3135_v49  ;;  %4958 = vmatmul.msk.bf16.gmra.mxu0 %vm922_vm6, %v3835_v59  ;;  %v6068_v59 = vld [vmem:[#allocation3 + $0x120] sm:$0xff] }
 0x397   : > { %4986 = vmatmul.msk.bf16.gmra.mxu1 %vm922_vm6, %v4550_v52  ;;  %v3085_v32 = vsel %vm226_vm0, %v6068_v59, %v5829_v53  ;;  %v9384_v53 = vld [vmem:[#allocation3 + $0x1a8] sm:$0x3] }
 0x398   : > { %v5838_v22 = vpop.permute.xlu1 %5837 }
 0x399   : > { %v5833_v5 = vpop.permute.xlu0 %5832  ;;  %v5840_v48 = vunpack.i.h.bf16 %v5838_v22  ;;  %v5839_v20 = vunpack.i.l.bf16 %v5838_v22 }
 0x39a   : > { %v5835_v46 = vunpack.i.h.bf16 %v5833_v5  ;;  %v5834_v3 = vunpack.i.l.bf16 %v5833_v5  ;;  %v9344_v61 = vpop.permute.xlu2 %5882 }
 0x39b   : > { %v5884_v2 = vunpack.i.l.bf16 %v9344_v61 }
 0x39c   : > { %v4498_v6 = vsel %vm226_vm0, %v8820_v30, %v5835_v46  ;;  %v4497_v21 = vsel %vm226_vm0, %v6068_v59, %v5834_v3 }
 0x39d   : > { %v4529_v30 = vsel %vm866_vm5, %v4497_v21, %v5839_v20  ;;  %v4530_v45 = vsel %vm866_vm5, %v4498_v6, %v5840_v48  ;;  %v5865_v48 = vunpack.i.h.bf16 %v5863_v57  ;;  %v5864_v20 = vunpack.i.l.bf16 %v5863_v57 }
 0x39e   : > { %v4551_v49 = vpack.c.bf16 %v4530_v45, %v4529_v30  ;;  %v3792_v45 = vsel %vm226_vm0, %v8898_v28, %v5874_v1 }
 0x39f   : > { %v4499_v40 = vsel %vm226_vm0, %v8898_v28, %v5864_v20  ;;  %v9380_v28 = vld [vmem:[#allocation3 + $0x198] sm:$0xff] }
 0x3a0   : > { %v5848_v34 = vpop.permute.xlu1 %5847 }
 0x3a1   : > { %v5850_v24 = vunpack.i.h.bf16 %v5848_v34  ;;  %v5849_v51 = vunpack.i.l.bf16 %v5848_v34  ;;  %v5843_v36 = vpop.permute.xlu0 %5842  ;;  %v3086_v34 = vsel %vm226_vm0, %v6069_v8, %v5830_v35  ;;  %v9382_v35 = vld [vmem:[#allocation3 + $0x1a0] sm:$0xff] }
 0x3a2   : > { %v5845_v0 = vunpack.i.h.bf16 %v5843_v36  ;;  %v5844_v29 = vunpack.i.l.bf16 %v5843_v36 }
 0x3a4   : > { %v3791_v25 = vsel %vm226_vm0, %v6069_v8, %v5845_v0  ;;  %v3790_v43 = vsel %vm226_vm0, %v6068_v59, %v5844_v29  ;;  %v3793_v59 = vsel %vm226_vm0, %v8907_v23, %v5875_v18 }
 0x3a5   : > { %v9329_v52 = vsel %vm866_vm5, %v3790_v43, %v5849_v51  ;;  %v9332_v22 = vsel %vm866_vm5, %v3791_v25, %v5850_v24  ;;  %v4500_v24 = vsel %vm226_vm0, %v8907_v23, %v5865_v48  ;;  %v9370_v43 = vpop.f32.mrf.mxu1 }
 0x3a6   : > { %4944 = vmatmul.msk.bf16.gmra.mxu3 %vm922_vm6, %v3136_v47  ;;  %4959 = vmatmul.msk.bf16.gmra.mxu0 %vm922_vm6, %v3836_v60  ;;  %v3843_v5 = vpack.c.bf16 %v9332_v22, %v9329_v52  ;;  %v9348_v60 = vpop.f32.mrf.mxu3 }
 0x3a7   : > { %4987 = vmatmul.msk.bf16.gmra.mxu1 %vm922_vm6, %v4551_v49  ;;  %v5893_v49 = vpop.permute.xlu2 %5892 }
 0x3a8   : > { %v5853_v46 = vpop.permute.xlu1 %5852 }
 0x3a9   : > { %v5868_v3 = vpop.permute.xlu0 %5867  ;;  %v5855_v14 = vunpack.i.h.bf16 %v5853_v46  ;;  %v5854_v41 = vunpack.i.l.bf16 %v5853_v46 }
 0x3aa   : > { %v5870_v6 = vunpack.i.h.bf16 %v5868_v3  ;;  %v5869_v21 = vunpack.i.l.bf16 %v5868_v3 }
 0x3ab   : > { %v3117_v57 = vsel %vm866_vm5, %v3085_v32, %v5854_v41  ;;  %v3118_v51 = vsel %vm866_vm5, %v3086_v34, %v5855_v14  ;;  %v4200_v14 = vrot.slane %v9380_v28, 1  ;;  %v4201_v41 = vrot.slane %v9382_v35, 1 }
 0x3ac   : > { %v4531_v0 = vsel %vm866_vm5, %v4499_v40, %v5869_v21  ;;  %v4532_v11 = vsel %vm866_vm5, %v4500_v24, %v5870_v6  ;;  %v3137_v47 = vpack.c.bf16 %v3118_v51, %v3117_v57  ;;  %v4203_v6 = vrot.slane %v9384_v53, 1 }
 0x3ad   : > { %v4552_v46 = vpack.c.bf16 %v4532_v11, %v4531_v0  ;;  %v4202_v21 = vsel %vm480_vm3, %v4200_v14, %v4201_v41  ;;  %v9393_v32 = vpop.f32.mrf.mxu1  ;;  %v5895_v11 = vunpack.i.h.bf16 %v5893_v49 }
 0x3ae   : > { %v9386_v48 = vpop.f32.mrf.mxu3  ;;  %v4204_v18 = vsel %vm480_vm3, %v4201_v41, %v4203_v6 }
 0x3af   : > { %v5966_v57 = vpack.i.bf16 %v4204_v18, %v4202_v21  ;;  %v5908_v51 = vpop.permute.xlu2 %5907 }
 0x3b0   : > { %v5858_v55 = vpop.permute.xlu1 %5857 }
 0x3b1   : > { %v5878_v36 = vpop.permute.xlu0 %5877  ;;  %v5860_v1 = vunpack.i.h.bf16 %v5858_v55  ;;  %v5859_v34 = vunpack.i.l.bf16 %v5858_v55  ;;  %5967 = vrot.lane.b32.xlu1 %v5966_v57, %s6081_s20 }
 0x3b2   : > { %v5880_v29 = vunpack.i.h.bf16 %v5878_v36  ;;  %v5879_v30 = vunpack.i.l.bf16 %v5878_v36 }
 0x3b4   : > { %v9365_v8 = vsel %vm866_vm5, %v3792_v45, %v5879_v30  ;;  %v9368_v25 = vsel %vm866_vm5, %v3793_v59, %v5880_v29  ;;  %v5894_v29 = vunpack.i.l.bf16 %v5893_v49  ;;  %v3088_v30 = vsel %vm226_vm0, %v8907_v23, %v5860_v1  ;;  %v6070_v59 = vld [vmem:[#allocation3 + $0x138] sm:$0xff] }
 0x3b5   : > { %v3844_v3 = vpack.c.bf16 %v9368_v25, %v9365_v8  ;;  %v3087_v55 = vsel %vm226_vm0, %v6070_v59, %v5859_v34  ;;  %v5909_v49 = vunpack.i.l.bf16 %v5908_v51  ;;  %v9428_v57 = vpop.f32.mrf.mxu1  ;;  %v5885_v59 = vunpack.i.h.bf16 %v9344_v61 }
 0x3b6   : > { %4945 = vmatmul.msk.bf16.gmra.mxu3 %vm922_vm6, %v3137_v47  ;;  %4960 = vmatmul.msk.bf16.gmra.mxu0 %vm922_vm6, %v3837_v56  ;;  %v9407_v6 = vpop.f32.mrf.mxu3 }
 0x3b7   : > { %4988 = vmatmul.msk.bf16.gmra.mxu1 %vm922_vm6, %v4552_v46 }
 0x3b8   : > { %v5888_v20 = vpop.permute.xlu1 %5887 }
 0x3b9   : > { %v5898_v12 = vpop.permute.xlu0 %5897  ;;  %v5890_v4 = vunpack.i.h.bf16 %v5888_v20  ;;  %v5889_v56 = vunpack.i.l.bf16 %v5888_v20 }
 0x3ba   : > { %v5900_v24 = vunpack.i.h.bf16 %v5898_v12  ;;  %v5899_v40 = vunpack.i.l.bf16 %v5898_v12 }
 0x3bb   : > { %v4502_v36 = vsel %vm226_vm0, %v9001_v37, %v5890_v4  ;;  %v4501_v0 = vsel %vm226_vm0, %v8994_v54, %v5889_v56  ;;  %v5910_v4 = vunpack.i.h.bf16 %v5908_v51 }
 0x3bc   : > { %v3120_v47 = vsel %vm866_vm5, %v3088_v30, %v5900_v24  ;;  %v3119_v46 = vsel %vm866_vm5, %v3087_v55, %v5899_v40  ;;  %v4533_v12 = vsel %vm866_vm5, %v4501_v0, %v5894_v29  ;;  %v4534_v23 = vsel %vm866_vm5, %v4502_v36, %v5895_v11  ;;  %v5928_v36 = vpop.permute.xlu2 %5927 }
 0x3bd   : > { %v3138_v18 = vpack.c.bf16 %v3120_v47, %v3119_v46  ;;  %v4553_v34 = vpack.c.bf16 %v4534_v23, %v4533_v12  ;;  %v5930_v13 = vunpack.i.h.bf16 %v5928_v36  ;;  %v9445_v23 = vpop.f32.mrf.mxu1 }
 0x3be   : > { %v9431_v11 = vpop.f32.mrf.mxu3 }
 0x3c0   : > { %v5903_v45 = vpop.permute.xlu1 %5902 }
 0x3c1   : > { %v5905_v20 = vunpack.i.h.bf16 %v5903_v45  ;;  %v5904_v14 = vunpack.i.l.bf16 %v5903_v45  ;;  %v9405_v41 = vpop.permute.xlu0 %5912 }
 0x3c2   : > { %v5915_v63 = vunpack.i.h.bf16 %v9405_v41 }
 0x3c3   : > { %v3795_v56 = vsel %vm226_vm0, %v9001_v37, %v5905_v20  ;;  %v3794_v21 = vsel %vm226_vm0, %v8994_v54, %v5904_v14  ;;  %v3090_v20 = vsel %vm226_vm0, %v9001_v37, %v5885_v59  ;;  %v3089_v14 = vsel %vm226_vm0, %v8994_v54, %v5884_v2 }
 0x3c4   : > { %v9416_v1 = vsel %vm866_vm5, %v3794_v21, %v5909_v49  ;;  %v9419_v24 = vsel %vm866_vm5, %v3795_v56, %v5910_v4  ;;  %v3122_v61 = vsel %vm866_vm5, %v3090_v20, %v5930_v13  ;;  %v4376_v37 = vrot.slane %v9380_v28, 2  ;;  %v5943_v20 = vpop.permute.xlu2 %5942 }
 0x3c5   : > { %v3845_v40 = vpack.c.bf16 %v9419_v24, %v9416_v1  ;;  %v4377_v54 = vrot.slane %v9382_v35, 2 }
 0x3c6   : > { %4946 = vmatmul.msk.bf16.gmra.mxu3 %vm922_vm6, %v3138_v18  ;;  %4961 = vmatmul.msk.bf16.gmra.mxu0 %vm922_vm6, %v3838_v58  ;;  %v5929_v58 = vunpack.i.l.bf16 %v5928_v36 }
 0x3c7   : > { %4989 = vmatmul.msk.bf16.gmra.mxu1 %vm922_vm6, %v4553_v34  ;;  %v4378_v13 = vsel %vm657_vm4, %v4376_v37, %v4377_v54 }
 0x3c8   : > { %v5923_v51 = vpop.permute.xlu1 %5922  ;;  %v3121_v49 = vsel %vm866_vm5, %v3089_v14, %v5929_v58 }
 0x3c9   : > { %v5918_v0 = vpop.permute.xlu0 %5917  ;;  %v5925_v55 = vunpack.i.h.bf16 %v5923_v51  ;;  %v5924_v45 = vunpack.i.l.bf16 %v5923_v51 }
 0x3ca   : > { %v5920_v29 = vunpack.i.h.bf16 %v5918_v0  ;;  %v5919_v30 = vunpack.i.l.bf16 %v5918_v0  ;;  %v4379_v0 = vrot.slane %v9384_v53, 2 }
 0x3cc   : > { %v4504_v47 = vsel %vm226_vm0, %v9085_v50, %v5920_v29  ;;  %v4503_v46 = vsel %vm226_vm0, %v9079_v17, %v5919_v30  ;;  %v9452_v29 = vpop.f32.mrf.mxu3  ;;  %v3139_v30 = vpack.c.bf16 %v3122_v61, %v3121_v49  ;;  %v9475_v49 = vpop.f32.mrf.mxu1 }
 0x3cd   : > { %v4535_v18 = vsel %vm866_vm5, %v4503_v46, %v5924_v45  ;;  %v4536_v34 = vsel %vm866_vm5, %v4504_v47, %v5925_v55  ;;  %v4380_v55 = vsel %vm657_vm4, %v4377_v54, %v4379_v0  ;;  %v3092_v54 = vsel %vm226_vm0, %v9085_v50, %v5915_v63 }
 0x3ce   : > { %v4554_v58 = vpack.c.bf16 %v4536_v34, %v4535_v18  ;;  %v5971_v53 = vpack.i.bf16 %v4380_v55, %v4378_v13  ;;  %v10016_v34 = vld [vmem:[#allocation8_spill] sm:$0xff] }
 0x3d0   : > { %v5938_v12 = vpop.permute.xlu1 %5937  ;;  %5972 = vrot.lane.b32.xlu2 %v5971_v53, %s6082_s25 }
 0x3d1   : > { %v5940_v4 = vunpack.i.h.bf16 %v5938_v12  ;;  %v5939_v56 = vunpack.i.l.bf16 %v5938_v12  ;;  %v5933_v21 = vpop.permute.xlu0 %5932  ;;  %v9480_v12 = vld [vmem:[%s9700_s4] ss:$0 sm:$0xff] }
 0x3d2   : > { %v5935_v51 = vunpack.i.h.bf16 %v5933_v21  ;;  %v5934_v36 = vunpack.i.l.bf16 %v5933_v21  ;;  %v2583_v62 = vadd.f32 %v9480_v12, %v10018_v44 }
 0x3d4   : > { %v3797_v59 = vsel %vm226_vm0, %v9085_v50, %v5935_v51  ;;  %v3796_v2 = vsel %vm226_vm0, %v9079_v17, %v5934_v36  ;;  %v9482_v27 = vpop.f32.mrf.mxu3  ;;  %v2581_v51 = vadd.f32 %v9480_v12, %v10016_v34  ;;  %v3290_v34 = vadd.f32 %v9386_v48, %v2583_v62 }
 0x3d5   : > { %v9461_v45 = vsel %vm866_vm5, %v3796_v2, %v5939_v56  ;;  %v9464_v47 = vsel %vm866_vm5, %v3797_v59, %v5940_v4  ;;  %v5945_v4 = vunpack.i.h.bf16 %v5943_v20  ;;  %v5944_v56 = vunpack.i.l.bf16 %v5943_v20  ;;  %v4640_v20 = vpop.f32.mrf.mxu1 }
 0x3d6   : > { %4947 = vmatmul.msk.bf16.gmra.mxu3 %vm922_vm6, %v3139_v30  ;;  %4962 = vmatmul.msk.bf16.gmra.mxu0 %vm922_vm6, %v3839_v15  ;;  %v3846_v46 = vpack.c.bf16 %v9464_v47, %v9461_v45  ;;  %v5914_v15 = vunpack.i.l.bf16 %v9405_v41  ;;  %v3288_v13 = vadd.f32 %v9324_v10, %v2581_v51 }
 0x3d7   : > { %4990 = vmatmul.msk.bf16.gmra.mxu1 %vm922_vm6, %v4554_v58  ;;  %v4506_v30 = vsel %vm226_vm0, %v9163_v31, %v5945_v4  ;;  %v4505_v41 = vsel %vm226_vm0, %v9154_v7, %v5944_v56 }
 0x3d8   : > { %v5953_v14 = vpop.permute.xlu1 %5952  ;;  %v3091_v0 = vsel %vm226_vm0, %v9079_v17, %v5914_v15 }
 0x3d9   : > { %v5948_v61 = vpop.permute.xlu0 %5947  ;;  %v5955_v21 = vunpack.i.h.bf16 %v5953_v14  ;;  %v5954_v18 = vunpack.i.l.bf16 %v5953_v14 }
 0x3da   : > { %v5950_v36 = vunpack.i.h.bf16 %v5948_v61  ;;  %v5949_v37 = vunpack.i.l.bf16 %v5948_v61  ;;  %v10017_v61 = vld [vmem:[#allocation9_spill] sm:$0xff] }
 0x3db   : > { %v3123_v59 = vsel %vm866_vm5, %v3091_v0, %v5954_v18  ;;  %v3124_v2 = vsel %vm866_vm5, %v3092_v54, %v5955_v21  ;;  %v2582_v63 = vadd.f32 %v9480_v12, %v10017_v61 }
 0x3dc   : > { %v4537_v58 = vsel %vm866_vm5, %v4505_v41, %v5949_v37  ;;  %v4538_v50 = vsel %vm866_vm5, %v4506_v30, %v5950_v36  ;;  %v3140_v53 = vpack.c.bf16 %v3124_v2, %v3123_v59  ;;  %v3225_v7 = vpop.f32.mrf.mxu3  ;;  %v10019_v37 = vld [vmem:[#allocation7_spill] sm:$0xff] }
 0x3dd   : > { %v4555_v14 = vpack.c.bf16 %v4538_v50, %v4537_v58  ;;  %v4642_v21 = vpop.f32.mrf.mxu1  ;;  %v2584_v54 = vadd.f32 %v9480_v12, %v10019_v37 }
 0x3df   : > { %v3291_v48 = vadd.f32 %v9407_v6, %v2584_v54  ;;  %v10021_v6 = vld [vmem:[#allocation13_spill] sm:$0xff] }
 0x3e3   : > { %v3916_v55 = vpop.f32.mrf.mxu0 }
 0x3e4   : > { %v3996_v17 = vadd.f32 %v3916_v55, %v3288_v13  ;;  %v3228_v51 = vpop.f32.mrf.mxu3  ;;  %v10020_v13 = vld [vmem:[#allocation12_spill] sm:$0xff] }
 0x3e5   : > { %v4645_v30 = vpop.f32.mrf.mxu1  ;;  %v2585_v58 = vadd.f32 %v9480_v12, %v10020_v13  ;;  %v9576_v13 = vpop.permute.xlu2 %5957 }
 0x3e6   : > { %v4705_v15 = vadd.f32 %v9342_v39, %v3996_v17  ;;  %4948 = vmatmul.msk.bf16.gmra.mxu3 %vm922_vm6, %v3140_v53  ;;  %4963 = vmatmul.msk.bf16.gmra.mxu0 %vm922_vm6, %v3840_v19  ;;  %v3289_v39 = vadd.f32 %v9348_v60, %v2582_v63  ;;  %v2586_v53 = vadd.f32 %v9480_v12, %v10021_v6 }
 0x3e7   : > { %4991 = vmatmul.msk.bf16.gmra.mxu1 %vm922_vm6, %v4555_v14  ;;  %v3292_v38 = vadd.f32 %v9431_v11, %v2585_v58 }
 0x3e8   : > { %v4737_v10 = vmax.f32 %v4705_v15, 0.0  ;;  %v3293_v11 = vadd.f32 %v9452_v29, %v2586_v53  ;;  %v10023_v29 = vld [vmem:[#allocation5_spill] sm:$0xff] }
 0x3e9   : > { %v2588_v44 = vadd.f32 %v9480_v12, %v10023_v29  ;;  %v10028_v29 = vld [vmem:[#allocation18_spill] sm:$0xff] }
 0x3ea   : > { %4769 = vst.msk [vmem:[%s9514_s11] sm:$0xff] %vm226_vm0, %v4737_v10  ;;  %v10022_v10 = vld [vmem:[#allocation4_spill] sm:$0xff]  ;;  %v2593_v1 = vadd.f32 %v9480_v12, %v10028_v29  ;;  %v10034_v29 = vld [vmem:[#allocation26_spill] sm:$0xff] }
 0x3eb   : > { %v3918_v4 = vpop.f32.mrf.mxu0 }
 0x3ec   : > { %v3997_v56 = vadd.f32 %v3918_v4, %v3289_v39  ;;  %v3230_v2 = vpop.f32.mrf.mxu3  ;;  %v2587_v39 = vadd.f32 %v9480_v12, %v10022_v10  ;;  %v10027_v10 = vld [vmem:[#allocation15_spill] sm:$0xff] }
 0x3ed   : > { %v4647_v16 = vpop.f32.mrf.mxu1 }
 0x3ee   : > { %v4706_v19 = vadd.f32 %v9370_v43, %v3997_v56  ;;  %v3294_v33 = vadd.f32 %v9482_v27, %v2587_v39 }
 0x3f0   : > { %v4738_v18 = vmax.f32 %v4706_v19, 0.0 }
 0x3f2   : > { %4770 = vst.msk [vmem:[%s9514_s11 + $0x8] sm:$0xff] %vm226_vm0, %v4738_v18  ;;  %v3295_v18 = vadd.f32 %v3225_v7, %v2588_v44 }
 0x3f3   : > { %v3921_v36 = vpop.f32.mrf.mxu0 }
 0x3f4   : > { %v3998_v60 = vadd.f32 %v3921_v36, %v3290_v34 }
 0x3f5   : > { %v4650_v15 = vpop.f32.mrf.mxu1 }
 0x3f6   : > { %v4707_v0 = vadd.f32 %v9393_v32, %v3998_v60  ;;  %4964 = vmatmul.msk.bf16.gmra.mxu0 %vm922_vm6, %v3841_v26  ;;  %v10024_v60 = vld [vmem:[#allocation10_spill] sm:$0xff] }
 0x3f7   : > { %v2589_v37 = vadd.f32 %v9480_v12, %v10024_v60 }
 0x3f8   : > { %v4739_v43 = vmax.f32 %v4707_v0, 0.0 }
 0x3fa   : > { %4771 = vst.msk [vmem:[%s9514_s11 + $0x10] sm:$0xff] %vm226_vm0, %v4739_v43  ;;  %v3296_v43 = vadd.f32 %v3228_v51, %v2589_v37 }
 0x3fb   : > { %v3923_v41 = vpop.f32.mrf.mxu0 }
 0x3fc   : > { %v3999_v59 = vadd.f32 %v3923_v41, %v3291_v48  ;;  %v10025_v48 = vld [vmem:[#allocation11_spill] sm:$0xff] }
 0x3fd   : > { %v4652_v19 = vpop.f32.mrf.mxu1  ;;  %v2590_v7 = vadd.f32 %v9480_v12, %v10025_v48 }
 0x3fe   : > { %v4708_v32 = vadd.f32 %v9428_v57, %v3999_v59  ;;  %v3233_v57 = vpop.f32.mrf.mxu3 }
 0x400   : > { %v4740_v50 = vmax.f32 %v4708_v32, 0.0 }
 0x402   : > { %4772 = vst.msk [vmem:[%s9514_s11 + $0x18] sm:$0xff] %vm226_vm0, %v4740_v50  ;;  %v10026_v50 = vld [vmem:[#allocation14_spill] sm:$0xff] }
 0x403   : > { %v3926_v26 = vpop.f32.mrf.mxu0 }
 0x404   : > { %v4000_v55 = vadd.f32 %v3926_v26, %v3292_v38  ;;  %v2591_v38 = vadd.f32 %v9480_v12, %v10026_v50 }
 0x406   : > { %v4709_v17 = vadd.f32 %v9445_v23, %v4000_v55  ;;  %4965 = vmatmul.msk.bf16.gmra.mxu0 %vm922_vm6, %v3842_v9  ;;  %v3235_v56 = vpop.f32.mrf.mxu3  ;;  %v3298_v6 = vadd.f32 %v3233_v57, %v2591_v38  ;;  %v2592_v57 = vadd.f32 %v9480_v12, %v10027_v10 }
 0x408   : > { %v4741_v14 = vmax.f32 %v4709_v17, 0.0 }
 0x40a   : > { %4773 = vst.msk [vmem:[%s9514_s11 + $0x20] sm:$0xff] %vm226_vm0, %v4741_v14 }
 0x40b   : > { %v3928_v61 = vpop.f32.mrf.mxu0 }
 0x40c   : > { %v4001_v63 = vadd.f32 %v3928_v61, %v3293_v11 }
 0x40e   : > { %v4710_v23 = vadd.f32 %v9475_v49, %v4001_v63  ;;  %v3238_v27 = vpop.f32.mrf.mxu3 }
 0x410   : > { %v4742_v4 = vmax.f32 %v4710_v23, 0.0 }
 0x412   : > { %4774 = vst.msk [vmem:[%s9514_s11 + $0x28] sm:$0xff] %vm226_vm0, %v4742_v4 }
 0x413   : > { %v3931_v42 = vpop.f32.mrf.mxu0 }
 0x414   : > { %v4002_v9 = vadd.f32 %v3931_v42, %v3294_v33 }
 0x416   : > { %v4711_v62 = vadd.f32 %v4640_v20, %v4002_v9  ;;  %4966 = vmatmul.msk.bf16.gmra.mxu0 %vm922_vm6, %v3843_v5  ;;  %v4655_v20 = vpop.f32.mrf.mxu1  ;;  %v3240_v5 = vpop.f32.mrf.mxu3 }
 0x418   : > { %v4743_v49 = vmax.f32 %v4711_v62, 0.0  ;;  %v3300_v62 = vadd.f32 %v3238_v27, %v2593_v1  ;;  %v2599_v1 = vadd.f32 %v9480_v12, %v10034_v29 }
 0x41a   : > { %4775 = vst.msk [vmem:[%s9514_s11 + $0x30] sm:$0xff] %vm226_vm0, %v4743_v49 }
 0x41b   : > { %v3933_v34 = vpop.f32.mrf.mxu0 }
 0x41c   : > { %v4003_v36 = vadd.f32 %v3933_v34, %v3295_v18 }
 0x41e   : > { %v4712_v54 = vadd.f32 %v4642_v21, %v4003_v36  ;;  %v3297_v21 = vadd.f32 %v3230_v2, %v2590_v7  ;;  %v4657_v51 = vpop.f32.mrf.mxu1  ;;  %v3243_v55 = vpop.f32.mrf.mxu3  ;;  %v10029_v36 = vld [vmem:[#allocation19_spill] sm:$0xff] }
 0x420   : > { %v4744_v0 = vmax.f32 %v4712_v54, 0.0 }
 0x422   : > { %4776 = vst.msk [vmem:[%s9514_s11 + $0x38] sm:$0xff] %vm226_vm0, %v4744_v0  ;;  %v5963_v0 = vpop.permute.xlu0 %5962 }
 0x423   : > { %v3936_v52 = vpop.f32.mrf.mxu0  ;;  %v5968_v8 = vpop.permute.xlu1 %5967  ;;  %v5965_v48 = vunpack.i.h.bf16 %v5963_v0 }
 0x424   : > { %v4004_v22 = vadd.f32 %v3936_v52, %v3296_v43  ;;  %v5970_v2 = vunpack.i.h.bf16 %v5968_v8  ;;  %v5969_v53 = vunpack.i.l.bf16 %v5968_v8  ;;  %v5960_v43 = vunpack.i.h.bf16 %v9576_v13 }
 0x425   : > { %v5959_v52 = vunpack.i.l.bf16 %v9576_v13 }
 0x426   : > { %v4713_v41 = vadd.f32 %v4645_v30, %v4004_v22  ;;  %4967 = vmatmul.msk.bf16.gmra.mxu0 %vm922_vm6, %v3844_v3  ;;  %v4660_v61 = vpop.f32.mrf.mxu1  ;;  %v4508_v63 = vsel %vm226_vm0, %v9382_v35, %v5970_v2  ;;  %v3245_v35 = vpop.f32.mrf.mxu3 }
 0x428   : > { %v4745_v59 = vmax.f32 %v4713_v41, 0.0  ;;  %v10030_v41 = vld [vmem:[#allocation16_spill] sm:$0xff] }
 0x429   : > { %v2595_v45 = vadd.f32 %v9480_v12, %v10030_v41 }
 0x42a   : > { %4777 = vst.msk [vmem:[%s9514_s11 + $0x40] sm:$0xff] %vm226_vm0, %v4745_v59  ;;  %v5973_v25 = vpop.permute.xlu2 %5972 }
 0x42b   : > { %v3938_v58 = vpop.f32.mrf.mxu0  ;;  %v5975_v17 = vunpack.i.h.bf16 %v5973_v25  ;;  %v5974_v14 = vunpack.i.l.bf16 %v5973_v25 }
 0x42c   : > { %v4005_v32 = vadd.f32 %v3938_v58, %v3297_v21 }
 0x42d   : > { %v4540_v23 = vsel %vm866_vm5, %v4508_v63, %v5975_v17  ;;  %v10032_v17 = vld [vmem:[#allocation20_spill] sm:$0xff] }
 0x42e   : > { %v4714_v26 = vadd.f32 %v4647_v16, %v4005_v32  ;;  %v4507_v16 = vsel %vm226_vm0, %v9380_v28, %v5969_v53  ;;  %v3299_v28 = vadd.f32 %v3235_v56, %v2592_v57  ;;  %v3248_v49 = vpop.f32.mrf.mxu3  ;;  %v2594_v56 = vadd.f32 %v9480_v12, %v10029_v36  ;;  %v10035_v36 = vld [vmem:[#allocation27_spill] sm:$0xff] }
 0x42f   : > { %v4539_v4 = vsel %vm866_vm5, %v4507_v16, %v5974_v14  ;;  %v3302_v32 = vadd.f32 %v3243_v55, %v2595_v45  ;;  %v2597_v14 = vadd.f32 %v9480_v12, %v10032_v17 }
 0x430   : > { %v4746_v30 = vmax.f32 %v4714_v26, 0.0  ;;  %v4556_v33 = vpack.c.bf16 %v4540_v23, %v4539_v4 }
 0x431   : > { %v3304_v10 = vadd.f32 %v3248_v49, %v2597_v14 }
 0x432   : > { %4778 = vst.msk [vmem:[%s9514_s11 + $0x48] sm:$0xff] %vm226_vm0, %v4746_v30  ;;  %4992 = vmatmul.msk.bf16.gmra.mxu1 %vm922_vm6, %v4556_v33 }
 0x433   : > { %v3941_v3 = vpop.f32.mrf.mxu0 }
 0x434   : > { %v4006_v11 = vadd.f32 %v3941_v3, %v3298_v6  ;;  %v10031_v6 = vld [vmem:[#allocation17_spill] sm:$0xff] }
 0x436   : > { %v4715_v39 = vadd.f32 %v4650_v15, %v4006_v11  ;;  %4968 = vmatmul.msk.bf16.gmra.mxu0 %vm922_vm6, %v3845_v40  ;;  %v4662_v40 = vpop.f32.mrf.mxu1  ;;  %v3250_v7 = vpop.f32.mrf.mxu3 }
 0x438   : > { %v4747_v42 = vmax.f32 %v4715_v39, 0.0  ;;  %v10033_v39 = vld [vmem:[#allocation21_spill] sm:$0xff] }
 0x439   : > { %v2598_v23 = vadd.f32 %v9480_v12, %v10033_v39 }
 0x43a   : > { %4779 = vst.msk [vmem:[%s9514_s11 + $0x50] sm:$0xff] %vm226_vm0, %v4747_v42 }
 0x43b   : > { %v3943_v9 = vpop.f32.mrf.mxu0 }
 0x43c   : > { %v4007_v15 = vadd.f32 %v3943_v9, %v3299_v28  ;;  %v3305_v28 = vadd.f32 %v3250_v7, %v2598_v23 }
 0x43e   : > { %v4716_v24 = vadd.f32 %v4652_v19, %v4007_v15  ;;  %v4665_v54 = vpop.f32.mrf.mxu1  ;;  %v3301_v19 = vadd.f32 %v3240_v5, %v2594_v56  ;;  %v6071_v5 = vld [vmem:[#allocation3 + $0x180] sm:$0xff]  ;;  %v2600_v56 = vadd.f32 %v9480_v12, %v10035_v36 }
 0x43f   : > { %v3798_v59 = vsel %vm226_vm0, %v6071_v5, %v5959_v52  ;;  %v10036_v52 = vld [vmem:[#allocation23_spill] sm:$0xff] }
 0x440   : > { %v4748_v44 = vmax.f32 %v4716_v24, 0.0 }
 0x442   : > { %4780 = vst.msk [vmem:[%s9514_s11 + $0x58] sm:$0xff] %vm226_vm0, %v4748_v44 }
 0x443   : > { %v3946_v18 = vpop.f32.mrf.mxu0 }
 0x444   : > { %v4008_v34 = vadd.f32 %v3946_v18, %v3300_v62 }
 0x446   : > { %v4717_v60 = vadd.f32 %v4655_v20, %v4008_v34  ;;  %4969 = vmatmul.msk.bf16.gmra.mxu0 %vm922_vm6, %v3846_v46  ;;  %v5964_v20 = vunpack.i.l.bf16 %v5963_v0  ;;  %v3799_v46 = vsel %vm226_vm0, %v9163_v31, %v5960_v43  ;;  %v4667_v50 = vpop.f32.mrf.mxu1  ;;  %v2596_v31 = vadd.f32 %v9480_v12, %v10031_v6 }
 0x447   : > { %v3831_v13 = vsel %vm866_vm5, %v3799_v46, %v5965_v48  ;;  %v10037_v46 = vld [vmem:[#allocation24_spill] sm:$0xff] }
 0x448   : > { %v4749_v37 = vmax.f32 %v4717_v60, 0.0  ;;  %v3830_v58 = vsel %vm866_vm5, %v3798_v59, %v5964_v20  ;;  %v3303_v3 = vadd.f32 %v3245_v35, %v2596_v31  ;;  %v2602_v5 = vadd.f32 %v9480_v12, %v10037_v46 }
 0x449   : > { %v3847_v26 = vpack.c.bf16 %v3831_v13, %v3830_v58 }
 0x44a   : > { %4781 = vst.msk [vmem:[%s9514_s11 + $0x60] sm:$0xff] %vm226_vm0, %v4749_v37 }
 0x44b   : > { %v3948_v27 = vpop.f32.mrf.mxu0 }
 0x44c   : > { %v4009_v22 = vadd.f32 %v3948_v27, %v3301_v19 }
 0x44e   : > { %v4718_v47 = vadd.f32 %v4657_v51, %v4009_v22  ;;  %v3253_v51 = vpop.f32.mrf.mxu3  ;;  %v4670_v53 = vpop.f32.mrf.mxu1  ;;  %v2601_v22 = vadd.f32 %v9480_v12, %v10036_v52 }
 0x44f   : > { %v3306_v62 = vadd.f32 %v3253_v51, %v2599_v1 }
 0x450   : > { %v4750_v21 = vmax.f32 %v4718_v47, 0.0 }
 0x452   : > { %4782 = vst.msk [vmem:[%s9514_s11 + $0x68] sm:$0xff] %vm226_vm0, %v4750_v21 }
 0x453   : > { %v3951_v38 = vpop.f32.mrf.mxu0 }
 0x454   : > { %v4010_v30 = vadd.f32 %v3951_v38, %v3302_v32  ;;  %v10038_v38 = vld [vmem:[#allocation30_spill] sm:$0xff] }
 0x456   : > { %v4719_v8 = vadd.f32 %v4660_v61, %v4010_v30  ;;  %4970 = vmatmul.msk.bf16.gmra.mxu0 %vm922_vm6, %v3847_v26  ;;  %v3255_v63 = vpop.f32.mrf.mxu3  ;;  %v4672_v33 = vpop.f32.mrf.mxu1  ;;  %v2603_v26 = vadd.f32 %v9480_v12, %v10038_v38 }
 0x458   : > { %v4751_v25 = vmax.f32 %v4719_v8, 0.0 }
 0x45a   : > { %4783 = vst.msk [vmem:[%s9514_s11 + $0x70] sm:$0xff] %vm226_vm0, %v4751_v25 }
 0x45b   : > { %v3953_v2 = vpop.f32.mrf.mxu0 }
 0x45c   : > { %v4011_v55 = vadd.f32 %v3953_v2, %v3303_v3  ;;  %v10039_v2 = vld [vmem:[#allocation31_spill] sm:$0xff] }
 0x45e   : > { %v4720_v11 = vadd.f32 %v4662_v40, %v4011_v55  ;;  %v3258_v35 = vpop.f32.mrf.mxu3  ;;  %v4675_v44 = vpop.f32.mrf.mxu1  ;;  %v2604_v55 = vadd.f32 %v9480_v12, %v10039_v2 }
 0x45f   : > { %v3308_v7 = vadd.f32 %v3258_v35, %v2601_v22 }
 0x460   : > { %v4752_v16 = vmax.f32 %v4720_v11, 0.0 }
 0x462   : > { %4784 = vst.msk [vmem:[%s9514_s11 + $0x78] sm:$0xff] %vm226_vm0, %v4752_v16 }
 0x463   : > { %v3956_v61 = vpop.f32.mrf.mxu0 }
 0x464   : > { %v4012_v57 = vadd.f32 %v3956_v61, %v3304_v10  ;;  %v10040_v61 = vld [vmem:[#allocation38_spill] sm:$0xff] }
 0x466   : > { %v4721_v4 = vadd.f32 %v4665_v54, %v4012_v57  ;;  %v3260_v49 = vpop.f32.mrf.mxu3  ;;  %v3307_v54 = vadd.f32 %v3255_v63, %v2600_v56  ;;  %v4677_v19 = vpop.f32.mrf.mxu1  ;;  %v2605_v57 = vadd.f32 %v9480_v12, %v10040_v61 }
 0x467   : > { %v3309_v13 = vadd.f32 %v3260_v49, %v2602_v5  ;;  %v10042_v49 = vld [vmem:[#allocation34_spill] sm:$0xff] }
 0x468   : > { %v4753_v42 = vmax.f32 %v4721_v4, 0.0 }
 0x46a   : > { %4785 = vst.msk [vmem:[%s9514_s11 + $0x80] sm:$0xff] %vm226_vm0, %v4753_v42 }
 0x46b   : > { %v3958_v9 = vpop.f32.mrf.mxu0 }
 0x46c   : > { %v4013_v15 = vadd.f32 %v3958_v9, %v3305_v28  ;;  %v10041_v9 = vld [vmem:[#allocation39_spill] sm:$0xff] }
 0x46e   : > { %v4722_v24 = vadd.f32 %v4667_v50, %v4013_v15  ;;  %v3263_v43 = vpop.f32.mrf.mxu3  ;;  %v4680_v47 = vpop.f32.mrf.mxu1  ;;  %v2606_v15 = vadd.f32 %v9480_v12, %v10041_v9 }
 0x46f   : > { %v3310_v8 = vadd.f32 %v3263_v43, %v2603_v26 }
 0x470   : > { %v4754_v40 = vmax.f32 %v4722_v24, 0.0 }
 0x472   : > { %4786 = vst.msk [vmem:[%s9514_s11 + $0x88] sm:$0xff] %vm226_vm0, %v4754_v40 }
 0x473   : > { %v3961_v18 = vpop.f32.mrf.mxu0 }
 0x474   : > { %v4014_v34 = vadd.f32 %v3961_v18, %v3306_v62  ;;  %v2607_v18 = vadd.f32 %v9480_v12, %v10042_v49 }
 0x476   : > { %v4723_v60 = vadd.f32 %v4670_v53, %v4014_v34  ;;  %v3265_v21 = vpop.f32.mrf.mxu3  ;;  %v4682_v51 = vpop.f32.mrf.mxu1 }
 0x477   : > { %v3311_v11 = vadd.f32 %v3265_v21, %v2604_v55 }
 0x478   : > { %v4755_v37 = vmax.f32 %v4723_v60, 0.0 }
 0x47a   : > { %4787 = vst.msk [vmem:[%s9514_s11 + $0x90] sm:$0xff] %vm226_vm0, %v4755_v37 }
 0x47b   : > { %v3963_v0 = vpop.f32.mrf.mxu0 }
 0x47c   : > { %v4015_v27 = vadd.f32 %v3963_v0, %v3307_v54 }
 0x47e   : > { %v4724_v48 = vadd.f32 %v4672_v33, %v4015_v27  ;;  %v3268_v31 = vpop.f32.mrf.mxu3  ;;  %v4685_v14 = vpop.f32.mrf.mxu1 }
 0x47f   : > { %v3312_v4 = vadd.f32 %v3268_v31, %v2605_v57 }
 0x480   : > { %v4756_v20 = vmax.f32 %v4724_v48, 0.0 }
 0x482   : > { %4788 = vst.msk [vmem:[%s9514_s11 + $0x98] sm:$0xff] %vm226_vm0, %v4756_v20 }
 0x483   : > { %v3966_v41 = vpop.f32.mrf.mxu0 }
 0x484   : > { %v4016_v45 = vadd.f32 %v3966_v41, %v3308_v7  ;;  %v10044_v41 = vld [vmem:[#allocation42_spill] sm:$0xff] }
 0x486   : > { %v4725_v59 = vadd.f32 %v4675_v44, %v4016_v45  ;;  %v3270_v63 = vpop.f32.mrf.mxu3  ;;  %v4687_v33 = vpop.f32.mrf.mxu1  ;;  %v2609_v45 = vadd.f32 %v9480_v12, %v10044_v41 }
 0x487   : > { %v3313_v24 = vadd.f32 %v3270_v63, %v2606_v15  ;;  %v10047_v63 = vld [vmem:[#allocation40_spill] sm:$0xff] }
 0x488   : > { %v4757_v58 = vmax.f32 %v4725_v59, 0.0 }
 0x48a   : > { %4789 = vst.msk [vmem:[%s9514_s11 + $0xa0] sm:$0xff] %vm226_vm0, %v4757_v58 }
 0x48b   : > { %v3968_v32 = vpop.f32.mrf.mxu0 }
 0x48c   : > { %v4017_v50 = vadd.f32 %v3968_v32, %v3309_v13  ;;  %v10045_v32 = vld [vmem:[#allocation43_spill] sm:$0xff] }
 0x48e   : > { %v4726_v30 = vadd.f32 %v4677_v19, %v4017_v50  ;;  %v3273_v28 = vpop.f32.mrf.mxu3  ;;  %v4690_v62 = vpop.f32.mrf.mxu1  ;;  %v10043_v19 = vld [vmem:[#allocation35_spill] sm:$0xff]  ;;  %v2610_v50 = vadd.f32 %v9480_v12, %v10045_v32 }
 0x48f   : > { %v3314_v60 = vadd.f32 %v3273_v28, %v2607_v18  ;;  %v2608_v0 = vadd.f32 %v9480_v12, %v10043_v19 }
 0x490   : > { %v4758_v6 = vmax.f32 %v4726_v30, 0.0 }
 0x492   : > { %4790 = vst.msk [vmem:[%s9514_s11 + $0xa8] sm:$0xff] %vm226_vm0, %v4758_v6 }
 0x493   : > { %v3971_v25 = vpop.f32.mrf.mxu0 }
 0x494   : > { %v4018_v3 = vadd.f32 %v3971_v25, %v3310_v8  ;;  %v10046_v25 = vld [vmem:[#allocation32_spill] sm:$0xff] }
 0x496   : > { %v4727_v53 = vadd.f32 %v4680_v47, %v4018_v3  ;;  %v3275_v36 = vpop.f32.mrf.mxu3  ;;  %v4692_v43 = vpop.f32.mrf.mxu1  ;;  %v2611_v3 = vadd.f32 %v9480_v12, %v10046_v25 }
 0x497   : > { %v3315_v48 = vadd.f32 %v3275_v36, %v2608_v0 }
 0x498   : > { %v4759_v17 = vmax.f32 %v4727_v53, 0.0 }
 0x49a   : > { %4791 = vst.msk [vmem:[%s9514_s11 + $0xb0] sm:$0xff] %vm226_vm0, %v4759_v17 }
 0x49b   : > { %v3973_v16 = vpop.f32.mrf.mxu0 }
 0x49c   : > { %v4019_v10 = vadd.f32 %v3973_v16, %v3311_v11  ;;  %v2612_v16 = vadd.f32 %v9480_v12, %v10047_v63 }
 0x49e   : > { %v4728_v39 = vadd.f32 %v4682_v51, %v4019_v10  ;;  %v3278_v22 = vpop.f32.mrf.mxu3  ;;  %v4695_v5 = vpop.f32.mrf.mxu1 }
 0x49f   : > { %v3316_v59 = vadd.f32 %v3278_v22, %v2609_v45 }
 0x4a0   : > { %v4760_v23 = vmax.f32 %v4728_v39, 0.0 }
 0x4a2   : > { %4792 = vst.msk [vmem:[%s9514_s11 + $0xb8] sm:$0xff] %vm226_vm0, %v4760_v23 }
 0x4a3   : > { %v3976_v42 = vpop.f32.mrf.mxu0 }
 0x4a4   : > { %v4020_v35 = vadd.f32 %v3976_v42, %v3312_v4 }
 0x4a6   : > { %v4729_v29 = vadd.f32 %v4685_v14, %v4020_v35  ;;  %v3280_v21 = vpop.f32.mrf.mxu3  ;;  %v4697_v51 = vpop.f32.mrf.mxu1 }
 0x4a7   : > { %v3317_v30 = vadd.f32 %v3280_v21, %v2610_v50 }
 0x4a8   : > { %v4761_v1 = vmax.f32 %v4729_v29, 0.0 }
 0x4aa   : > { %4793 = vst.msk [vmem:[%s9514_s11 + $0xc0] sm:$0xff] %vm226_vm0, %v4761_v1 }
 0x4ab   : > { %v3978_v40 = vpop.f32.mrf.mxu0 }
 0x4ac   : > { %v4021_v44 = vadd.f32 %v3978_v40, %v3313_v24 }
 0x4ae   : > { %v4730_v34 = vadd.f32 %v4687_v33, %v4021_v44  ;;  %v3283_v8 = vpop.f32.mrf.mxu3 }
 0x4af   : > { %v3318_v53 = vadd.f32 %v3283_v8, %v2611_v3  ;;  %v4700_v17 = vpop.f32.mrf.mxu1 }
 0x4b0   : > { %v4762_v56 = vmax.f32 %v4730_v34, 0.0 }
 0x4b2   : > { %4794 = vst.msk [vmem:[%s9514_s11 + $0xc8] sm:$0xff] %vm226_vm0, %v4762_v56 }
 0x4b3   : > { %v3981_v37 = vpop.f32.mrf.mxu0 }
 0x4b4   : > { %v4022_v54 = vadd.f32 %v3981_v37, %v3314_v60 }
 0x4b6   : > { %v4731_v27 = vadd.f32 %v4690_v62, %v4022_v54  ;;  %v3285_v61 = vpop.f32.mrf.mxu3 }
 0x4b7   : > { %v3319_v39 = vadd.f32 %v3285_v61, %v2612_v16  ;;  %v4702_v33 = vpop.f32.mrf.mxu1 }
 0x4b8   : > { %v4763_v52 = vmax.f32 %v4731_v27, 0.0 }
 0x4ba   : > { %4795 = vst.msk [vmem:[%s9514_s11 + $0xd0] sm:$0xff] %vm226_vm0, %v4763_v52 }
 0x4bb   : > { %v3983_v20 = vpop.f32.mrf.mxu0 }
 0x4bc   : > { %v4023_v7 = vadd.f32 %v3983_v20, %v3315_v48 }
 0x4be   : > { %v4732_v47 = vadd.f32 %v4692_v43, %v4023_v7 }
 0x4c0   : > { %v4764_v46 = vmax.f32 %v4732_v47, 0.0 }
 0x4c2   : > { %4796 = vst.msk [vmem:[%s9514_s11 + $0xd8] sm:$0xff] %vm226_vm0, %v4764_v46 }
 0x4c3   : > { %v3986_v58 = vpop.f32.mrf.mxu0 }
 0x4c4   : > { %v4024_v13 = vadd.f32 %v3986_v58, %v3316_v59 }
 0x4c6   : > { %v4733_v38 = vadd.f32 %v4695_v5, %v4024_v13 }
 0x4c8   : > { %v4765_v26 = vmax.f32 %v4733_v38, 0.0 }
 0x4ca   : > { %4797 = vst.msk [vmem:[%s9514_s11 + $0xe0] sm:$0xff] %vm226_vm0, %v4765_v26 }
 0x4cb   : > { %v3988_v6 = vpop.f32.mrf.mxu0 }
 0x4cc   : > { %v4025_v31 = vadd.f32 %v3988_v6, %v3317_v30 }
 0x4ce   : > { %v4734_v2 = vadd.f32 %v4697_v51, %v4025_v31 }
 0x4d0   : > { %v4766_v55 = vmax.f32 %v4734_v2, 0.0 }
 0x4d2   : > { %4798 = vst.msk [vmem:[%s9514_s11 + $0xe8] sm:$0xff] %vm226_vm0, %v4766_v55 }
 0x4d3   : > { %v3991_v14 = vpop.f32.mrf.mxu0 }
 0x4d4   : > { %v4026_v11 = vadd.f32 %v3991_v14, %v3318_v53 }
 0x4d6   : > { %v4735_v10 = vadd.f32 %v4700_v17, %v4026_v11 }
 0x4d8   : > { %v4767_v57 = vmax.f32 %v4735_v10, 0.0 }
 0x4da   : > { %4799 = vst.msk [vmem:[%s9514_s11 + $0xf0] sm:$0xff] %vm226_vm0, %v4767_v57 }
 0x4db   : > { %v3993_v23 = vpop.f32.mrf.mxu0 }
 0x4dc   : > { %v4027_v4 = vadd.f32 %v3993_v23, %v3319_v39 }
 0x4de   : > { %v4736_v42 = vadd.f32 %v4702_v33, %v4027_v4 }
 0x4e0   : > { %v4768_v35 = vmax.f32 %v4736_v42, 0.0 }
 0x4e2   : > { %4800 = vst.msk [vmem:[%s9514_s11 + $0xf8] sm:$0xff] %vm226_vm0, %v4768_v35 }
 0x4e3 PF: > { %s15_s18 = sadd.s32 1, %s6078_s18  }
 0x4e4   : > { %p12_p4 = scmp.ge.s32.totalorder %s15_s18, 4  }
 0x4e6   :  { %14 = sbr.rel (!%p12_p4) target bundleno = 1 (0x1), region = 80 }

</bundles_post_ra>
